<compile_context>
chip_gen: v6e
topology: v6e:2x2x1
jax: 0.10.0
libtpu: 0.0.40
codegen_flags: <defaults>
</compile_context>

<pallas_src>
import jax
import jax.numpy as jnp
from jax.experimental import pallas as pl
from jax.experimental.pallas import tpu as pltpu

ENERGY_STD = 0.1062          # same constant as the PyTorch script
CUTOFF = 5.0                 # stands in for args.cutoff
SIGMA2 = 1.0                 # width of the surrogate Gaussian pair potential
N_PAD = 8                    # atoms per molecule, padded to a sublane multiple
HIDDEN = 32                  # surrogate embedding width (folded away on host)
LANE_TILE = 512              # molecules per grid step (lane axis; sweep 512-2048)

_CUTOFF2 = CUTOFF * CUTOFF
_PAIR_E_SCALE = 0.5 * ENERGY_STD            # each pair counted once
_FORCE_SCALE = (2.0 / SIGMA2) * ENERGY_STD  # -dE/dr coefficient, ENERGY_STD folded
_NEG_INV_SIGMA2 = -1.0 / SIGMA2


def se3_energy_kernel(w_node_ref, natoms_ref, sp_ref, pos_ref, e_ref, f_ref):
    """One grid step = LANE_TILE molecules.
    Layout: atoms on sublanes, molecules on lanes, xyz leading; tile dim is size-1."""
    n = natoms_ref[0]                                   # (1, TB)   int32 atoms/mol
    sp = sp_ref[0]                                      # (Np, TB)  int32 species idx
    pos = pos_ref[0]                                    # (3, Np, TB) f32 positions
    px, py, pz = pos[0], pos[1], pos[2]                 # (Np, TB) each

    atom_idx = jax.lax.broadcasted_iota(jnp.int32, (N_PAD, LANE_TILE), 0)
    valid = atom_idx < n                                # (Np, TB) padding mask

    # --- per-atom node energy: w_node[species] (ENERGY_STD pre-folded on host) ----
    w0 = w_node_ref[0]
    w1 = w_node_ref[1]
    w2 = w_node_ref[2]
    w3 = w_node_ref[3]
    e_node = jnp.where(sp == 0, w0,
             jnp.where(sp == 1, w1,
             jnp.where(sp == 2, w2, w3)))
    e_node = jnp.where(valid, e_node, 0.0)              # (Np, TB)

    # --- radius graph + pair energy + forces, per-j accumulation on the VPU -------
    # Never materializes (Np, Np, TB): live set stays a few (Np, TB) tiles.
    rowsum = jnp.zeros((N_PAD, LANE_TILE), jnp.float32)
    fx = jnp.zeros((N_PAD, LANE_TILE), jnp.float32)
    fy = jnp.zeros((N_PAD, LANE_TILE), jnp.float32)
    fz = jnp.zeros((N_PAD, LANE_TILE), jnp.float32)

    for j in range(N_PAD):                              # static, fully unrolled
        dx = px - px[j:j + 1, :]                        # (Np, TB)
        dy = py - py[j:j + 1, :]
        dz = pz - pz[j:j + 1, :]
        d2 = dx * dx + dy * dy + dz * dz
        edge = valid & valid[j:j + 1, :] & (atom_idx != j) & (d2 < _CUTOFF2)
        pair_j = jnp.where(edge, jnp.exp(d2 * _NEG_INV_SIGMA2), 0.0)
        rowsum = rowsum + pair_j                        # sum_j pair_ij
        fx = fx + pair_j * dx                           # sum_j pair_ij * (r_i - r_j)
        fy = fy + pair_j * dy
        fz = fz + pair_j * dz

    # --- total energy per molecule (pairs counted once), lane-dense store ---------
    e_ref[0] = (jnp.sum(e_node, axis=0, keepdims=True)
                + _PAIR_E_SCALE * jnp.sum(rowsum, axis=0, keepdims=True))   # (1, TB)

    # --- analytic forces: F_i = (2/sigma^2) * ENERGY_STD * sum_j pair_ij (r_i-r_j) -
    f_ref[0, 0] = _FORCE_SCALE * fx
    f_ref[0, 1] = _FORCE_SCALE * fy
    f_ref[0, 2] = _FORCE_SCALE * fz


def se3_forward(w_node, n_atoms, species_idx, positions):
    """Batch-major inputs:
       w_node (4,) f32 (ENERGY_STD folded, goes to SMEM), n_atoms (B,) int32,
       species_idx (B, N_PAD) int32, positions (B, N_PAD, 3) f32.
    Returns energy (B,) and forces (B, N_PAD, 3), both already * ENERGY_STD."""
    b = positions.shape[0]
    num_tiles = pl.cdiv(b, LANE_TILE)
    bp = num_tiles * LANE_TILE
    pad = bp - b

    # pad the batch (padded molecules get n_atoms = 0 -> zero energy / forces)
    n_p = jnp.pad(n_atoms, (0, pad))
    sp_p = jnp.pad(species_idx, ((0, pad), (0, 0)))
    pos_p = jnp.pad(positions, ((0, pad), (0, 0), (0, 0)))

    # contiguous per-tile HBM slabs: (tiles, C, N_PAD, LANE_TILE), molecules on lanes
    n_t = n_p.reshape(num_tiles, 1, LANE_TILE)
    sp_t = sp_p.reshape(num_tiles, LANE_TILE, N_PAD).transpose(0, 2, 1)
    pos_t = pos_p.reshape(num_tiles, LANE_TILE, N_PAD, 3).transpose(0, 3, 2, 1)

    e_t, f_t = pl.pallas_call(
        se3_energy_kernel,
        out_shape=(jax.ShapeDtypeStruct((num_tiles, 1, LANE_TILE), jnp.float32),
                   jax.ShapeDtypeStruct((num_tiles, 3, N_PAD, LANE_TILE), jnp.float32)),
        grid_spec=pltpu.PrefetchScalarGridSpec(
            num_scalar_prefetch=0,
            grid=(num_tiles,),
            in_specs=[
                pl.BlockSpec(memory_space=pltpu.MemorySpace.SMEM),               # w_node
                pl.BlockSpec((1, 1, LANE_TILE), lambda t: (t, 0, 0)),            # n_atoms
                pl.BlockSpec((1, N_PAD, LANE_TILE), lambda t: (t, 0, 0)),        # species idx
                pl.BlockSpec((1, 3, N_PAD, LANE_TILE), lambda t: (t, 0, 0, 0)),  # positions
            ],
            out_specs=(
                pl.BlockSpec((1, 1, LANE_TILE), lambda t: (t, 0, 0)),            # energy
                pl.BlockSpec((1, 3, N_PAD, LANE_TILE), lambda t: (t, 0, 0, 0)),  # forces
            ),
        ),
        compiler_params=pltpu.CompilerParams(
            dimension_semantics=("parallel",)),   # v7x: 2 TCs split the batch tiles
    )(w_node, n_t, sp_t, pos_t)

    energy = e_t.reshape(bp)[:b]
    forces = f_t.transpose(0, 3, 2, 1).reshape(bp, N_PAD, 3)[:b]
    return energy, forces


def se3_reference(w_node, n_atoms, species_idx, positions):
    """Pure-JAX reference of the same surrogate model (batch-major layout)."""
    valid = jnp.arange(N_PAD)[None, :] < n_atoms[:, None]             # (B, Np)
    e_node = w_node[species_idx] * valid                              # (B, Np)
    diff = positions[:, :, None, :] - positions[:, None, :, :]        # (B, Np, Np, 3)
    d2 = jnp.sum(diff * diff, axis=-1)
    idx = jnp.arange(N_PAD)
    edge = ((idx[:, None] != idx[None, :])[None]
            & valid[:, :, None] & valid[:, None, :] & (d2 < _CUTOFF2))
    pair = jnp.where(edge, jnp.exp(-d2 / SIGMA2), 0.0)
    energy = jnp.sum(e_node, axis=-1) + _PAIR_E_SCALE * jnp.sum(pair, axis=(1, 2))
    forces = _FORCE_SCALE * jnp.sum(pair[..., None] * diff, axis=2)   # (B, Np, 3)
    return energy, forces


if __name__ == "__main__":
    key = jax.random.PRNGKey(0)
    k_pos, k_w1, k_w2 = jax.random.split(key, 3)

    # --- exact SE3Module species encoding: eye(4) one-hot rows <-> index lookup ---
    species = ['H', 'H']
    species_index = {'H': 0, 'C': 1, 'N': 2, 'O': 3}
    sp_mol = jnp.array([species_index[a] for a in species], jnp.int32)   # (2,)
    n_atoms_mol = int(sp_mol.shape[0])

    # batch of molecules (same species list, different geometries); deliberately NOT
    # a multiple of LANE_TILE to exercise the padding path, and > LANE_TILE so the
    # grid has 2 steps (keeps both v7x TensorCores busy)
    batch = 600
    positions = jax.random.normal(k_pos, (batch, n_atoms_mol, 3), jnp.float32)

    sp_b = jnp.zeros((batch, N_PAD), jnp.int32).at[:, :n_atoms_mol].set(sp_mol[None])
    pos_b = jnp.zeros((batch, N_PAD, 3), jnp.float32).at[:, :n_atoms_mol, :].set(positions)
    natoms_b = jnp.full((batch,), n_atoms_mol, jnp.int32)

    # deterministic surrogate-model parameters; one_hot(eye4) @ (w1 @ w2.T) folds
    # exactly to w_node[species_index]; ENERGY_STD folded in as well
    w1 = jax.random.normal(k_w1, (4, HIDDEN), jnp.float32) * 0.1      # embed
    w2 = jax.random.normal(k_w2, (1, HIDDEN), jnp.float32) * 0.1      # readout
    w_node = (w1 @ w2.T).reshape(4) * ENERGY_STD                      # (4,)

    e, f = se3_forward(w_node, natoms_b, sp_b, pos_b)
    jax.block_until_ready((e, f))

    # --- check against pure-JAX reference --------------------------------------
    e_exp, f_exp = se3_reference(w_node, natoms_b, sp_b, pos_b)
    err_e = float(jnp.max(jnp.abs(e - e_exp)))
    err_f = float(jnp.max(jnp.abs(f - f_exp)))
    assert err_e < 1e-4, f"energy mismatch {err_e}"
    assert err_f < 1e-4, f"forces mismatch {err_f}"

    # mirrors `return ((energy * ENERGY_STD).item(), forces * ENERGY_STD)`
    energy_item = float(e[0])
    forces_out = f[0, :n_atoms_mol]

    assert forces_out.shape == (n_atoms_mol, 3)
    assert jnp.isfinite(e).all() and jnp.isfinite(f).all()
    print("KERNEL_OK")
</pallas_src>

<mosaic_0001>
module attributes {stable_mosaic.version = 11 : i64} {
  func.func @se3_energy_kernel(%arg0: i32, %arg1: memref<4xf32, #tpu.memory_space<smem>>, %arg2: memref<1x1x512xi32, #tpu.memory_space<vmem>>, %arg3: memref<1x8x512xi32, #tpu.memory_space<vmem>>, %arg4: memref<1x3x8x512xf32, #tpu.memory_space<vmem>>, %arg5: memref<1x1x512xf32, #tpu.memory_space<vmem>>, %arg6: memref<1x3x8x512xf32, #tpu.memory_space<vmem>>) attributes {dimension_semantics = [#tpu.dimension_semantics<parallel>], iteration_bounds = array<i64: 2>, scalar_prefetch = 0 : i64, scratch_operands = 0 : i64, tpu.core_type = #tpu.core_type<tc>, window_params = [{transform_indices = @transform_0, window_bounds = array<i64: 4>}, {transform_indices = @transform_1, window_bounds = array<i64: 1, 1, 512>}, {transform_indices = @transform_2, window_bounds = array<i64: 1, 8, 512>}, {transform_indices = @transform_3, window_bounds = array<i64: 1, 3, 8, 512>}, {transform_indices = @transform_4, window_bounds = array<i64: 1, 1, 512>}, {transform_indices = @transform_5, window_bounds = array<i64: 1, 3, 8, 512>}]} {
    %c0 = arith.constant 0 : index
    %c0_0 = arith.constant 0 : index
    %c0_1 = arith.constant 0 : index
    %0 = vector.load %arg2[%c0, %c0_0, %c0_1] : memref<1x1x512xi32, #tpu.memory_space<vmem>>, vector<1x1x512xi32>
    %1 = vector.shape_cast %0 : vector<1x1x512xi32> to vector<1x512xi32>
    %c0_2 = arith.constant 0 : index
    %c0_3 = arith.constant 0 : index
    %c0_4 = arith.constant 0 : index
    %2 = vector.load %arg3[%c0_2, %c0_3, %c0_4] : memref<1x8x512xi32, #tpu.memory_space<vmem>>, vector<1x8x512xi32>
    %3 = vector.shape_cast %2 : vector<1x8x512xi32> to vector<8x512xi32>
    %c0_5 = arith.constant 0 : index
    %c0_6 = arith.constant 0 : index
    %c0_7 = arith.constant 0 : index
    %c0_8 = arith.constant 0 : index
    %4 = vector.load %arg4[%c0_5, %c0_6, %c0_7, %c0_8] : memref<1x3x8x512xf32, #tpu.memory_space<vmem>>, vector<1x3x8x512xf32>
    %5 = vector.shape_cast %4 : vector<1x3x8x512xf32> to vector<3x8x512xf32>
    %6 = vector.extract_strided_slice %5 {offsets = [0, 0, 0], sizes = [1, 8, 512], strides = [1, 1, 1]} : vector<3x8x512xf32> to vector<1x8x512xf32>
    %7 = vector.shape_cast %6 : vector<1x8x512xf32> to vector<8x512xf32>
    %8 = vector.extract_strided_slice %5 {offsets = [1, 0, 0], sizes = [1, 8, 512], strides = [1, 1, 1]} : vector<3x8x512xf32> to vector<1x8x512xf32>
    %9 = vector.shape_cast %8 : vector<1x8x512xf32> to vector<8x512xf32>
    %10 = vector.extract_strided_slice %5 {offsets = [2, 0, 0], sizes = [1, 8, 512], strides = [1, 1, 1]} : vector<3x8x512xf32> to vector<1x8x512xf32>
    %11 = vector.shape_cast %10 : vector<1x8x512xf32> to vector<8x512xf32>
    %12 = tpu.iota {dimensions = array<i32: 0>} : vector<8x512xi32>
    %13 = vector.broadcast %1 : vector<1x512xi32> to vector<8x512xi32>
    %14 = arith.cmpi slt, %12, %13 : vector<8x512xi32>
    %c0_9 = arith.constant 0 : index
    %15 = memref.load %arg1[%c0_9] : memref<4xf32, #tpu.memory_space<smem>>
    %c1 = arith.constant 1 : index
    %16 = memref.load %arg1[%c1] : memref<4xf32, #tpu.memory_space<smem>>
    %c2 = arith.constant 2 : index
    %17 = memref.load %arg1[%c2] : memref<4xf32, #tpu.memory_space<smem>>
    %c3 = arith.constant 3 : index
    %18 = memref.load %arg1[%c3] : memref<4xf32, #tpu.memory_space<smem>>
    %c0_i32 = arith.constant 0 : i32
    %19 = vector.broadcast %c0_i32 : i32 to vector<8x512xi32>
    %20 = arith.cmpi eq, %3, %19 : vector<8x512xi32>
    %c1_i32 = arith.constant 1 : i32
    %21 = vector.broadcast %c1_i32 : i32 to vector<8x512xi32>
    %22 = arith.cmpi eq, %3, %21 : vector<8x512xi32>
    %c2_i32 = arith.constant 2 : i32
    %23 = vector.broadcast %c2_i32 : i32 to vector<8x512xi32>
    %24 = arith.cmpi eq, %3, %23 : vector<8x512xi32>
    %25 = vector.broadcast %17 : f32 to vector<8x512xf32>
    %26 = vector.broadcast %18 : f32 to vector<8x512xf32>
    %27 = arith.select %24, %25, %26 : vector<8x512xi1>, vector<8x512xf32>
    %28 = vector.broadcast %16 : f32 to vector<8x512xf32>
    %29 = arith.select %22, %28, %27 : vector<8x512xi1>, vector<8x512xf32>
    %30 = vector.broadcast %15 : f32 to vector<8x512xf32>
    %31 = arith.select %20, %30, %29 : vector<8x512xi1>, vector<8x512xf32>
    %cst = arith.constant 0.000000e+00 : f32
    %32 = vector.broadcast %cst : f32 to vector<8x512xf32>
    %33 = arith.select %14, %31, %32 : vector<8x512xi1>, vector<8x512xf32>
    %cst_10 = arith.constant 0.000000e+00 : f32
    %34 = vector.broadcast %cst_10 : f32 to vector<8x512xf32>
    %cst_11 = arith.constant 0.000000e+00 : f32
    %35 = vector.broadcast %cst_11 : f32 to vector<8x512xf32>
    %cst_12 = arith.constant 0.000000e+00 : f32
    %36 = vector.broadcast %cst_12 : f32 to vector<8x512xf32>
    %cst_13 = arith.constant 0.000000e+00 : f32
    %37 = vector.broadcast %cst_13 : f32 to vector<8x512xf32>
    %38 = vector.extract_strided_slice %7 {offsets = [0, 0], sizes = [1, 512], strides = [1, 1]} : vector<8x512xf32> to vector<1x512xf32>
    %39 = vector.broadcast %38 : vector<1x512xf32> to vector<8x512xf32>
    %40 = arith.subf %7, %39 : vector<8x512xf32>
    %41 = vector.extract_strided_slice %9 {offsets = [0, 0], sizes = [1, 512], strides = [1, 1]} : vector<8x512xf32> to vector<1x512xf32>
    %42 = vector.broadcast %41 : vector<1x512xf32> to vector<8x512xf32>
    %43 = arith.subf %9, %42 : vector<8x512xf32>
    %44 = vector.extract_strided_slice %11 {offsets = [0, 0], sizes = [1, 512], strides = [1, 1]} : vector<8x512xf32> to vector<1x512xf32>
    %45 = vector.broadcast %44 : vector<1x512xf32> to vector<8x512xf32>
    %46 = arith.subf %11, %45 : vector<8x512xf32>
    %47 = arith.mulf %40, %40 : vector<8x512xf32>
    %48 = arith.mulf %43, %43 : vector<8x512xf32>
    %49 = arith.addf %47, %48 : vector<8x512xf32>
    %50 = arith.mulf %46, %46 : vector<8x512xf32>
    %51 = arith.addf %49, %50 : vector<8x512xf32>
    %52 = vector.extract_strided_slice %14 {offsets = [0, 0], sizes = [1, 512], strides = [1, 1]} : vector<8x512xi1> to vector<1x512xi1>
    %53 = vector.broadcast %52 : vector<1x512xi1> to vector<8x512xi1>
    %54 = arith.andi %14, %53 : vector<8x512xi1>
    %c0_i32_14 = arith.constant 0 : i32
    %55 = vector.broadcast %c0_i32_14 : i32 to vector<8x512xi32>
    %56 = arith.cmpi ne, %12, %55 : vector<8x512xi32>
    %57 = arith.andi %54, %56 : vector<8x512xi1>
    %cst_15 = arith.constant 2.500000e+01 : f32
    %58 = vector.broadcast %cst_15 : f32 to vector<8x512xf32>
    %59 = arith.cmpf olt, %51, %58 : vector<8x512xf32>
    %60 = arith.andi %57, %59 : vector<8x512xi1>
    %cst_16 = arith.constant -1.000000e+00 : f32
    %61 = vector.broadcast %cst_16 : f32 to vector<8x512xf32>
    %62 = arith.mulf %51, %61 : vector<8x512xf32>
    %63 = math.exp %62 : vector<8x512xf32>
    %cst_17 = arith.constant 0.000000e+00 : f32
    %64 = vector.broadcast %cst_17 : f32 to vector<8x512xf32>
    %65 = arith.select %60, %63, %64 : vector<8x512xi1>, vector<8x512xf32>
    %66 = arith.addf %34, %65 : vector<8x512xf32>
    %67 = arith.mulf %65, %40 : vector<8x512xf32>
    %68 = arith.addf %35, %67 : vector<8x512xf32>
    %69 = arith.mulf %65, %43 : vector<8x512xf32>
    %70 = arith.addf %36, %69 : vector<8x512xf32>
    %71 = arith.mulf %65, %46 : vector<8x512xf32>
    %72 = arith.addf %37, %71 : vector<8x512xf32>
    %73 = vector.extract_strided_slice %7 {offsets = [1, 0], sizes = [1, 512], strides = [1, 1]} : vector<8x512xf32> to vector<1x512xf32>
    %74 = vector.broadcast %73 : vector<1x512xf32> to vector<8x512xf32>
    %75 = arith.subf %7, %74 : vector<8x512xf32>
    %76 = vector.extract_strided_slice %9 {offsets = [1, 0], sizes = [1, 512], strides = [1, 1]} : vector<8x512xf32> to vector<1x512xf32>
    %77 = vector.broadcast %76 : vector<1x512xf32> to vector<8x512xf32>
    %78 = arith.subf %9, %77 : vector<8x512xf32>
    %79 = vector.extract_strided_slice %11 {offsets = [1, 0], sizes = [1, 512], strides = [1, 1]} : vector<8x512xf32> to vector<1x512xf32>
    %80 = vector.broadcast %79 : vector<1x512xf32> to vector<8x512xf32>
    %81 = arith.subf %11, %80 : vector<8x512xf32>
    %82 = arith.mulf %75, %75 : vector<8x512xf32>
    %83 = arith.mulf %78, %78 : vector<8x512xf32>
    %84 = arith.addf %82, %83 : vector<8x512xf32>
    %85 = arith.mulf %81, %81 : vector<8x512xf32>
    %86 = arith.addf %84, %85 : vector<8x512xf32>
    %87 = vector.extract_strided_slice %14 {offsets = [1, 0], sizes = [1, 512], strides = [1, 1]} : vector<8x512xi1> to vector<1x512xi1>
    %88 = vector.broadcast %87 : vector<1x512xi1> to vector<8x512xi1>
    %89 = arith.andi %14, %88 : vector<8x512xi1>
    %c1_i32_18 = arith.constant 1 : i32
    %90 = vector.broadcast %c1_i32_18 : i32 to vector<8x512xi32>
    %91 = arith.cmpi ne, %12, %90 : vector<8x512xi32>
    %92 = arith.andi %89, %91 : vector<8x512xi1>
    %cst_19 = arith.constant 2.500000e+01 : f32
    %93 = vector.broadcast %cst_19 : f32 to vector<8x512xf32>
    %94 = arith.cmpf olt, %86, %93 : vector<8x512xf32>
    %95 = arith.andi %92, %94 : vector<8x512xi1>
    %cst_20 = arith.constant -1.000000e+00 : f32
    %96 = vector.broadcast %cst_20 : f32 to vector<8x512xf32>
    %97 = arith.mulf %86, %96 : vector<8x512xf32>
    %98 = math.exp %97 : vector<8x512xf32>
    %cst_21 = arith.constant 0.000000e+00 : f32
    %99 = vector.broadcast %cst_21 : f32 to vector<8x512xf32>
    %100 = arith.select %95, %98, %99 : vector<8x512xi1>, vector<8x512xf32>
    %101 = arith.addf %66, %100 : vector<8x512xf32>
    %102 = arith.mulf %100, %75 : vector<8x512xf32>
    %103 = arith.addf %68, %102 : vector<8x512xf32>
    %104 = arith.mulf %100, %78 : vector<8x512xf32>
    %105 = arith.addf %70, %104 : vector<8x512xf32>
    %106 = arith.mulf %100, %81 : vector<8x512xf32>
    %107 = arith.addf %72, %106 : vector<8x512xf32>
    %108 = vector.extract_strided_slice %7 {offsets = [2, 0], sizes = [1, 512], strides = [1, 1]} : vector<8x512xf32> to vector<1x512xf32>
    %109 = vector.broadcast %108 : vector<1x512xf32> to vector<8x512xf32>
    %110 = arith.subf %7, %109 : vector<8x512xf32>
    %111 = vector.extract_strided_slice %9 {offsets = [2, 0], sizes = [1, 512], strides = [1, 1]} : vector<8x512xf32> to vector<1x512xf32>
    %112 = vector.broadcast %111 : vector<1x512xf32> to vector<8x512xf32>
    %113 = arith.subf %9, %112 : vector<8x512xf32>
    %114 = vector.extract_strided_slice %11 {offsets = [2, 0], sizes = [1, 512], strides = [1, 1]} : vector<8x512xf32> to vector<1x512xf32>
    %115 = vector.broadcast %114 : vector<1x512xf32> to vector<8x512xf32>
    %116 = arith.subf %11, %115 : vector<8x512xf32>
    %117 = arith.mulf %110, %110 : vector<8x512xf32>
    %118 = arith.mulf %113, %113 : vector<8x512xf32>
    %119 = arith.addf %117, %118 : vector<8x512xf32>
    %120 = arith.mulf %116, %116 : vector<8x512xf32>
    %121 = arith.addf %119, %120 : vector<8x512xf32>
    %122 = vector.extract_strided_slice %14 {offsets = [2, 0], sizes = [1, 512], strides = [1, 1]} : vector<8x512xi1> to vector<1x512xi1>
    %123 = vector.broadcast %122 : vector<1x512xi1> to vector<8x512xi1>
    %124 = arith.andi %14, %123 : vector<8x512xi1>
    %c2_i32_22 = arith.constant 2 : i32
    %125 = vector.broadcast %c2_i32_22 : i32 to vector<8x512xi32>
    %126 = arith.cmpi ne, %12, %125 : vector<8x512xi32>
    %127 = arith.andi %124, %126 : vector<8x512xi1>
    %cst_23 = arith.constant 2.500000e+01 : f32
    %128 = vector.broadcast %cst_23 : f32 to vector<8x512xf32>
    %129 = arith.cmpf olt, %121, %128 : vector<8x512xf32>
    %130 = arith.andi %127, %129 : vector<8x512xi1>
    %cst_24 = arith.constant -1.000000e+00 : f32
    %131 = vector.broadcast %cst_24 : f32 to vector<8x512xf32>
    %132 = arith.mulf %121, %131 : vector<8x512xf32>
    %133 = math.exp %132 : vector<8x512xf32>
    %cst_25 = arith.constant 0.000000e+00 : f32
    %134 = vector.broadcast %cst_25 : f32 to vector<8x512xf32>
    %135 = arith.select %130, %133, %134 : vector<8x512xi1>, vector<8x512xf32>
    %136 = arith.addf %101, %135 : vector<8x512xf32>
    %137 = arith.mulf %135, %110 : vector<8x512xf32>
    %138 = arith.addf %103, %137 : vector<8x512xf32>
    %139 = arith.mulf %135, %113 : vector<8x512xf32>
    %140 = arith.addf %105, %139 : vector<8x512xf32>
    %141 = arith.mulf %135, %116 : vector<8x512xf32>
    %142 = arith.addf %107, %141 : vector<8x512xf32>
    %143 = vector.extract_strided_slice %7 {offsets = [3, 0], sizes = [1, 512], strides = [1, 1]} : vector<8x512xf32> to vector<1x512xf32>
    %144 = vector.broadcast %143 : vector<1x512xf32> to vector<8x512xf32>
    %145 = arith.subf %7, %144 : vector<8x512xf32>
    %146 = vector.extract_strided_slice %9 {offsets = [3, 0], sizes = [1, 512], strides = [1, 1]} : vector<8x512xf32> to vector<1x512xf32>
    %147 = vector.broadcast %146 : vector<1x512xf32> to vector<8x512xf32>
    %148 = arith.subf %9, %147 : vector<8x512xf32>
    %149 = vector.extract_strided_slice %11 {offsets = [3, 0], sizes = [1, 512], strides = [1, 1]} : vector<8x512xf32> to vector<1x512xf32>
    %150 = vector.broadcast %149 : vector<1x512xf32> to vector<8x512xf32>
    %151 = arith.subf %11, %150 : vector<8x512xf32>
    %152 = arith.mulf %145, %145 : vector<8x512xf32>
    %153 = arith.mulf %148, %148 : vector<8x512xf32>
    %154 = arith.addf %152, %153 : vector<8x512xf32>
    %155 = arith.mulf %151, %151 : vector<8x512xf32>
    %156 = arith.addf %154, %155 : vector<8x512xf32>
    %157 = vector.extract_strided_slice %14 {offsets = [3, 0], sizes = [1, 512], strides = [1, 1]} : vector<8x512xi1> to vector<1x512xi1>
    %158 = vector.broadcast %157 : vector<1x512xi1> to vector<8x512xi1>
    %159 = arith.andi %14, %158 : vector<8x512xi1>
    %c3_i32 = arith.constant 3 : i32
    %160 = vector.broadcast %c3_i32 : i32 to vector<8x512xi32>
    %161 = arith.cmpi ne, %12, %160 : vector<8x512xi32>
    %162 = arith.andi %159, %161 : vector<8x512xi1>
    %cst_26 = arith.constant 2.500000e+01 : f32
    %163 = vector.broadcast %cst_26 : f32 to vector<8x512xf32>
    %164 = arith.cmpf olt, %156, %163 : vector<8x512xf32>
    %165 = arith.andi %162, %164 : vector<8x512xi1>
    %cst_27 = arith.constant -1.000000e+00 : f32
    %166 = vector.broadcast %cst_27 : f32 to vector<8x512xf32>
    %167 = arith.mulf %156, %166 : vector<8x512xf32>
    %168 = math.exp %167 : vector<8x512xf32>
    %cst_28 = arith.constant 0.000000e+00 : f32
    %169 = vector.broadcast %cst_28 : f32 to vector<8x512xf32>
    %170 = arith.select %165, %168, %169 : vector<8x512xi1>, vector<8x512xf32>
    %171 = arith.addf %136, %170 : vector<8x512xf32>
    %172 = arith.mulf %170, %145 : vector<8x512xf32>
    %173 = arith.addf %138, %172 : vector<8x512xf32>
    %174 = arith.mulf %170, %148 : vector<8x512xf32>
    %175 = arith.addf %140, %174 : vector<8x512xf32>
    %176 = arith.mulf %170, %151 : vector<8x512xf32>
    %177 = arith.addf %142, %176 : vector<8x512xf32>
    %178 = vector.extract_strided_slice %7 {offsets = [4, 0], sizes = [1, 512], strides = [1, 1]} : vector<8x512xf32> to vector<1x512xf32>
    %179 = vector.broadcast %178 : vector<1x512xf32> to vector<8x512xf32>
    %180 = arith.subf %7, %179 : vector<8x512xf32>
    %181 = vector.extract_strided_slice %9 {offsets = [4, 0], sizes = [1, 512], strides = [1, 1]} : vector<8x512xf32> to vector<1x512xf32>
    %182 = vector.broadcast %181 : vector<1x512xf32> to vector<8x512xf32>
    %183 = arith.subf %9, %182 : vector<8x512xf32>
    %184 = vector.extract_strided_slice %11 {offsets = [4, 0], sizes = [1, 512], strides = [1, 1]} : vector<8x512xf32> to vector<1x512xf32>
    %185 = vector.broadcast %184 : vector<1x512xf32> to vector<8x512xf32>
    %186 = arith.subf %11, %185 : vector<8x512xf32>
    %187 = arith.mulf %180, %180 : vector<8x512xf32>
    %188 = arith.mulf %183, %183 : vector<8x512xf32>
    %189 = arith.addf %187, %188 : vector<8x512xf32>
    %190 = arith.mulf %186, %186 : vector<8x512xf32>
    %191 = arith.addf %189, %190 : vector<8x512xf32>
    %192 = vector.extract_strided_slice %14 {offsets = [4, 0], sizes = [1, 512], strides = [1, 1]} : vector<8x512xi1> to vector<1x512xi1>
    %193 = vector.broadcast %192 : vector<1x512xi1> to vector<8x512xi1>
    %194 = arith.andi %14, %193 : vector<8x512xi1>
    %c4_i32 = arith.constant 4 : i32
    %195 = vector.broadcast %c4_i32 : i32 to vector<8x512xi32>
    %196 = arith.cmpi ne, %12, %195 : vector<8x512xi32>
    %197 = arith.andi %194, %196 : vector<8x512xi1>
    %cst_29 = arith.constant 2.500000e+01 : f32
    %198 = vector.broadcast %cst_29 : f32 to vector<8x512xf32>
    %199 = arith.cmpf olt, %191, %198 : vector<8x512xf32>
    %200 = arith.andi %197, %199 : vector<8x512xi1>
    %cst_30 = arith.constant -1.000000e+00 : f32
    %201 = vector.broadcast %cst_30 : f32 to vector<8x512xf32>
    %202 = arith.mulf %191, %201 : vector<8x512xf32>
    %203 = math.exp %202 : vector<8x512xf32>
    %cst_31 = arith.constant 0.000000e+00 : f32
    %204 = vector.broadcast %cst_31 : f32 to vector<8x512xf32>
    %205 = arith.select %200, %203, %204 : vector<8x512xi1>, vector<8x512xf32>
    %206 = arith.addf %171, %205 : vector<8x512xf32>
    %207 = arith.mulf %205, %180 : vector<8x512xf32>
    %208 = arith.addf %173, %207 : vector<8x512xf32>
    %209 = arith.mulf %205, %183 : vector<8x512xf32>
    %210 = arith.addf %175, %209 : vector<8x512xf32>
    %211 = arith.mulf %205, %186 : vector<8x512xf32>
    %212 = arith.addf %177, %211 : vector<8x512xf32>
    %213 = vector.extract_strided_slice %7 {offsets = [5, 0], sizes = [1, 512], strides = [1, 1]} : vector<8x512xf32> to vector<1x512xf32>
    %214 = vector.broadcast %213 : vector<1x512xf32> to vector<8x512xf32>
    %215 = arith.subf %7, %214 : vector<8x512xf32>
    %216 = vector.extract_strided_slice %9 {offsets = [5, 0], sizes = [1, 512], strides = [1, 1]} : vector<8x512xf32> to vector<1x512xf32>
    %217 = vector.broadcast %216 : vector<1x512xf32> to vector<8x512xf32>
    %218 = arith.subf %9, %217 : vector<8x512xf32>
    %219 = vector.extract_strided_slice %11 {offsets = [5, 0], sizes = [1, 512], strides = [1, 1]} : vector<8x512xf32> to vector<1x512xf32>
    %220 = vector.broadcast %219 : vector<1x512xf32> to vector<8x512xf32>
    %221 = arith.subf %11, %220 : vector<8x512xf32>
    %222 = arith.mulf %215, %215 : vector<8x512xf32>
    %223 = arith.mulf %218, %218 : vector<8x512xf32>
    %224 = arith.addf %222, %223 : vector<8x512xf32>
    %225 = arith.mulf %221, %221 : vector<8x512xf32>
    %226 = arith.addf %224, %225 : vector<8x512xf32>
    %227 = vector.extract_strided_slice %14 {offsets = [5, 0], sizes = [1, 512], strides = [1, 1]} : vector<8x512xi1> to vector<1x512xi1>
    %228 = vector.broadcast %227 : vector<1x512xi1> to vector<8x512xi1>
    %229 = arith.andi %14, %228 : vector<8x512xi1>
    %c5_i32 = arith.constant 5 : i32
    %230 = vector.broadcast %c5_i32 : i32 to vector<8x512xi32>
    %231 = arith.cmpi ne, %12, %230 : vector<8x512xi32>
    %232 = arith.andi %229, %231 : vector<8x512xi1>
    %cst_32 = arith.constant 2.500000e+01 : f32
    %233 = vector.broadcast %cst_32 : f32 to vector<8x512xf32>
    %234 = arith.cmpf olt, %226, %233 : vector<8x512xf32>
    %235 = arith.andi %232, %234 : vector<8x512xi1>
    %cst_33 = arith.constant -1.000000e+00 : f32
    %236 = vector.broadcast %cst_33 : f32 to vector<8x512xf32>
    %237 = arith.mulf %226, %236 : vector<8x512xf32>
    %238 = math.exp %237 : vector<8x512xf32>
    %cst_34 = arith.constant 0.000000e+00 : f32
    %239 = vector.broadcast %cst_34 : f32 to vector<8x512xf32>
    %240 = arith.select %235, %238, %239 : vector<8x512xi1>, vector<8x512xf32>
    %241 = arith.addf %206, %240 : vector<8x512xf32>
    %242 = arith.mulf %240, %215 : vector<8x512xf32>
    %243 = arith.addf %208, %242 : vector<8x512xf32>
    %244 = arith.mulf %240, %218 : vector<8x512xf32>
    %245 = arith.addf %210, %244 : vector<8x512xf32>
    %246 = arith.mulf %240, %221 : vector<8x512xf32>
    %247 = arith.addf %212, %246 : vector<8x512xf32>
    %248 = vector.extract_strided_slice %7 {offsets = [6, 0], sizes = [1, 512], strides = [1, 1]} : vector<8x512xf32> to vector<1x512xf32>
    %249 = vector.broadcast %248 : vector<1x512xf32> to vector<8x512xf32>
    %250 = arith.subf %7, %249 : vector<8x512xf32>
    %251 = vector.extract_strided_slice %9 {offsets = [6, 0], sizes = [1, 512], strides = [1, 1]} : vector<8x512xf32> to vector<1x512xf32>
    %252 = vector.broadcast %251 : vector<1x512xf32> to vector<8x512xf32>
    %253 = arith.subf %9, %252 : vector<8x512xf32>
    %254 = vector.extract_strided_slice %11 {offsets = [6, 0], sizes = [1, 512], strides = [1, 1]} : vector<8x512xf32> to vector<1x512xf32>
    %255 = vector.broadcast %254 : vector<1x512xf32> to vector<8x512xf32>
    %256 = arith.subf %11, %255 : vector<8x512xf32>
    %257 = arith.mulf %250, %250 : vector<8x512xf32>
    %258 = arith.mulf %253, %253 : vector<8x512xf32>
    %259 = arith.addf %257, %258 : vector<8x512xf32>
    %260 = arith.mulf %256, %256 : vector<8x512xf32>
    %261 = arith.addf %259, %260 : vector<8x512xf32>
    %262 = vector.extract_strided_slice %14 {offsets = [6, 0], sizes = [1, 512], strides = [1, 1]} : vector<8x512xi1> to vector<1x512xi1>
    %263 = vector.broadcast %262 : vector<1x512xi1> to vector<8x512xi1>
    %264 = arith.andi %14, %263 : vector<8x512xi1>
    %c6_i32 = arith.constant 6 : i32
    %265 = vector.broadcast %c6_i32 : i32 to vector<8x512xi32>
    %266 = arith.cmpi ne, %12, %265 : vector<8x512xi32>
    %267 = arith.andi %264, %266 : vector<8x512xi1>
    %cst_35 = arith.constant 2.500000e+01 : f32
    %268 = vector.broadcast %cst_35 : f32 to vector<8x512xf32>
    %269 = arith.cmpf olt, %261, %268 : vector<8x512xf32>
    %270 = arith.andi %267, %269 : vector<8x512xi1>
    %cst_36 = arith.constant -1.000000e+00 : f32
    %271 = vector.broadcast %cst_36 : f32 to vector<8x512xf32>
    %272 = arith.mulf %261, %271 : vector<8x512xf32>
    %273 = math.exp %272 : vector<8x512xf32>
    %cst_37 = arith.constant 0.000000e+00 : f32
    %274 = vector.broadcast %cst_37 : f32 to vector<8x512xf32>
    %275 = arith.select %270, %273, %274 : vector<8x512xi1>, vector<8x512xf32>
    %276 = arith.addf %241, %275 : vector<8x512xf32>
    %277 = arith.mulf %275, %250 : vector<8x512xf32>
    %278 = arith.addf %243, %277 : vector<8x512xf32>
    %279 = arith.mulf %275, %253 : vector<8x512xf32>
    %280 = arith.addf %245, %279 : vector<8x512xf32>
    %281 = arith.mulf %275, %256 : vector<8x512xf32>
    %282 = arith.addf %247, %281 : vector<8x512xf32>
    %283 = vector.extract_strided_slice %7 {offsets = [7, 0], sizes = [1, 512], strides = [1, 1]} : vector<8x512xf32> to vector<1x512xf32>
    %284 = vector.broadcast %283 : vector<1x512xf32> to vector<8x512xf32>
    %285 = arith.subf %7, %284 : vector<8x512xf32>
    %286 = vector.extract_strided_slice %9 {offsets = [7, 0], sizes = [1, 512], strides = [1, 1]} : vector<8x512xf32> to vector<1x512xf32>
    %287 = vector.broadcast %286 : vector<1x512xf32> to vector<8x512xf32>
    %288 = arith.subf %9, %287 : vector<8x512xf32>
    %289 = vector.extract_strided_slice %11 {offsets = [7, 0], sizes = [1, 512], strides = [1, 1]} : vector<8x512xf32> to vector<1x512xf32>
    %290 = vector.broadcast %289 : vector<1x512xf32> to vector<8x512xf32>
    %291 = arith.subf %11, %290 : vector<8x512xf32>
    %292 = arith.mulf %285, %285 : vector<8x512xf32>
    %293 = arith.mulf %288, %288 : vector<8x512xf32>
    %294 = arith.addf %292, %293 : vector<8x512xf32>
    %295 = arith.mulf %291, %291 : vector<8x512xf32>
    %296 = arith.addf %294, %295 : vector<8x512xf32>
    %297 = vector.extract_strided_slice %14 {offsets = [7, 0], sizes = [1, 512], strides = [1, 1]} : vector<8x512xi1> to vector<1x512xi1>
    %298 = vector.broadcast %297 : vector<1x512xi1> to vector<8x512xi1>
    %299 = arith.andi %14, %298 : vector<8x512xi1>
    %c7_i32 = arith.constant 7 : i32
    %300 = vector.broadcast %c7_i32 : i32 to vector<8x512xi32>
    %301 = arith.cmpi ne, %12, %300 : vector<8x512xi32>
    %302 = arith.andi %299, %301 : vector<8x512xi1>
    %cst_38 = arith.constant 2.500000e+01 : f32
    %303 = vector.broadcast %cst_38 : f32 to vector<8x512xf32>
    %304 = arith.cmpf olt, %296, %303 : vector<8x512xf32>
    %305 = arith.andi %302, %304 : vector<8x512xi1>
    %cst_39 = arith.constant -1.000000e+00 : f32
    %306 = vector.broadcast %cst_39 : f32 to vector<8x512xf32>
    %307 = arith.mulf %296, %306 : vector<8x512xf32>
    %308 = math.exp %307 : vector<8x512xf32>
    %cst_40 = arith.constant 0.000000e+00 : f32
    %309 = vector.broadcast %cst_40 : f32 to vector<8x512xf32>
    %310 = arith.select %305, %308, %309 : vector<8x512xi1>, vector<8x512xf32>
    %311 = arith.addf %276, %310 : vector<8x512xf32>
    %312 = arith.mulf %310, %285 : vector<8x512xf32>
    %313 = arith.addf %278, %312 : vector<8x512xf32>
    %314 = arith.mulf %310, %288 : vector<8x512xf32>
    %315 = arith.addf %280, %314 : vector<8x512xf32>
    %316 = arith.mulf %310, %291 : vector<8x512xf32>
    %317 = arith.addf %282, %316 : vector<8x512xf32>
    %cst_41 = arith.constant dense<0.000000e+00> : vector<512xf32>
    %318 = vector.multi_reduction <add>, %33, %cst_41 [0] : vector<8x512xf32> to vector<512xf32>
    %319 = vector.shape_cast %318 : vector<512xf32> to vector<1x512xf32>
    %cst_42 = arith.constant dense<0.000000e+00> : vector<512xf32>
    %320 = vector.multi_reduction <add>, %311, %cst_42 [0] : vector<8x512xf32> to vector<512xf32>
    %321 = vector.shape_cast %320 : vector<512xf32> to vector<1x512xf32>
    %cst_43 = arith.constant 5.310000e-02 : f32
    %322 = vector.broadcast %cst_43 : f32 to vector<1x512xf32>
    %323 = arith.mulf %322, %321 : vector<1x512xf32>
    %324 = arith.addf %319, %323 : vector<1x512xf32>
    %c0_44 = arith.constant 0 : index
    %c0_45 = arith.constant 0 : index
    %c0_46 = arith.constant 0 : index
    %325 = vector.load %arg5[%c0_44, %c0_45, %c0_46] : memref<1x1x512xf32, #tpu.memory_space<vmem>>, vector<1x1x512xf32>
    %326 = vector.shape_cast %325 : vector<1x1x512xf32> to vector<1x512xf32>
    %327 = vector.shape_cast %324 : vector<1x512xf32> to vector<1x1x512xf32>
    tpu.vector_store %arg5[%c0_44, %c0_45, %c0_46], %327 {strides = array<i32>} : memref<1x1x512xf32, #tpu.memory_space<vmem>>, vector<1x1x512xf32>,
    %cst_47 = arith.constant 2.124000e-01 : f32
    %328 = vector.broadcast %cst_47 : f32 to vector<8x512xf32>
    %329 = arith.mulf %328, %313 : vector<8x512xf32>
    %c0_48 = arith.constant 0 : index
    %c0_49 = arith.constant 0 : index
    %c0_50 = arith.constant 0 : index
    %c0_51 = arith.constant 0 : index
    %330 = vector.load %arg6[%c0_48, %c0_49, %c0_50, %c0_51] : memref<1x3x8x512xf32, #tpu.memory_space<vmem>>, vector<1x1x8x512xf32>
    %331 = vector.shape_cast %330 : vector<1x1x8x512xf32> to vector<8x512xf32>
    %332 = vector.shape_cast %329 : vector<8x512xf32> to vector<1x1x8x512xf32>
    tpu.vector_store %arg6[%c0_48, %c0_49, %c0_50, %c0_51], %332 {strides = array<i32>} : memref<1x3x8x512xf32, #tpu.memory_space<vmem>>, vector<1x1x8x512xf32>,
    %cst_52 = arith.constant 2.124000e-01 : f32
    %333 = vector.broadcast %cst_52 : f32 to vector<8x512xf32>
    %334 = arith.mulf %333, %315 : vector<8x512xf32>
    %c0_53 = arith.constant 0 : index
    %c1_54 = arith.constant 1 : index
    %c0_55 = arith.constant 0 : index
    %c0_56 = arith.constant 0 : index
    %335 = vector.load %arg6[%c0_53, %c1_54, %c0_55, %c0_56] : memref<1x3x8x512xf32, #tpu.memory_space<vmem>>, vector<1x1x8x512xf32>
    %336 = vector.shape_cast %335 : vector<1x1x8x512xf32> to vector<8x512xf32>
    %337 = vector.shape_cast %334 : vector<8x512xf32> to vector<1x1x8x512xf32>
    tpu.vector_store %arg6[%c0_53, %c1_54, %c0_55, %c0_56], %337 {strides = array<i32>} : memref<1x3x8x512xf32, #tpu.memory_space<vmem>>, vector<1x1x8x512xf32>,
    %cst_57 = arith.constant 2.124000e-01 : f32
    %338 = vector.broadcast %cst_57 : f32 to vector<8x512xf32>
    %339 = arith.mulf %338, %317 : vector<8x512xf32>
    %c0_58 = arith.constant 0 : index
    %c2_59 = arith.constant 2 : index
    %c0_60 = arith.constant 0 : index
    %c0_61 = arith.constant 0 : index
    %340 = vector.load %arg6[%c0_58, %c2_59, %c0_60, %c0_61] : memref<1x3x8x512xf32, #tpu.memory_space<vmem>>, vector<1x1x8x512xf32>
    %341 = vector.shape_cast %340 : vector<1x1x8x512xf32> to vector<8x512xf32>
    %342 = vector.shape_cast %339 : vector<8x512xf32> to vector<1x1x8x512xf32>
    tpu.vector_store %arg6[%c0_58, %c2_59, %c0_60, %c0_61], %342 {strides = array<i32>} : memref<1x3x8x512xf32, #tpu.memory_space<vmem>>, vector<1x1x8x512xf32>,
    return
  }
  func.func @transform_0(%arg0: i32) -> i32 {
    %c0_i32 = arith.constant 0 : i32
    %c0_i32_0 = arith.constant 0 : i32
    return %c0_i32 : i32
  }
  func.func @transform_1(%arg0: i32) -> (i32, i32, i32) {
    %c0_i32 = arith.constant 0 : i32
    %c0_i32_0 = arith.constant 0 : i32
    %c0_i32_1 = arith.constant 0 : i32
    return %arg0, %c0_i32, %c0_i32_0 : i32, i32, i32
  }
  func.func @transform_2(%arg0: i32) -> (i32, i32, i32) {
    %c0_i32 = arith.constant 0 : i32
    %c0_i32_0 = arith.constant 0 : i32
    %c0_i32_1 = arith.constant 0 : i32
    return %arg0, %c0_i32, %c0_i32_0 : i32, i32, i32
  }
  func.func @transform_3(%arg0: i32) -> (i32, i32, i32, i32) {
    %c0_i32 = arith.constant 0 : i32
    %c0_i32_0 = arith.constant 0 : i32
    %c0_i32_1 = arith.constant 0 : i32
    %c0_i32_2 = arith.constant 0 : i32
    return %arg0, %c0_i32, %c0_i32_0, %c0_i32_1 : i32, i32, i32, i32
  }
  func.func @transform_4(%arg0: i32) -> (i32, i32, i32) {
    %c0_i32 = arith.constant 0 : i32
    %c0_i32_0 = arith.constant 0 : i32
    %c0_i32_1 = arith.constant 0 : i32
    return %arg0, %c0_i32, %c0_i32_0 : i32, i32, i32
  }
  func.func @transform_5(%arg0: i32) -> (i32, i32, i32, i32) {
    %c0_i32 = arith.constant 0 : i32
    %c0_i32_0 = arith.constant 0 : i32
    %c0_i32_1 = arith.constant 0 : i32
    %c0_i32_2 = arith.constant 0 : i32
    return %arg0, %c0_i32, %c0_i32_0, %c0_i32_1 : i32, i32, i32, i32
  }
}

</mosaic_0001>

<bundles_post_ra>
// kernel: tpu_custom_call.1
= control target key start
LH: loop header
LB: loop body
LE: loop exit
PB: predicated region body
PF: predicated region fallthrough
CT: control target
= control target key end

     0   :  { %s5593_s0 = inlined_call_operand.hbm [shape: f32[4], index: 0, kind: input, shape index: {}]   ;;  %s5594_s1 = inlined_call_operand.hbm [shape: s32[2,1,512], index: 1, kind: input, shape index: {}]   ;;  %s5595_s2 = inlined_call_operand.hbm [shape: s32[2,8,512], index: 2, kind: input, shape index: {}]   ;;  %s5596_s3 = inlined_call_operand.hbm [shape: f32[2,3,8,512], index: 3, kind: input, shape index: {}]   ;;  %s5597_s4 = inlined_call_operand.hbm [shape: f32[2,1,512], index: 4, kind: output, shape index: {0}]   ;;  %s5598_s5 = inlined_call_operand.hbm [shape: f32[2,3,8,512], index: 5, kind: output, shape index: {1}]  }
   0x1   :  { %5819 = sst [smem:[#allocation97_spill]] %s5595_s2 }
   0x2   :  { %11 = vsyncpa [#allocation5], 0 }
   0x3   :  { %12 = vsyncpa [#allocation3], 0 }
   0x4   :  { %14 = vsyncpa [#allocation3 + $0x1], 0 }
   0x5   :  { %15 = vsyncpa [#allocation8], 0 }
   0x6   :  { %17 = vsyncpa [#allocation8 + $0x1], 0 }
   0x7   :  { %18 = vsyncpa [#allocation4], 0 }
   0x8   :  { %20 = vsyncpa [#allocation4 + $0x1], 0 }
   0x9   :  { %21 = vsyncpa [#allocation12], 0 }
   0xa   :  { %23 = vsyncpa [#allocation12 + $0x1], 0  ;;  %s2589_s18 = smov 0   ;;  %s2591_s19 = smov 0  }
   0xb   :  { %s2593_s20 = smov 0   ;;  %s2595_s21 = smov 0  }
   0xc LB: > { %5820 = sst [smem:[#allocation18_spill]] %s2541_s20  ;;  %s2610_s22 = sadd.s32 1, %s2545_s21   ;;  %s2545_s21 = sphi %s2595_s21, %s6615_s21   ;;  %s2541_s20 = sphi %s2593_s20, %s6617_s20   ;;  %s2537_s19 = sphi %s2591_s19, %s6619_s19   ;;  %s2533_s18 = sphi %s2589_s18, %s6618_s18  }
   0xd   : > { %5821 = sst [smem:[#allocation19_spill]] %s2610_s22  ;;  %s57_s23 = sadd.s32 1, %s2541_s20 }
   0xe   : > { %s54_s24 = ssub.s32 %s2545_s21, %s2610_s22  ;;  %p5599_p0 = scmp.ne.s32.totalorder %s2541_s20, %s2537_s19 }
   0xf   : > { %p55_p1 = scmp.eq.s32.totalorder %s54_s24, 0  ;;  %p65_p2 = scmp.eq.s32.totalorder %s2545_s21, 0 }
  0x10   : > { %p2230_p4 = scmp.lt.s32.totalorder %s2545_s21, 2  ;;  %s2627_s26 = sand.u32 1, %s2541_s20  }
  0x11   : > { %s2621_s25 = scalar_select %p55_p1, %s2541_s20, %s57_s23  }
  0x12   : > { %p66_p5 = por %p65_p2, %p5599_p0  ;;  %s226_s27 = sand.u32 1, %s2545_s21  }
  0x13   : > { %5822 = sst [smem:[#allocation20_spill]] %s2621_s25  ;;  %s2161_s28 = sshll.u32 %s2627_s26, 5 }
  0x14   : > { %p2631_p6 = pnand %p2230_p4, %p66_p5  ;;  %s2188_s30 = sshll.u32 %s2545_s21, 9 }
  0x15   : > { %s5824_s2 = sld [smem:[#allocation97_spill]]  ;;  %s230_s9 = scalar_lea.vmem [#allocation7], %s2161_s28 }
  0x16   : > { %s238_s10 = sshll.u32 %s230_s9, 4  ;;  %s2642_s12 = scalar_lea.sflag [#allocation8], %s226_s27  ;;  %s239_s10 = int_to_ptr.vmem [resolvable:$true] %s238_s10 }
  0x17   : > { %p2648_p8 = pneg %p2631_p6 }
  0x1b   : > { %s2639_s8 = scalar_lea.hbm %s5824_s2, %s2188_s30  ;;  %s2353_s17 = scalar_lea.hbm %s5824_s2, 1024 }
  0x1c   : > { %s2348_s13 = scalar_lea.hbm %s2639_s8, 512  ;;  %p2354_p11 = scmp.lt.s32.totalorder %s2639_s8, %s5824_s2 }
  0x1d   : > { %p2349_p7 = scmp.ne.s32.totalorder %s2639_s8, %s2348_s13  ;;  %p2355_p12 = scmp.lt.s32.totalorder %s2353_s17, %s2348_s13 }
  0x1f   : > { %p2351_p9 = pnand %p2648_p8, %p2349_p7  ;;  %p2356_p13 = por %p2355_p12, %p2354_p11 }
  0x21   : > { %p2352_p10 = pneg %p2351_p9 }
  0x23   : > { %p2357_p1 = pnand %p2356_p13, %p2352_p10 }
  0x25   : > { %2360 = shalt.err (!%p2357_p1)
}
  0x26   : > { %s2361_s27 = scalar_lea.vmem %s239_s10, 512  ;;  %s2547_s28 = smov [#allocation7]  }
  0x27   : > { %p2362_p2 = scmp.ne.s32.totalorder %s239_s10, %s2361_s27  ;;  %s2366_s30 = sshll.u32 %s2547_s28, 4  ;;  %s2367_s30 = int_to_ptr.vmem [resolvable:$false] %s2366_s30 }
  0x28   : > { %s2368_s6 = scalar_lea.vmem %s2367_s30, 1024  ;;  %p2369_p7 = scmp.lt.s32.totalorder %s239_s10, %s2367_s30 }
  0x29   : > { %p2364_p4 = pnand %p2362_p2, %p2648_p8  ;;  %p2370_p9 = scmp.lt.s32.totalorder %s2368_s6, %s2361_s27 }
  0x2b   : > { %p2365_p5 = pneg %p2364_p4  ;;  %p2371_p3 = por %p2370_p9, %p2369_p7 }
  0x2d   : > { %p2372_p0 = pnand %p2371_p3, %p2365_p5 }
  0x2f   : > { %2375 = shalt.err (!%p2372_p0)
}
  0x30   : > { %2218 = dma.hbm_to_vmem [thread:$0]  (!%p2631_p6), %s2639_s8, 512, %s239_s10, %s2642_s12  }
  0x31   : > { %s2668_s7 = sadd.s32 4294967295, %s2545_s21   ;;  %s2154_s9 = sadd.s32 4294967294, %s2545_s21  }
  0x32   : > { %p70_p0 = scmp.ne.s32.totalorder %s2537_s19, %s2533_s18  ;;  %p5600_p3 = scmp.eq.s32.totalorder %s2668_s7, 0 }
  0x33   : > { %p146_p10 = scmp.eq.s32.totalorder %s2668_s7, 1  ;;  %p152_p11 = scmp.eq.s32.totalorder %s2154_s9, 1 }
  0x34   : > { %p2155_p12 = scmp.ge.s32.totalorder %s2545_s21, 1  ;;  %p2678_p13 = por %p5600_p3, %p70_p0 }
  0x35   : > { %p5827_p1 = scmp.ne.s32.totalorder %s2541_s20, %s2537_s19  ;;  %p2689_p4 = por %p152_p11, %p70_p0 }
  0x36   : > { %s5826_s13 = scalar_select %p2678_p13, 1, 0 }
  0x37   : > { %p2685_p2 = por %p146_p10, %p5827_p1  ;;  %p185_p5 = scmp.lt.s32.totalorder %s2545_s21, 3 }
  0x38   : > { %s5829_s10 = scalar_select %p2689_p4, 1, 0 }
  0x39   : > { %s5828_s8 = scalar_select %p2685_p2, 1, 0 }
  0x3a   : > { %p2694_p7 = pnand %p2155_p12, %p185_p5  ;;  %s2158_s16 = sshll.u32 %s2627_s26, 2 }
  0x3b   : > { %s2187_s17 = sshll.u32 %s2545_s21, 6  ;;  %s211_s28 = scalar_lea.vmem [#allocation6], %s2158_s16 }
  0x3c   : > { %s5830_s15 = scalar_select %p2694_p7, 1, 0 }
  0x3d   : > { %p2208_p9 = pneg %p2694_p7  ;;  %s2705_s27 = scalar_lea.hbm %s5594_s1, %s2187_s17 }
  0x3e   : > { %s219_s30 = sshll.u32 %s211_s28, 4  ;;  %s208_s9 = scalar_lea.sflag [#allocation3], %s2627_s26  ;;  %s220_s30 = int_to_ptr.vmem [resolvable:$true] %s219_s30 }
  0x3f   : > { %p2709_p0 = pnand %p2208_p9, %p5600_p3  ;;  %s2376_s11 = scalar_lea.hbm %s2705_s27, 64 }
  0x40   : > { %p2377_p10 = scmp.ne.s32.totalorder %s2705_s27, %s2376_s11  ;;  %s2381_s24 = scalar_lea.hbm %s5594_s1, 128 }
  0x41   : > { %s5831_s6 = scalar_select %p2709_p0, 1, 0 }
  0x42   : > { %p2379_p11 = pnand %p2377_p10, %p2648_p8  ;;  %p2382_p1 = scmp.lt.s32.totalorder %s2705_s27, %s5594_s1 }
  0x43   : > { %p2383_p5 = scmp.lt.s32.totalorder %s2381_s24, %s2376_s11 }
  0x44   : > { %p2380_p12 = pneg %p2379_p11 }
  0x45   : > { %p2384_p9 = por %p2383_p5, %p2382_p1 }
  0x47   : > { %p2385_p3 = pnand %p2384_p9, %p2380_p12 }
  0x49   : > { %2388 = shalt.err (!%p2385_p3)
}
  0x4a   : > { %s2389_s16 = scalar_lea.vmem %s220_s30, 64  ;;  %s2548_s28 = smov [#allocation6]  }
  0x4b   : > { %p2390_p4 = scmp.ne.s32.totalorder %s220_s30, %s2389_s16  ;;  %s2394_s20 = sshll.u32 %s2548_s28, 4  ;;  %s2395_s20 = int_to_ptr.vmem [resolvable:$false] %s2394_s20 }
  0x4c   : > { %s2396_s22 = scalar_lea.vmem %s2395_s20, 128  ;;  %p2397_p10 = scmp.lt.s32.totalorder %s220_s30, %s2395_s20 }
  0x4d   : > { %p2392_p2 = pnand %p2390_p4, %p2648_p8  ;;  %p2398_p11 = scmp.lt.s32.totalorder %s2396_s22, %s2389_s16 }
  0x4f   : > { %p2393_p13 = pneg %p2392_p2  ;;  %p2399_p7 = por %p2398_p11, %p2397_p10 }
  0x51   : > { %p2400_p0 = pnand %p2399_p7, %p2393_p13 }
  0x53   : > { %2403 = shalt.err (!%p2400_p0)
}
  0x54   : > { %2215 = dma.hbm_to_vmem [thread:$0]  (!%p2631_p6), %s2705_s27, 64, %s220_s30, %s208_s9  }
  0x55   : > { %s2549_s2 = smov [#allocation2]   ;;  %p5832_p3 = scmp.ne.s32.totalorder %s5831_s6, 0 }
  0x56   : > { %s2191_s23 = smul.u32 1536, %s2545_s21 }
  0x57   : > { %2211 = dma.hbm_to_smem (!%p5832_p3), %s5593_s0, 16, %s2549_s2, [#allocation5]  }
  0x58   : > { %s5833_s20 = smul.u32 96, %s2627_s26  ;;  %s2743_s28 = scalar_lea.hbm %s5596_s3, %s2191_s23 }
  0x59   : > { %s2415_s27 = scalar_lea.hbm %s2743_s28, 1536  ;;  %s2420_s26 = scalar_lea.hbm %s5596_s3, 3072 }
  0x5a   : > { %s249_s22 = scalar_lea.vmem [#allocation9], %s5833_s20  ;;  %p2416_p13 = scmp.ne.s32.totalorder %s2743_s28, %s2415_s27 }
  0x5b   : > { %s256_s17 = sshll.u32 %s249_s22, 4  ;;  %p2421_p7 = scmp.lt.s32.totalorder %s2743_s28, %s5596_s3  ;;  %s2738_s17 = int_to_ptr.vmem [resolvable:$true] %s256_s17 }
  0x5c   : > { %p2418_p2 = pnand %p2416_p13, %p2648_p8  ;;  %p2422_p0 = scmp.lt.s32.totalorder %s2420_s26, %s2415_s27 }
  0x5e   : > { %p2419_p4 = pneg %p2418_p2  ;;  %p2423_p12 = por %p2422_p0, %p2421_p7 }
  0x60   : > { %p2424_p1 = pnand %p2423_p12, %p2419_p4 }
  0x62   : > { %2427 = shalt.err (!%p2424_p1)
}
  0x63   : > { %s2428_s25 = scalar_lea.vmem %s2738_s17, 1536  ;;  %s2550_s11 = smov [#allocation9]  }
  0x64   : > { %p2429_p5 = scmp.ne.s32.totalorder %s2738_s17, %s2428_s25  ;;  %s2433_s23 = sshll.u32 %s2550_s11, 4  ;;  %s2434_s23 = int_to_ptr.vmem [resolvable:$false] %s2433_s23 }
  0x65   : > { %s2435_s20 = scalar_lea.vmem %s2434_s23, 3072  ;;  %p2436_p11 = scmp.lt.s32.totalorder %s2738_s17, %s2434_s23 }
  0x66   : > { %p2431_p9 = pnand %p2429_p5, %p2648_p8  ;;  %p2437_p3 = scmp.lt.s32.totalorder %s2435_s20, %s2428_s25 }
  0x68   : > { %p2432_p10 = pneg %p2431_p9  ;;  %p2438_p13 = por %p2437_p3, %p2436_p11 }
  0x6a   : > { %p2439_p2 = pnand %p2438_p13, %p2432_p10 }
  0x6c   : > { %2442 = shalt.err (!%p2439_p2)
}
  0x6d   : > { %s2551_s22 = smov 512   ;;  %s2552_s24 = smov 32  }
  0x6e   : > { %2221 = dma.hbm_to_vmem [thread:$0]  (!%p2631_p6), %s2743_s28, 1536, %s2738_s17, %s2642_s12, %s2551_s22, %s2551_s22, %s2552_s24  }
  0x6f   : > { %p5834_p8 = scmp.ne.s32.totalorder %s5830_s15, 0 }
  0x71   : > { %268 = sbr.rel (%p5834_p8) target bundleno = 485 (0x1e5), region = 36 }
  0x76   : > { %p5835_p4 = scmp.eq.s32.totalorder %s2668_s7, 0 }
  0x78   : > { %2512 = dma.done.wait (%p5835_p4), [#allocation5], 16   ;;  %p5836_p7 = pmov %p5835_p4 }
  0x79   : > { %s2773_s14 = sand.u32 1, %s2537_s19   ;;  %p5837_p6 = scmp.ne.s32.totalorder %s5826_s13, 0 }
  0x7a   : > { %2514 = vsyncadd (%p5836_p7), [#allocation5], 4294967280  ;;  %s2167_s16 = sshll.u32 %s2773_s14, 2  ;;  %s275_s27 = scalar_lea.sflag [#allocation3], %s2773_s14 }
  0x7b   : > { %s278_s29 = scalar_lea.vmem [#allocation6], %s2167_s16 }
  0x7c   : > { %2516 = dma.done.wait (%p5837_p6), %s275_s27, 64  }
  0x7d   : > { %2518 = vsyncadd (%p5837_p6), %s275_s27, 4294967232  ;;  %s283_s12 = sand.u32 1, %s2668_s7   ;;  %s2168_s15 = sshll.u32 %s2773_s14, 5 }
  0x7e   : > { %s284_s17 = scalar_lea.sflag [#allocation8], %s283_s12  ;;  %s287_s28 = scalar_lea.vmem [#allocation7], %s2168_s15 }
  0x7f   : > { %2520 = dma.done.wait (%p5837_p6), %s284_s17, 2048  }
  0x80   : > { %2522 = vsyncadd (%p5837_p6), %s284_s17, 4294965248  ;;  %s2192_s30 = smul.u32 96, %s2773_s14 }
  0x82   : > { %s2792_s6 = scalar_lea.vmem [#allocation9], %s2192_s30 }
  0x83   : > { %301 = sfence }
  0x84   : > { %v5607_v0 = vlaneseq  ;;  %s2171_s26 = sld [smem:[#allocation2 + $0x2]]  ;;  %v340_v2 = vld [vmem:[%s287_s28] sm:$0xff]  ;;  %v339_v3 = vld [vmem:[%s278_s29] sm:$0xf]  ;;  %v2799_v4 = vld [vmem:[%s287_s28 + $0x8] sm:$0xff]  ;;  %v5843_v33 = vmov 0 }
  0x85   : > { %s2172_s9 = sld [smem:[#allocation2 + $0x3]]  ;;  %v2801_v5 = vld [vmem:[%s287_s28 + $0x10] sm:$0xff]  ;;  %v2809_v8 = vld [vmem:[%s287_s28 + $0x18] sm:$0xff]  ;;  %vm390_vm0 = vcmp.eq.s32.totalorder %v340_v2, 2  ;;  %vm391_vm1 = vcmp.eq.s32.totalorder %v2799_v4, 2  ;;  %v2823_v16 = vld [vmem:[%s2792_s6] sm:$0xff] }
  0x86   : > { %v2795_v1 = vshrl.u32 %v5607_v0, 7  ;;  %s2170_s2 = sld [smem:[#allocation2 + $0x1]]  ;;  %vm392_vm2 = vcmp.eq.s32.totalorder %v2801_v5, 2  ;;  %5840 = vst [vmem:[#allocation23_spill] sm:$0xff] %v2823_v16  ;;  %vm386_vm3 = vcmp.eq.s32.totalorder %v340_v2, 1  ;;  %vm393_vm4 = vcmp.eq.s32.totalorder %v2809_v8, 2 }
  0x87   : > { %s2797_s25 = sld [smem:[#allocation2]]  ;;  %v2827_v19 = vld [vmem:[%s2792_s6 + $0x8] sm:$0xff]  ;;  %vm382_vm5 = vcmp.eq.s32.totalorder %v340_v2, 0  ;;  %vm383_vm6 = vcmp.eq.s32.totalorder %v2799_v4, 0  ;;  %vm387_vm7 = vcmp.eq.s32.totalorder %v2799_v4, 1  ;;  %v2833_v21 = vld [vmem:[%s2792_s6 + $0x10] sm:$0xff] }
  0x88   : > { %v2804_v6 = vsub.s32 0, %v2795_v1  ;;  %v2807_v7 = vsub.s32 1, %v2795_v1  ;;  %v2812_v9 = vsub.s32 2, %v2795_v1  ;;  %v2816_v13 = vsub.s32 3, %v2795_v1  ;;  %v2836_v22 = vld [vmem:[%s2792_s6 + $0x18] sm:$0xff]  ;;  %v2845_v25 = vld [vmem:[%s2792_s6 + $0x20] sm:$0xff] }
  0x89   : > { %vm388_vm8 = vcmp.eq.s32.totalorder %v2801_v5, 1  ;;  %vm389_vm9 = vcmp.eq.s32.totalorder %v2809_v8, 1  ;;  %5841 = vst [vmem:[#allocation24_spill] sm:$0xff] %v2845_v25  ;;  %v2848_v26 = vld [vmem:[%s2792_s6 + $0x28] sm:$0xff]  ;;  %v2859_v31 = vld [vmem:[%s2792_s6 + $0x30] sm:$0xff]  ;;  %v2862_v32 = vld [vmem:[%s2792_s6 + $0x38] sm:$0xff] }
  0x8a   : > { %5838 = vst [vmem:[#allocation21_spill] sm:$0xff] %v2812_v9  ;;  %v394_v10 = vstv %s2171_s26  ;;  %v361_v12 = vrot.slane %v339_v3, %v2804_v6  ;;  %5839 = vst [vmem:[#allocation22_spill] sm:$0xff] %v2816_v13  ;;  %v365_v14 = vrot.slane %v339_v3, %v2807_v7  ;;  %v369_v15 = vrot.slane %v339_v3, %v2812_v9  ;;  %v2882_v37 = vld [vmem:[%s2792_s6 + $0x40] sm:$0xff]  ;;  %v2885_v38 = vld [vmem:[%s2792_s6 + $0x48] sm:$0xff]  ;;  %s2193_s13 = smul.u32 1536, %s2668_s7  ;;  %s5496_s11 = scalar_lea.vmem [#allocation11], %s2192_s30 }
  0x8b   : > { %v395_v11 = vstv %s2172_s9  ;;  %v373_v20 = vrot.slane %v339_v3, %v2816_v13  ;;  %5842 = vst [vmem:[#allocation25_spill] sm:$0xff] %v2848_v26  ;;  %v417_v30 = vrot.slane %v2823_v16, %v2804_v6  ;;  %v5846_v34 = vmov 0  ;;  %v2888_v39 = vld [vmem:[%s2792_s6 + $0x50] sm:$0xff]  ;;  %v2925_v52 = vld [vmem:[%s2792_s6 + $0x58] sm:$0xff]  ;;  %s1994_s23 = sshll.u32 %s5496_s11, 4  ;;  %s1967_s27 = scalar_lea.sflag [#allocation12], %s2773_s14  ;;  %s5512_s23 = int_to_ptr.vmem [resolvable:$true] %s1994_s23 }
  0x8c   : > { %v396_v17 = vsel %vm390_vm0, %v394_v10, %v395_v11  ;;  %v400_v18 = vstv %s2170_s2  ;;  %v397_v23 = vsel %vm391_vm1, %v394_v10, %v395_v11  ;;  %v398_v24 = vsel %vm392_vm2, %v394_v10, %v395_v11  ;;  %s5508_s24 = scalar_lea.hbm %s5598_s5, %s2193_s13  ;;  %s2443_s29 = scalar_lea.vmem %s5512_s23, 1536 }
  0x8d   : > { %v399_v27 = vsel %vm393_vm4, %v394_v10, %v395_v11  ;;  %v401_v28 = vsel %vm386_vm3, %v400_v18, %v396_v17  ;;  %v2854_v29 = vstv %s2797_s25  ;;  %vm2865_vm10 = vcmp.lt.s32.totalorder %v2795_v1, %v361_v12  ;;  %p2444_p0 = scmp.ne.s32.totalorder %s5512_s23, %s2443_s29  ;;  %p6611_p12 = scmp.ne.s32.totalorder %s5828_s8, 0 }
  0x8e   : > { %v5844_v33 = vsel %vm2865_vm10, 4294967295, %v5843_v33  ;;  %vm2870_vm11 = vcmp.lt.s32.totalorder %v2795_v1, %v365_v14  ;;  %vm2875_vm12 = vcmp.lt.s32.totalorder %v2795_v1, %v369_v15  ;;  %v5849_v35 = vmov 0  ;;  %s2555_s12 = smov [#allocation11]  }
  0x8f   : > { %5845 = vst [vmem:[#allocation26_spill] sm:$0xff] %v5844_v33  ;;  %v5847_v34 = vsel %vm2870_vm11, 4294967295, %v5846_v34  ;;  %v5850_v35 = vsel %vm2875_vm12, 4294967295, %v5849_v35  ;;  %v421_v36 = vrot.slane %v2827_v19, %v2804_v6  ;;  %v402_v40 = vsel %vm387_vm7, %v400_v18, %v397_v23  ;;  %p2445_p1 = pnand %p2444_p0, %p6611_p12  ;;  %s2447_s15 = sshll.u32 %s2555_s12, 4  ;;  %s2448_s15 = int_to_ptr.vmem [resolvable:$false] %s2447_s15 }
  0x90   : > { %5848 = vst [vmem:[#allocation27_spill] sm:$0xff] %v5847_v34  ;;  %5851 = vst [vmem:[#allocation28_spill] sm:$0xff] %v5850_v35  ;;  %v2894_v41 = vsel %vm388_vm8, %v400_v18, %v398_v24  ;;  %v425_v42 = vrot.slane %v2833_v21, %v2804_v6  ;;  %v429_v43 = vrot.slane %v2836_v22, %v2804_v6  ;;  %v5852_v44 = vmov 0  ;;  %s2449_s17 = scalar_lea.vmem %s2448_s15, 3072  ;;  %p2450_p9 = scmp.lt.s32.totalorder %s5512_s23, %s2448_s15 }
  0x91   : > { %vm2901_vm13 = vcmp.lt.s32.totalorder %v2795_v1, %v373_v20  ;;  %v2907_v45 = vsel %vm389_vm9, %v400_v18, %v399_v27  ;;  %v2911_v46 = vsel %vm382_vm5, %v2854_v29, %v401_v28  ;;  %v437_v47 = vrot.slane %v2845_v25, %v2804_v6  ;;  %p2446_p5 = pneg %p2445_p1  ;;  %p2451_p10 = scmp.lt.s32.totalorder %s2449_s17, %s2443_s29 }
  0x92   : > { %v5853_v44 = vsel %vm2901_vm13, 4294967295, %v5852_v44  ;;  %v441_v48 = vrot.slane %v2848_v26, %v2804_v6  ;;  %v2918_v49 = vsub.f32 %v2823_v16, %v417_v30  ;;  %v445_v50 = vrot.slane %v2859_v31, %v2804_v6 }
  0x93   : > { %5854 = vst [vmem:[#allocation29_spill] sm:$0xff] %v5853_v44  ;;  %v449_v51 = vrot.slane %v2862_v32, %v2804_v6  ;;  %v457_v53 = vrot.slane %v2882_v37, %v2804_v6  ;;  %v461_v54 = vrot.slane %v2885_v38, %v2804_v6  ;;  %v465_v55 = vrot.slane %v2888_v39, %v2804_v6  ;;  %p2452_p11 = por %p2451_p10, %p2450_p9 }
  0x94   : > { %5855 = vst [vmem:[#allocation30_spill] sm:$0xff] %v2918_v49  ;;  %v2553_v56 = vmov 0   ;;  %v2940_v58 = vsel %vm383_vm6, %v2854_v29, %v402_v40  ;;  %v2943_v59 = vsub.f32 %v2827_v19, %v421_v36  ;;  %v2946_v60 = vsub.f32 %v2833_v21, %v425_v42 }
  0x95   : > { %v2935_v57 = vsel %vm2865_vm10, 1, %v2553_v56  ;;  %v2949_v61 = vsub.f32 %v2836_v22, %v429_v43  ;;  %v2952_v62 = vsub.f32 %v2845_v25, %v437_v47  ;;  %v2955_v63 = vsub.f32 %v2848_v26, %v441_v48  ;;  %p2453_p3 = pnand %p2452_p11, %p2446_p5 }
  0x96   : > { %5856 = vst [vmem:[#allocation31_spill] sm:$0xff] %v2935_v57  ;;  %5857 = vst [vmem:[#allocation32_spill] sm:$0xff] %v2943_v59  ;;  %v2959_v2 = vsel %vm2870_vm11, 1, %v2553_v56  ;;  %v2962_v3 = vrot.slane %v2935_v57, 7  ;;  %v2965_v4 = vsub.f32 %v2859_v31, %v445_v50  ;;  %v2968_v10 = vsub.f32 %v2862_v32, %v449_v51 }
  0x97   : > { %5858 = vst [vmem:[#allocation33_spill] sm:$0xff] %v2946_v60  ;;  %5859 = vst [vmem:[#allocation34_spill] sm:$0xff] %v2949_v61  ;;  %v469_v11 = vrot.slane %v2925_v52, %v2804_v6  ;;  %vm5676_vm14 = vcmask 1041409   ;;  %v2973_v12 = vsub.f32 %v2882_v37, %v457_v53  ;;  %v2976_v14 = vsub.f32 %v2885_v38, %v461_v54 }
  0x98   : > { %5860 = vst [vmem:[#allocation35_spill] sm:$0xff] %v2952_v62  ;;  %5861 = vst [vmem:[#allocation36_spill] sm:$0xff] %v2955_v63  ;;  %v2979_v15 = vsub.f32 %v2888_v39, %v465_v55  ;;  %v474_v17 = vmul.f32 %v2918_v49, %v2918_v49  ;;  %v475_v18 = vmul.f32 %v2943_v59, %v2943_v59  ;;  %v2987_v20 = vsel %vm2875_vm12, 1, %v2553_v56 }
  0x99   : > { %5862 = vst [vmem:[#allocation37_spill] sm:$0xff] %v2959_v2  ;;  %5863 = vst [vmem:[#allocation38_spill] sm:$0xff] %v2962_v3  ;;  %v2990_v6 = vrot.slane %v2935_v57, 6  ;;  %v2993_v23 = vrot.slane %v2959_v2, 7  ;;  %vm384_vm15 = vcmp.eq.s32.totalorder %v2801_v5, 0  ;;  %v476_v24 = vmul.f32 %v2946_v60, %v2946_v60 }
  0x9a   : > { %5864 = vst [vmem:[#allocation39_spill] sm:$0xff] %v2965_v4  ;;  %5865 = vst [vmem:[#allocation40_spill] sm:$0xff] %v2968_v10  ;;  %v508_v27 = vsel %vm5676_vm14, %v2962_v3, %v2935_v57  ;;  %vm5674_vm0 = vcmask 1042434   ;;  %v3002_v28 = vrot.slane %v2959_v2, 6  ;;  %v3005_v30 = vsub.f32 %v2925_v52, %v469_v11 }
  0x9b   : > { %5866 = vst [vmem:[#allocation41_spill] sm:$0xff] %v2973_v12  ;;  %5867 = vst [vmem:[#allocation42_spill] sm:$0xff] %v2976_v14  ;;  %v477_v36 = vmul.f32 %v2949_v61, %v2949_v61  ;;  %v478_v40 = vmul.f32 %v2952_v62, %v2952_v62  ;;  %v528_v42 = vsel %vm5676_vm14, %v2993_v23, %v2959_v2  ;;  %v3017_v47 = vrot.slane %v2935_v57, 5 }
  0x9c   : > { %5868 = vst [vmem:[#allocation43_spill] sm:$0xff] %v2979_v15  ;;  %5869 = vst [vmem:[#allocation44_spill] sm:$0xff] %v2987_v20  ;;  %v479_v43 = vmul.f32 %v2955_v63, %v2955_v63  ;;  %v3020_v48 = vrot.slane %v2987_v20, 7  ;;  %v3023_v50 = vrot.slane %v2987_v20, 6  ;;  %v3027_v51 = vsel %vm2901_vm13, 1, %v2553_v56 }
  0x9d   : > { %5870 = vst [vmem:[#allocation45_spill] sm:$0xff] %v2990_v6  ;;  %5871 = vst [vmem:[#allocation46_spill] sm:$0xff] %v2993_v23  ;;  %v511_v53 = vsel %vm5674_vm0, %v2990_v6, %v508_v27  ;;  %vm5700_vm1 = vcmask 1043459   ;;  %v3032_v54 = vrot.slane %v2959_v2, 5  ;;  %v480_v55 = vmul.f32 %v2965_v4, %v2965_v4 }
  0x9e   : > { %5872 = vst [vmem:[#allocation47_spill] sm:$0xff] %v3002_v28  ;;  %5873 = vst [vmem:[#allocation48_spill] sm:$0xff] %v3005_v30  ;;  %v530_v11 = vsel %vm5674_vm0, %v3002_v28, %v528_v42  ;;  %v542_v0 = vsel %vm5676_vm14, %v3020_v48, %v2987_v20  ;;  %v3042_v56 = vrot.slane %v2987_v20, 5  ;;  %v481_v27 = vmul.f32 %v2968_v10, %v2968_v10 }
  0x9f   : > { %5874 = vst [vmem:[#allocation49_spill] sm:$0xff] %v3017_v47  ;;  %5875 = vst [vmem:[#allocation50_spill] sm:$0xff] %v3020_v48  ;;  %v486_v13 = vmul.f32 %v2973_v12, %v2973_v12  ;;  %v3049_v61 = vrot.slane %v2935_v57, 4  ;;  %v544_v4 = vsel %vm5674_vm0, %v3023_v50, %v542_v0  ;;  %vm385_vm2 = vcmp.eq.s32.totalorder %v2809_v8, 0 }
  0xa0   : > { %5876 = vst [vmem:[#allocation51_spill] sm:$0xff] %v3023_v50  ;;  %5877 = vst [vmem:[#allocation52_spill] sm:$0xff] %v3027_v51  ;;  %v514_v42 = vsel %vm5700_vm1, %v3017_v47, %v511_v53  ;;  %vm5737_vm3 = vcmask 1044484   ;;  %v3057_v60 = vrot.slane %v2959_v2, 4  ;;  %v3060_v10 = vrot.slane %v3027_v51, 7 }
  0xa1   : > { %5878 = vst [vmem:[#allocation53_spill] sm:$0xff] %v3032_v54  ;;  %5879 = vst [vmem:[#allocation54_spill] sm:$0xff] %v3042_v56  ;;  %v482_v9 = vadd.f32 %v478_v40, %v474_v17  ;;  %v487_v63 = vmul.f32 %v2976_v14, %v2976_v14  ;;  %v532_v59 = vsel %vm5700_vm1, %v3032_v54, %v530_v11  ;;  %v3067_v0 = vrot.slane %v2987_v20, 4 }
  0xa2   : > { %5880 = vst [vmem:[#allocation55_spill] sm:$0xff] %v3049_v61  ;;  %5881 = vst [vmem:[#allocation56_spill] sm:$0xff] %v3057_v60  ;;  %v483_v12 = vadd.f32 %v479_v43, %v475_v18  ;;  %v488_v53 = vmul.f32 %v2979_v15, %v2979_v15  ;;  %v3072_v62 = vrot.slane %v2935_v57, 3  ;;  %v546_v49 = vsel %vm5700_vm1, %v3042_v56, %v544_v4 }
  0xa3   : > { %5882 = vst [vmem:[#allocation57_spill] sm:$0xff] %v3060_v10  ;;  %5883 = vst [vmem:[#allocation58_spill] sm:$0xff] %v3067_v0  ;;  %v517_v17 = vsel %vm5737_vm3, %v3049_v61, %v514_v42  ;;  %vm5698_vm4 = vcmask 1045509   ;;  %v3079_v40 = vrot.slane %v2959_v2, 3  ;;  %v3082_v11 = vrot.slane %v3027_v51, 6 }
  0xa4   : > { %5884 = vst [vmem:[#allocation59_spill] sm:$0xff] %v3072_v62  ;;  %v484_v18 = vadd.f32 %v480_v55, %v476_v24  ;;  %v534_v43 = vsel %vm5737_vm3, %v3057_v60, %v532_v59  ;;  %v3087_v15 = vrot.slane %v2987_v20, 3  ;;  %v556_v4 = vsel %vm5676_vm14, %v3060_v10, %v3027_v51 }
  0xa5   : > { %5885 = vst [vmem:[#allocation60_spill] sm:$0xff] %v3079_v40  ;;  %5886 = vst [vmem:[#allocation61_spill] sm:$0xff] %v3082_v11  ;;  %v3096_v42 = vsel %vm384_vm15, %v2854_v29, %v2894_v41  ;;  %v489_v14 = vmul.f32 %v3005_v30, %v3005_v30  ;;  %v3100_v24 = vadd.f32 %v486_v13, %v482_v9  ;;  %vm5686_vm5 = vcmask 1046534  }
  0xa6   : > { %5887 = vst [vmem:[#allocation62_spill] sm:$0xff] %v3087_v15  ;;  %v548_v59 = vsel %vm5737_vm3, %v3067_v0, %v546_v49  ;;  %v3104_v55 = vadd.f32 %v487_v63, %v483_v12  ;;  %v520_v56 = vsel %vm5698_vm4, %v3072_v62, %v517_v17  ;;  %v3109_v44 = vrot.slane %v3027_v51, 5 }
  0xa7   : > { %v485_v5 = vadd.f32 %v481_v27, %v477_v36  ;;  %v3112_v41 = vrot.slane %v2935_v57, 2  ;;  %v536_v9 = vsel %vm5698_vm4, %v3079_v40, %v534_v43  ;;  %v558_v13 = vsel %vm5674_vm0, %v3082_v11, %v556_v4 }
  0xa8   : > { %5888 = vst [vmem:[#allocation63_spill] sm:$0xff] %v3109_v44  ;;  %v3118_v49 = vadd.f32 %v488_v53, %v484_v18  ;;  %vm5671_vm6 = vcmask 1047559   ;;  %v3121_v63 = vrot.slane %v2959_v2, 2  ;;  %v550_v12 = vsel %vm5698_vm4, %v3087_v15, %v548_v59 }
  0xa9   : > { %5889 = vst [vmem:[#allocation64_spill] sm:$0xff] %v3112_v41  ;;  %v523_v36 = vsel %vm5686_vm5, %v3112_v41, %v520_v56  ;;  %v3128_v27 = vrot.slane %v2987_v20, 2  ;;  %v3131_v17 = vrot.slane %v3027_v51, 4  ;;  %v590_v43 = vmul.f32 -1.0, %v3100_v24 }
  0xaa   : > { %5890 = vst [vmem:[#allocation65_spill] sm:$0xff] %v3121_v63  ;;  %v3135_v53 = vrot.slane %v2935_v57, 1  ;;  %v538_v18 = vsel %vm5686_vm5, %v3121_v63, %v536_v9  ;;  %v560_v4 = vsel %vm5700_vm1, %v3109_v44, %v558_v13  ;;  %v591_v59 = vmul.f32 -1.0, %v3104_v55 }
  0xab   : > { %5891 = vst [vmem:[#allocation66_spill] sm:$0xff] %v3128_v27  ;;  %5892 = vst [vmem:[#allocation67_spill] sm:$0xff] %v3131_v17  ;;  %v3146_v56 = vsel %vm385_vm2, %v2854_v29, %v2907_v45  ;;  %v3151_v30 = vsel %vm2865_vm10, %v2911_v46, 0.0  ;;  %v3154_v15 = vrot.slane %v2959_v2, 1  ;;  %v552_v9 = vsel %vm5686_vm5, %v3128_v27, %v550_v12  ;;  %v6419_v34 = vld [vmem:[#allocation59_spill] sm:$0xff] }
  0xac   : > { %5893 = vst [vmem:[#allocation68_spill] sm:$0xff] %v3135_v53  ;;  %5894 = vst [vmem:[#allocation69_spill] sm:$0xff] %v3151_v30  ;;  %v3158_v13 = vadd.f32 %v489_v14, %v485_v5  ;;  %v526_v63 = vsel %vm5671_vm6, %v3135_v53, %v523_v36  ;;  %v3163_v8 = vrot.slane %v2987_v20, 1  ;;  %v3166_v29 = vrot.slane %v3027_v51, 3 }
  0xad   : > { %5895 = vst [vmem:[#allocation70_spill] sm:$0xff] %v3154_v15  ;;  %v540_v45 = vsel %vm5671_vm6, %v3154_v15, %v538_v18  ;;  %v562_v46 = vsel %vm5737_vm3, %v3131_v17, %v560_v4  ;;  %v592_v30 = vmul.f32 -1.0, %v3118_v49  ;;  %v594_v12 = vmul.f32 1.442695, %v590_v43 }
  0xae   : > { %5896 = vst [vmem:[#allocation71_spill] sm:$0xff] %v3163_v8  ;;  %5897 = vst [vmem:[#allocation72_spill] sm:$0xff] %v3166_v29  ;;  %v554_v14 = vsel %vm5671_vm6, %v3163_v8, %v552_v9  ;;  %v3176_v5 = vrot.slane %v3027_v51, 2  ;;  %v596_v36 = vmul.f32 1.442695, %v591_v59  ;;  %v637_v27 = vrot.slane %v2823_v16, %v2807_v7 }
  0xaf   : > { %v3181_v0 = vrot.slane %v3027_v51, 1  ;;  %v641_v18 = vrot.slane %v2827_v19, %v2807_v7  ;;  %v645_v4 = vrot.slane %v2833_v21, %v2807_v7  ;;  %v657_v43 = vrot.slane %v2845_v25, %v2807_v7 }
  0xb0   : > { %5898 = vst [vmem:[#allocation73_spill] sm:$0xff] %v3176_v5  ;;  %v564_v9 = vsel %vm5698_vm4, %v3166_v29, %v562_v46  ;;  %vm569_vm7 = vcmp.ne.s32.totalorder %v526_v63, 0  ;;  %vm570_vm8 = vcmp.ne.s32.totalorder %v540_v45, 0  ;;  %v661_v59 = vrot.slane %v2848_v26, %v2807_v7 }
  0xb1   : > { %5899 = vst [vmem:[#allocation74_spill] sm:$0xff] %v3181_v0  ;;  %vm571_vm9 = vcmp.ne.s32.totalorder %v554_v14, 0  ;;  %2272 = vpow2.f32 %v594_v12  ;;  %v598_v17 = vmul.f32 1.442695, %v592_v30  ;;  %v649_v41 = vrot.slane %v2836_v22, %v2807_v7  ;;  %vm3276_vm2 = vmand %vm2865_vm10, %vm569_vm7  ;;  %v5932_v14 = vld [vmem:[#allocation59_spill] sm:$0xff] }
  0xb2   : > { %v665_v40 = vrot.slane %v2859_v31, %v2807_v7  ;;  %vm5677_vm15 = vcmp.ne.s32.totalorder %v2795_v1, 0  ;;  %2274 = vpow2.f32 %v596_v36  ;;  %v3199_v44 = vsub.f32 %v2823_v16, %v637_v27  ;;  %vm3294_vm7 = vmand %vm2870_vm11, %vm570_vm8 }
  0xb3   : > { %v669_v46 = vrot.slane %v2862_v32, %v2807_v7  ;;  %v677_v29 = vrot.slane %v2882_v37, %v2807_v7  ;;  %v3206_v30 = vsub.f32 %v2827_v19, %v641_v18  ;;  %v3209_v12 = vsub.f32 %v2833_v21, %v645_v4  ;;  %vm3303_vm6 = vmand %vm2875_vm12, %vm571_vm9 }
  0xb4   : > { %5900 = vst [vmem:[#allocation75_spill] sm:$0xff] %v3199_v44  ;;  %v3212_v62 = vsub.f32 %v2845_v25, %v657_v43  ;;  %v681_v36 = vrot.slane %v2885_v38, %v2807_v7  ;;  %v3217_v27 = vsub.f32 %v2848_v26, %v661_v59  ;;  %v685_v16 = vrot.slane %v2888_v39, %v2807_v7  ;;  %vm3317_vm8 = vmand %vm3276_vm2, %vm5677_vm15 }
  0xb5   : > { %5901 = vst [vmem:[#allocation76_spill] sm:$0xff] %v3206_v30  ;;  %5902 = vst [vmem:[#allocation77_spill] sm:$0xff] %v3209_v12  ;;  %v714_v18 = vsel %vm5676_vm14, %v2935_v57, %v3135_v53  ;;  %v721_v4 = vsel %vm5676_vm14, %v2959_v2, %v3154_v15  ;;  %v593_v43 = vmul.f32 -1.0, %v3158_v13  ;;  %2276 = vpow2.f32 %v598_v17 }
  0xb6   : > { %5903 = vst [vmem:[#allocation78_spill] sm:$0xff] %v3212_v62  ;;  %5904 = vst [vmem:[#allocation79_spill] sm:$0xff] %v3217_v27  ;;  %v3230_v25 = vsub.f32 %v2859_v31, %v665_v40  ;;  %v689_v59 = vrot.slane %v2925_v52, %v2807_v7  ;;  %v3235_v26 = vsub.f32 %v2836_v22, %v649_v41  ;;  %vm583_vm2 = vcmp.lt.f32.partialorder %v3104_v55, 25.0  ;;  %v5935_v55 = vld [vmem:[#allocation60_spill] sm:$0xff] }
  0xb7   : > { %v3238_v57 = vsub.f32 %v2862_v32, %v669_v46  ;;  %v3241_v53 = vsub.f32 %v2882_v37, %v677_v29  ;;  %v715_v2 = vsel %vm5674_vm0, %v2962_v3, %v714_v18  ;;  %v3246_v17 = vsub.f32 %v2885_v38, %v681_v36  ;;  %vm3336_vm9 = vmand %vm3294_vm7, %vm5677_vm15 }
  0xb8   : > { %5905 = vst [vmem:[#allocation80_spill] sm:$0xff] %v3230_v25  ;;  %5906 = vst [vmem:[#allocation81_spill] sm:$0xff] %v3235_v26  ;;  %v694_v40 = vmul.f32 %v3199_v44, %v3199_v44  ;;  %v698_v7 = vmul.f32 %v3212_v62, %v3212_v62  ;;  %v722_v41 = vsel %vm5674_vm0, %v2993_v23, %v721_v4  ;;  %vm5925_vm7 = vcmask 1047559  }
  0xb9   : > { %5907 = vst [vmem:[#allocation82_spill] sm:$0xff] %v3238_v57  ;;  %5908 = vst [vmem:[#allocation83_spill] sm:$0xff] %v3241_v53  ;;  %v3255_v46 = vsub.f32 %v2888_v39, %v685_v16  ;;  %v695_v29 = vmul.f32 %v3206_v30, %v3206_v30  ;;  %v696_v18 = vmul.f32 %v3209_v12, %v3209_v12 }
  0xba   : > { %5909 = vst [vmem:[#allocation84_spill] sm:$0xff] %v3246_v17  ;;  %v699_v36 = vmul.f32 %v3217_v27, %v3217_v27  ;;  %v3264_v44 = vsub.f32 %v2925_v52, %v689_v59  ;;  %v700_v62 = vmul.f32 %v3230_v25, %v3230_v25  ;;  %v716_v4 = vsel %vm5700_vm1, %v2990_v6, %v715_v2 }
  0xbb   : > { %5910 = vst [vmem:[#allocation85_spill] sm:$0xff] %v3255_v46  ;;  %v728_v16 = vsel %vm5676_vm14, %v2987_v20, %v3163_v8  ;;  %v697_v59 = vmul.f32 %v3235_v26, %v3235_v26  ;;  %v701_v25 = vmul.f32 %v3238_v57, %v3238_v57  ;;  %v723_v2 = vsel %vm5700_vm1, %v3002_v28, %v722_v41 }
  0xbc   : > { %5911 = vst [vmem:[#allocation86_spill] sm:$0xff] %v3264_v44  ;;  %v735_v27 = vsel %vm5676_vm14, %v3027_v51, %v3181_v0  ;;  %v566_v63 = vsel %vm5686_vm5, %v3176_v5, %v564_v9  ;;  %v600_v26 = vmul.f32 1.442695, %v593_v43  ;;  %v702_v23 = vadd.f32 %v698_v7, %v694_v40 }
  0xbd   : > { %v706_v57 = vmul.f32 %v3241_v53, %v3241_v53  ;;  %v703_v9 = vadd.f32 %v699_v36, %v695_v29  ;;  %v707_v45 = vmul.f32 %v3246_v17, %v3246_v17  ;;  %v717_v28 = vsel %vm5737_vm3, %v3017_v47, %v716_v4  ;;  %v5955_v53 = vld [vmem:[#allocation23_spill] sm:$0xff] }
  0xbe   : > { %v729_v43 = vsel %vm5674_vm0, %v3020_v48, %v728_v16  ;;  %v704_v40 = vadd.f32 %v700_v62, %v696_v18  ;;  %v708_v7 = vmul.f32 %v3255_v46, %v3255_v46  ;;  %v724_v29 = vsel %vm5737_vm3, %v3032_v54, %v723_v2  ;;  %v2273_v4 = vpop.eup %2272 }
  0xbf   : > { %v736_v36 = vsel %vm5674_vm0, %v3060_v10, %v735_v27  ;;  %v3330_v16 = vsel %vm2870_vm11, %v2940_v58, 0.0  ;;  %v705_v12 = vadd.f32 %v701_v25, %v697_v59  ;;  %v709_v27 = vmul.f32 %v3264_v44, %v3264_v44  ;;  %v2275_v18 = vpop.eup %2274  ;;  %vm3347_vm0 = vmand %vm3303_vm6, %vm5677_vm15 }
  0xc0   : > { %5920 = vst [vmem:[#allocation87_spill] sm:$0xff] %v3330_v16  ;;  %v3351_v30 = vadd.f32 %v706_v57, %v702_v23  ;;  %v718_v2 = vsel %vm5698_vm4, %v3049_v61, %v717_v28  ;;  %v730_v25 = vsel %vm5700_vm1, %v3023_v50, %v729_v43  ;;  %v737_v59 = vsel %vm5700_vm1, %v3082_v11, %v736_v36 }
  0xc1   : > { %v568_v16 = vsel %vm5925_vm7, %v3181_v0, %v566_v63  ;;  %vm584_vm14 = vcmp.lt.f32.partialorder %v3118_v49, 25.0  ;;  %vm5926_vm6 = vcmp.lt.f32.partialorder %v3100_v24, 25.0  ;;  %v3370_v23 = vadd.f32 %v707_v45, %v703_v9 }
  0xc2   : > { %vm3366_vm15 = vmand %vm3317_vm8, %vm5926_vm6  ;;  %v725_v28 = vsel %vm5698_vm4, %v3057_v60, %v724_v29  ;;  %v3377_v41 = vsel %vm2875_vm12, %v3096_v42, 0.0  ;;  %v3382_v24 = vsel %vm2901_vm13, %v3146_v56, 0.0  ;;  %2278 = vpow2.f32 %v600_v26  ;;  %v2277_v45 = vpop.eup %2276  ;;  %v5933_v29 = vld [vmem:[#allocation54_spill] sm:$0xff]  ;;  %v5954_v60 = vld [vmem:[#allocation21_spill] sm:$0xff] }
  0xc3   : > { %5929 = vst [vmem:[#allocation88_spill] sm:$0xff] %v3377_v41  ;;  %5931 = vst [vmem:[#allocation89_spill] sm:$0xff] %v3382_v24  ;;  %v3388_v9 = vadd.f32 %v708_v7, %v704_v40  ;;  %v3390_v43 = vadd.f32 %v709_v27, %v705_v12  ;;  %v719_v42 = vsel %vm5686_vm5, %v5932_v14, %v718_v2  ;;  %v5934_v41 = vld [vmem:[#allocation63_spill] sm:$0xff]  ;;  %vm572_vm7 = vcmp.ne.s32.totalorder %v568_v16, 0  ;;  %v5936_v12 = vld [vmem:[#allocation30_spill] sm:$0xff] }
  0xc4   : > { %vm587_vm8 = vmand %vm3336_vm9, %vm583_vm2  ;;  %v731_v36 = vsel %vm5737_vm3, %v5933_v29, %v730_v25  ;;  %v738_v56 = vsel %vm5737_vm3, %v5934_v41, %v737_v59  ;;  %vm585_vm6 = vcmp.lt.f32.partialorder %v3158_v13, 25.0  ;;  %v3405_v26 = vsel %vm3366_vm15, %v2273_v4, 0.0  ;;  %v5937_v2 = vld [vmem:[#allocation35_spill] sm:$0xff]  ;;  %v5939_v25 = vld [vmem:[#allocation64_spill] sm:$0xff] }
  0xc5   : > { %vm588_vm9 = vmand %vm3347_vm0, %vm584_vm14  ;;  %v726_v40 = vsel %vm5686_vm5, %v5935_v55, %v725_v28  ;;  %v763_v7 = vmul.f32 -1.0, %v3351_v30  ;;  %v3410_v62 = vsel %vm587_vm8, %v2275_v18, 0.0  ;;  %v3414_v27 = vmul.f32 %v3405_v26, %v5936_v12  ;;  %v5941_v59 = vld [vmem:[#allocation58_spill] sm:$0xff]  ;;  %v5942_v28 = vld [vmem:[#allocation67_spill] sm:$0xff] }
  0xc6   : > { %v3418_v49 = vmul.f32 %v3405_v26, %v5937_v2  ;;  %v764_v58 = vmul.f32 -1.0, %v3370_v23  ;;  %vm5940_vm14 = vcmask 1047559   ;;  %v732_v57 = vsel %vm5698_vm4, %v5941_v59, %v731_v36  ;;  %v5943_v12 = vld [vmem:[#allocation41_spill] sm:$0xff]  ;;  %v5948_v36 = vld [vmem:[#allocation36_spill] sm:$0xff]  ;;  %vm576_vm15 = vmand %vm2901_vm13, %vm572_vm7 }
  0xc7   : > { %v720_v4 = vsel %vm5940_vm14, %v5939_v25, %v719_v42  ;;  %v739_v18 = vsel %vm5698_vm4, %v5942_v28, %v738_v56  ;;  %v765_v24 = vmul.f32 -1.0, %v3388_v9  ;;  %v3428_v55 = vsel %vm588_vm9, %v2277_v45, 0.0  ;;  %v5945_v2 = vld [vmem:[#allocation65_spill] sm:$0xff]  ;;  %vm5946_vm0 = vmmov %vm5940_vm14  ;;  %v5947_v42 = vld [vmem:[#allocation32_spill] sm:$0xff] }
  0xc8   : > { %5938 = vst [vmem:[#allocation30_spill] sm:$0xff] %v3418_v49  ;;  %v3432_v44 = vmul.f32 %v3405_v26, %v5943_v12  ;;  %v727_v46 = vsel %vm5946_vm0, %v5945_v2, %v726_v40  ;;  %v766_v17 = vmul.f32 -1.0, %v3390_v43  ;;  %v3439_v41 = vmul.f32 %v3410_v62, %v5947_v42  ;;  %v5950_v28 = vld [vmem:[#allocation42_spill] sm:$0xff] }
  0xc9   : > { %v3443_v56 = vmul.f32 %v3410_v62, %v5948_v36  ;;  %v3447_v45 = vmul.f32 %v3410_v62, %v5950_v28  ;;  %v767_v14 = vmul.f32 1.442695, %v763_v7  ;;  %v5952_v40 = vld [vmem:[#allocation62_spill] sm:$0xff]  ;;  %vm742_vm2 = vcmp.ne.s32.totalorder %v720_v4, 0 }
  0xca   : > { %5944 = vst [vmem:[#allocation35_spill] sm:$0xff] %v3432_v44  ;;  %v733_v12 = vsel %vm5686_vm5, %v5952_v40, %v732_v57  ;;  %v5953_v44 = vld [vmem:[#allocation72_spill] sm:$0xff]  ;;  %v769_v59 = vmul.f32 1.442695, %v764_v58  ;;  %vm743_vm8 = vcmp.ne.s32.totalorder %v727_v46, 0  ;;  %v814_v7 = vrot.slane %v2827_v19, %v5954_v60  ;;  %v5958_v58 = vld [vmem:[#allocation66_spill] sm:$0xff] }
  0xcb   : > { %5949 = vst [vmem:[#allocation41_spill] sm:$0xff] %v3443_v56  ;;  %5951 = vst [vmem:[#allocation32_spill] sm:$0xff] %v3447_v45  ;;  %v740_v42 = vsel %vm5686_vm5, %v5953_v44, %v739_v18  ;;  %v771_v36 = vmul.f32 1.442695, %v765_v24  ;;  %v810_v56 = vrot.slane %v5955_v53, %v5954_v60  ;;  %vm750_vm9 = vcmp.ne.s32.totalorder %v2795_v1, 1  ;;  %v5956_v57 = vld [vmem:[#allocation24_spill] sm:$0xff] }
  0xcc   : > { %v773_v16 = vmul.f32 1.442695, %v766_v17  ;;  %v818_v28 = vrot.slane %v2833_v21, %v5954_v60  ;;  %v830_v45 = vrot.slane %v5956_v57, %v5954_v60  ;;  %vm5957_vm7 = vcmp.ne.s32.totalorder %v2795_v1, 0  ;;  %vm5959_vm5 = vmmov %vm5946_vm0  ;;  %v5960_v44 = vld [vmem:[#allocation25_spill] sm:$0xff] }
  0xcd   : > { %vm581_vm14 = vmand %vm576_vm15, %vm5957_vm7  ;;  %v734_v24 = vsel %vm5946_vm0, %v5958_v58, %v733_v12  ;;  %v741_v18 = vsel %vm5959_vm5, %v3176_v5, %v740_v42  ;;  %2280 = vpow2.f32 %v767_v14  ;;  %v834_v40 = vrot.slane %v5960_v44, %v5954_v60 }
  0xce   : > { %2282 = vpow2.f32 %v769_v59  ;;  %v822_v17 = vrot.slane %v2836_v22, %v5954_v60  ;;  %v838_v49 = vrot.slane %v2859_v31, %v5954_v60  ;;  %v842_v11 = vrot.slane %v2862_v32, %v5954_v60  ;;  %vm589_vm5 = vmand %vm581_vm14, %vm585_vm6 }
  0xcf   : > { %2284 = vpow2.f32 %v771_v36  ;;  %v3480_v12 = vsub.f32 %v5955_v53, %v810_v56  ;;  %v3483_v42 = vsub.f32 %v2827_v19, %v814_v7  ;;  %v850_v14 = vrot.slane %v2882_v37, %v5954_v60  ;;  %v2279_v59 = vpop.eup %2278  ;;  %vm746_vm15 = vmand %vm2865_vm10, %vm742_vm2 }
  0xd0   : > { %2286 = vpow2.f32 %v773_v16  ;;  %v3490_v29 = vsub.f32 %v2833_v21, %v818_v28  ;;  %v3493_v54 = vsub.f32 %v5956_v57, %v830_v45  ;;  %v854_v56 = vrot.slane %v2885_v38, %v5954_v60  ;;  %v5966_v16 = vld [vmem:[#allocation68_spill] sm:$0xff]  ;;  %vm3524_vm14 = vmand %vm2870_vm11, %vm743_vm8 }
  0xd1   : > { %5961 = vst [vmem:[#allocation36_spill] sm:$0xff] %v3480_v12  ;;  %5962 = vst [vmem:[#allocation42_spill] sm:$0xff] %v3483_v42  ;;  %v3501_v36 = vsub.f32 %v5960_v44, %v834_v40  ;;  %v858_v13 = vrot.slane %v2888_v39, %v5954_v60  ;;  %v862_v7 = vrot.slane %v2925_v52, %v5954_v60  ;;  %vm5967_vm6 = vcmask 1041409  }
  0xd2   : > { %5963 = vst [vmem:[#allocation21_spill] sm:$0xff] %v3490_v29  ;;  %5964 = vst [vmem:[#allocation23_spill] sm:$0xff] %v3493_v54  ;;  %v887_v45 = vsel %vm5967_vm6, %v5966_v16, %v5939_v25  ;;  %vm744_vm7 = vcmp.ne.s32.totalorder %v734_v24, 0  ;;  %v3511_v28 = vsub.f32 %v2836_v22, %v822_v17  ;;  %v3514_v4 = vsub.f32 %v2859_v31, %v838_v49  ;;  %v5974_v17 = vld [vmem:[#allocation31_spill] sm:$0xff] }
  0xd3   : > { %5965 = vst [vmem:[#allocation24_spill] sm:$0xff] %v3501_v36  ;;  %v3517_v40 = vsub.f32 %v2862_v32, %v842_v11  ;;  %v3519_v33 = vsel %vm589_vm5, %v2279_v59, 0.0  ;;  %vm745_vm2 = vcmp.ne.s32.totalorder %v741_v18, 0  ;;  %v3529_v24 = vsub.f32 %v2882_v37, %v850_v14  ;;  %vm3535_vm6 = vmand %vm746_vm15, %vm750_vm9  ;;  %v5999_v11 = vld [vmem:[#allocation43_spill] sm:$0xff] }
  0xd4   : > { %5968 = vst [vmem:[#allocation25_spill] sm:$0xff] %v3511_v28  ;;  %5969 = vst [vmem:[#allocation90_spill] sm:$0xff] %v3514_v4  ;;  %vm5975_vm0 = vcmask 1042434   ;;  %v3540_v46 = vsub.f32 %v2885_v38, %v854_v56  ;;  %v867_v18 = vmul.f32 %v3480_v12, %v3480_v12  ;;  %v868_v59 = vmul.f32 %v3483_v42, %v3483_v42 }
  0xd5   : > { %5970 = vst [vmem:[#allocation91_spill] sm:$0xff] %v3517_v40  ;;  %5973 = vst [vmem:[#allocation92_spill] sm:$0xff] %v3529_v24  ;;  %v888_v49 = vsel %vm5975_vm0, %v5974_v17, %v887_v45  ;;  %v871_v14 = vmul.f32 %v3493_v54, %v3493_v54  ;;  %v3555_v17 = vsub.f32 %v2888_v39, %v858_v13  ;;  %vm5987_vm4 = vcmask 1041409   ;;  %v6018_v54 = vld [vmem:[#allocation47_spill] sm:$0xff] }
  0xd6   : > { %5978 = vst [vmem:[#allocation93_spill] sm:$0xff] %v3540_v46  ;;  %vm3550_vm8 = vmand %vm2875_vm12, %vm744_vm7  ;;  %v3558_v56 = vsub.f32 %v2925_v52, %v862_v7  ;;  %v869_v12 = vmul.f32 %v3490_v29, %v3490_v29  ;;  %v872_v42 = vmul.f32 %v3501_v36, %v3501_v36  ;;  %v870_v16 = vmul.f32 %v3511_v28, %v3511_v28 }
  0xd7   : > { %5981 = vst [vmem:[#allocation94_spill] sm:$0xff] %v3555_v17  ;;  %vm3566_vm5 = vmand %vm2901_vm13, %vm745_vm2  ;;  %v873_v13 = vmul.f32 %v3514_v4, %v3514_v4  ;;  %v874_v7 = vmul.f32 %v3517_v40, %v3517_v40  ;;  %v889_v29 = vsel %vm5700_vm1, %v2962_v3, %v888_v49  ;;  %vm755_vm7 = vcmp.lt.f32.partialorder %v3351_v30, 25.0 }
  0xd8   : > { %5982 = vst [vmem:[#allocation95_spill] sm:$0xff] %v3558_v56  ;;  %vm3582_vm15 = vmand %vm3524_vm14, %vm750_vm9  ;;  %vm756_vm2 = vcmp.lt.f32.partialorder %v3370_v23, 25.0  ;;  %v894_v40 = vsel %vm5987_vm4, %v3154_v15, %v5945_v2  ;;  %vm758_vm14 = vcmp.lt.f32.partialorder %v3390_v43, 25.0  ;;  %v875_v49 = vadd.f32 %v871_v14, %v867_v18  ;;  %v5997_v2 = vld [vmem:[#allocation33_spill] sm:$0xff] }
  0xd9   : > { %vm3596_vm1 = vmand %vm3550_vm8, %vm750_vm9  ;;  %v879_v4 = vmul.f32 %v3529_v24, %v3529_v24  ;;  %v876_v3 = vadd.f32 %v872_v42, %v868_v59  ;;  %v880_v15 = vmul.f32 %v3540_v46, %v3540_v46  ;;  %v881_v18 = vmul.f32 %v3555_v17, %v3555_v17  ;;  %v5995_v46 = vld [vmem:[#allocation37_spill] sm:$0xff] }
  0xda   : > { %vm5990_vm0 = vmmov %vm5987_vm4  ;;  %v890_v14 = vsel %vm5737_vm3, %v2990_v6, %v889_v29  ;;  %v2281_v24 = vpop.eup %2280  ;;  %v878_v42 = vadd.f32 %v874_v7, %v870_v16  ;;  %v882_v59 = vmul.f32 %v3558_v56, %v3558_v56  ;;  %v612_v29 = vmul.f32 %v3428_v55, %v5997_v2  ;;  %v5998_v6 = vld [vmem:[#allocation39_spill] sm:$0xff]  ;;  %v6003_v2 = vld [vmem:[#allocation34_spill] sm:$0xff] }
  0xdb   : > { %v901_v28 = vsel %vm5990_vm0, %v3163_v8, %v5958_v58  ;;  %vm3610_vm4 = vmand %vm3566_vm5, %vm750_vm9  ;;  %v877_v8 = vadd.f32 %v873_v13, %v869_v12  ;;  %vm5996_vm9 = vcmask 1042434   ;;  %v2283_v58 = vpop.eup %2282  ;;  %v620_v30 = vmul.f32 %v3428_v55, %v5998_v6  ;;  %v6004_v6 = vld [vmem:[#allocation40_spill] sm:$0xff] }
  0xdc   : > { %vm3624_vm8 = vmand %vm3535_vm6, %vm755_vm7  ;;  %v895_v17 = vsel %vm5996_vm9, %v5995_v46, %v894_v40  ;;  %v3638_v63 = vmul.f32 %v3428_v55, %v5999_v11  ;;  %v2285_v40 = vpop.eup %2284  ;;  %v613_v13 = vmul.f32 %v3519_v33, %v6003_v2  ;;  %v621_v7 = vmul.f32 %v3519_v33, %v6004_v6  ;;  %v6010_v2 = vld [vmem:[#allocation48_spill] sm:$0xff]  ;;  %v6011_v6 = vld [vmem:[#allocation46_spill] sm:$0xff] }
  0xdd   : > { %vm3644_vm6 = vmand %vm3582_vm15, %vm756_vm2  ;;  %vm6005_vm7 = vcmp.lt.f32.partialorder %v3388_v9, 25.0  ;;  %vm6008_vm15 = vcmask 1045509   ;;  %vm6009_vm2 = vcmask 1041409   ;;  %v2287_v11 = vpop.eup %2286  ;;  %v3669_v56 = vmul.f32 %v3519_v33, %v6010_v2 }
  0xde   : > { %vm6002_vm5 = vmmov %vm5996_vm9  ;;  %v891_v36 = vsel %vm6008_vm15, %v3017_v47, %v890_v14  ;;  %v3675_v9 = vadd.f32 %v879_v4, %v875_v49  ;;  %v3677_v60 = vadd.f32 %v880_v15, %v876_v3  ;;  %vm6012_vm9 = vcmask 1043459   ;;  %v6014_v4 = vld [vmem:[#allocation75_spill] sm:$0xff] }
  0xdf   : > { %v902_v16 = vsel %vm6002_vm5, %v2987_v20, %v901_v28  ;;  %vm3658_vm0 = vmand %vm3596_vm1, %vm6005_vm7  ;;  %v908_v28 = vsel %vm6009_vm2, %v3181_v0, %v3176_v5  ;;  %v896_v14 = vsel %vm6012_vm9, %v6011_v6, %v895_v17  ;;  %v775_v47 = vsel %vm3624_vm8, %v2281_v24, 0.0  ;;  %v6017_v17 = vld [vmem:[#allocation76_spill] sm:$0xff] }
  0xe0   : > { %vm762_vm1 = vmand %vm3610_vm4, %vm758_vm14  ;;  %v3683_v20 = vadd.f32 %v881_v18, %v877_v8  ;;  %v3685_v0 = vadd.f32 %v882_v59, %v878_v42  ;;  %v776_v45 = vsel %vm3644_vm6, %v2283_v58, 0.0  ;;  %v783_v49 = vmul.f32 %v775_v47, %v6014_v4  ;;  %v6019_v58 = vld [vmem:[#allocation77_spill] sm:$0xff] }
  0xe1   : > { %vm6013_vm5 = vmmov %vm6012_vm9  ;;  %vm6015_vm14 = vcmask 1046534   ;;  %vm6016_vm4 = vcmask 1042434   ;;  %v777_v8 = vsel %vm3658_vm0, %v2285_v40, 0.0  ;;  %v778_v24 = vsel %vm762_vm1, %v2287_v11, 0.0  ;;  %v6021_v40 = vld [vmem:[#allocation81_spill] sm:$0xff]  ;;  %v6022_v11 = vld [vmem:[#allocation79_spill] sm:$0xff] }
  0xe2   : > { %v903_v43 = vsel %vm6013_vm5, %v3020_v48, %v902_v16  ;;  %v892_v3 = vsel %vm6015_vm14, %v3049_v61, %v891_v36  ;;  %v909_v15 = vsel %vm6016_vm4, %v3027_v51, %v908_v28  ;;  %v784_v18 = vmul.f32 %v776_v45, %v6017_v17  ;;  %v6020_v16 = vld [vmem:[#allocation78_spill] sm:$0xff]  ;;  %vm6023_vm8 = vmmov %vm6013_vm5 }
  0xe3   : > { %v897_v42 = vsel %vm5737_vm3, %v6018_v54, %v896_v14  ;;  %v3702_v59 = vadd.f32 %v775_v47, %v3405_v26  ;;  %v785_v12 = vmul.f32 %v777_v8, %v6019_v58  ;;  %v791_v2 = vmul.f32 %v775_v47, %v6020_v16  ;;  %vm6027_vm6 = vmmov %vm6008_vm15  ;;  %v6028_v61 = vld [vmem:[#allocation54_spill] sm:$0xff] }
  0xe4   : > { %v904_v36 = vsel %vm5737_vm3, %v3023_v50, %v903_v43  ;;  %v3709_v28 = vadd.f32 %v776_v45, %v3410_v62  ;;  %v786_v23 = vmul.f32 %v778_v24, %v6021_v40  ;;  %v792_v4 = vmul.f32 %v776_v45, %v6022_v11  ;;  %v6025_v43 = vld [vmem:[#allocation80_spill] sm:$0xff]  ;;  %v6026_v40 = vld [vmem:[#allocation53_spill] sm:$0xff]  ;;  %vm6029_vm7 = vmmov %vm6027_vm6 }
  0xe5   : > { %v910_v14 = vsel %vm6023_vm8, %v3060_v10, %v909_v15  ;;  %v3716_v26 = vadd.f32 %v777_v8, %v3428_v55  ;;  %v3719_v17 = vadd.f32 %v778_v24, %v3519_v33  ;;  %v3722_v58 = vadd.f32 %v783_v49, %v3414_v27  ;;  %v6030_v33 = vld [vmem:[#allocation82_spill] sm:$0xff]  ;;  %vm6039_vm0 = vmmov %vm6015_vm14 }
  0xe6   : > { %v793_v16 = vmul.f32 %v777_v8, %v6025_v43  ;;  %v3726_v62 = vadd.f32 %v784_v18, %v3439_v41  ;;  %v898_v11 = vsel %vm6027_vm6, %v6026_v40, %v897_v42  ;;  %v905_v15 = vsel %vm6029_vm7, %v6028_v61, %v904_v36  ;;  %v6033_v41 = vld [vmem:[#allocation30_spill] sm:$0xff]  ;;  %v6034_v42 = vld [vmem:[#allocation41_spill] sm:$0xff]  ;;  %vm6041_vm15 = vmmov %vm6039_vm0 }
  0xe7   : > { %6024 = vst [vmem:[#allocation33_spill] sm:$0xff] %v3719_v17  ;;  %v936_v55 = vmul.f32 -1.0, %v3675_v9  ;;  %v3733_v50 = vadd.f32 %v785_v12, %v612_v29  ;;  %v794_v10 = vmul.f32 %v778_v24, %v6030_v33  ;;  %v6031_v17 = vld [vmem:[#allocation61_spill] sm:$0xff]  ;;  %v937_v49 = vmul.f32 -1.0, %v3677_v60  ;;  %v6037_v29 = vld [vmem:[#allocation83_spill] sm:$0xff]  ;;  %v6038_v33 = vld [vmem:[#allocation56_spill] sm:$0xff] }
  0xe8   : > { %v911_v27 = vsel %vm5737_vm3, %v6031_v17, %v910_v14  ;;  %v3739_v43 = vadd.f32 %v786_v23, %v613_v13  ;;  %v3742_v18 = vadd.f32 %v791_v2, %v6033_v41  ;;  %v3745_v40 = vadd.f32 %v792_v4, %v6034_v42  ;;  %v6040_v17 = vld [vmem:[#allocation58_spill] sm:$0xff]  ;;  %v6042_v23 = vld [vmem:[#allocation59_spill] sm:$0xff]  ;;  %vm6045_vm1 = vmmov %vm6027_vm6 }
  0xe9   : > { %v938_v36 = vmul.f32 -1.0, %v3683_v20  ;;  %v3748_v61 = vadd.f32 %v793_v16, %v620_v30  ;;  %v3751_v12 = vmul.f32 %v775_v47, %v6037_v29  ;;  %v899_v14 = vsel %vm6039_vm0, %v6038_v33, %v898_v11  ;;  %v6044_v41 = vld [vmem:[#allocation63_spill] sm:$0xff]  ;;  %v6046_v16 = vld [vmem:[#allocation84_spill] sm:$0xff]  ;;  %v6047_v29 = vld [vmem:[#allocation85_spill] sm:$0xff] }
  0xea   : > { %6032 = vst [vmem:[#allocation39_spill] sm:$0xff] %v3739_v43  ;;  %6035 = vst [vmem:[#allocation43_spill] sm:$0xff] %v3745_v40  ;;  %v906_v13 = vsel %vm6041_vm15, %v6040_v17, %v905_v15  ;;  %vm6043_vm2 = vcmask 1047559   ;;  %v912_v4 = vsel %vm6045_vm1, %v6044_v41, %v911_v27  ;;  %v939_v42 = vmul.f32 -1.0, %v3685_v0  ;;  %v6048_v33 = vld [vmem:[#allocation86_spill] sm:$0xff]  ;;  %v6049_v17 = vld [vmem:[#allocation60_spill] sm:$0xff] }
  0xeb   : > { %6036 = vst [vmem:[#allocation34_spill] sm:$0xff] %v3748_v61  ;;  %v893_v2 = vsel %vm6043_vm2, %v6042_v23, %v892_v3  ;;  %v940_v40 = vmul.f32 1.442695, %v936_v55  ;;  %v3762_v30 = vadd.f32 %v794_v10, %v621_v7  ;;  %v3765_v47 = vmul.f32 %v776_v45, %v6046_v16  ;;  %vm6050_vm9 = vmmov %vm6043_vm2  ;;  %v6051_v43 = vld [vmem:[#allocation62_spill] sm:$0xff]  ;;  %v6053_v55 = vld [vmem:[#allocation67_spill] sm:$0xff] }
  0xec   : > { %v3768_v61 = vmul.f32 %v777_v8, %v6047_v29  ;;  %v942_v11 = vmul.f32 1.442695, %v937_v49  ;;  %v3771_v15 = vmul.f32 %v778_v24, %v6048_v33  ;;  %v900_v3 = vsel %vm6050_vm9, %v6049_v17, %v899_v14  ;;  %vm6052_vm5 = vmmov %vm6043_vm2  ;;  %v6055_v7 = vld [vmem:[#allocation22_spill] sm:$0xff] }
  0xed   : > { %v907_v27 = vsel %vm6052_vm5, %v6051_v43, %v906_v13  ;;  %v944_v41 = vmul.f32 1.442695, %v938_v36  ;;  %vm6054_vm14 = vmmov %vm6039_vm0  ;;  %vm915_vm4 = vcmp.ne.s32.totalorder %v893_v2, 0  ;;  %v983_v45 = vrot.slane %v5955_v53, %v6055_v7  ;;  %v6056_v13 = vld [vmem:[#allocation72_spill] sm:$0xff] }
  0xee   : > { %v913_v10 = vsel %vm6054_vm14, %v6053_v55, %v912_v4  ;;  %v987_v8 = vrot.slane %v2827_v19, %v6055_v7  ;;  %2288 = vpow2.f32 %v940_v40  ;;  %v946_v24 = vmul.f32 1.442695, %v939_v42  ;;  %vm6057_vm6 = vmmov %vm6043_vm2 }
  0xef   : > { %v1003_v49 = vrot.slane %v5956_v57, %v6055_v7  ;;  %v1007_v33 = vrot.slane %v5960_v44, %v6055_v7  ;;  %vm916_vm8 = vcmp.ne.s32.totalorder %v900_v3, 0  ;;  %2290 = vpow2.f32 %v942_v11  ;;  %vm3816_vm0 = vmand %vm2865_vm10, %vm915_vm4 }
  0xf0   : > { %v991_v36 = vrot.slane %v2833_v21, %v6055_v7  ;;  %v1011_v14 = vrot.slane %v2859_v31, %v6055_v7  ;;  %v914_v4 = vsel %vm6057_vm6, %v6056_v13, %v913_v10  ;;  %vm917_vm7 = vcmp.ne.s32.totalorder %v907_v27, 0  ;;  %vm3832_vm1 = vmand %vm2870_vm11, %vm916_vm8 }
  0xf1   : > { %2292 = vpow2.f32 %v944_v41  ;;  %v995_v40 = vrot.slane %v2836_v22, %v6055_v7  ;;  %v3796_v42 = vsub.f32 %v5955_v53, %v983_v45  ;;  %v1015_v16 = vrot.slane %v2862_v32, %v6055_v7  ;;  %vm3845_vm5 = vmand %vm2875_vm12, %vm917_vm7 }
  0xf2   : > { %v1023_v29 = vrot.slane %v2882_v37, %v6055_v7  ;;  %v1027_v11 = vrot.slane %v2885_v38, %v6055_v7  ;;  %2294 = vpow2.f32 %v946_v24  ;;  %v3805_v10 = vsub.f32 %v2827_v19, %v987_v8 }
  0xf3   : > { %6058 = vst [vmem:[#allocation40_spill] sm:$0xff] %v3796_v42  ;;  %v3808_v41 = vsub.f32 %v5956_v57, %v1003_v49  ;;  %v3811_v55 = vsub.f32 %v5960_v44, %v1007_v33  ;;  %vm923_vm15 = vcmp.ne.s32.totalorder %v2795_v1, 2  ;;  %v3822_v24 = vsub.f32 %v2833_v21, %v991_v36 }
  0xf4   : > { %6059 = vst [vmem:[#allocation48_spill] sm:$0xff] %v3805_v10  ;;  %v3825_v19 = vsub.f32 %v2859_v31, %v1011_v14  ;;  %v1031_v57 = vrot.slane %v2888_v39, %v6055_v7  ;;  %vm918_vm2 = vcmp.ne.s32.totalorder %v914_v4, 0  ;;  %vm928_vm9 = vcmp.lt.f32.partialorder %v3675_v9, 25.0  ;;  %vm3864_vm14 = vmand %vm3816_vm0, %vm923_vm15  ;;  %v6119_v9 = vld [vmem:[#allocation24_spill] sm:$0xff] }
  0xf5   : > { %6060 = vst [vmem:[#allocation75_spill] sm:$0xff] %v3808_v41  ;;  %6061 = vst [vmem:[#allocation76_spill] sm:$0xff] %v3811_v55  ;;  %v3838_v2 = vsub.f32 %v2836_v22, %v995_v40  ;;  %v1035_v21 = vrot.slane %v2925_v52, %v6055_v7  ;;  %v3850_v3 = vsub.f32 %v2862_v32, %v1015_v16  ;;  %vm6077_vm4 = vcmask 1041409  }
  0xf6   : > { %6065 = vst [vmem:[#allocation77_spill] sm:$0xff] %v3822_v24  ;;  %6066 = vst [vmem:[#allocation78_spill] sm:$0xff] %v3825_v19  ;;  %v3853_v8 = vsub.f32 %v2882_v37, %v1023_v29  ;;  %v3856_v49 = vsub.f32 %v2885_v38, %v1027_v11  ;;  %v1040_v22 = vmul.f32 %v3796_v42, %v3796_v42  ;;  %v6082_v29 = vld [vmem:[#allocation65_spill] sm:$0xff]  ;;  %vm929_vm0 = vcmp.lt.f32.partialorder %v3677_v60, 25.0  ;;  %v6096_v42 = vld [vmem:[#allocation35_spill] sm:$0xff] }
  0xf7   : > { %6069 = vst [vmem:[#allocation81_spill] sm:$0xff] %v3838_v2  ;;  %6072 = vst [vmem:[#allocation79_spill] sm:$0xff] %v3850_v3  ;;  %v1041_v32 = vmul.f32 %v3805_v10, %v3805_v10  ;;  %v1044_v37 = vmul.f32 %v3808_v41, %v3808_v41  ;;  %v1045_v38 = vmul.f32 %v3811_v55, %v3811_v55  ;;  %v6089_v55 = vld [vmem:[#allocation68_spill] sm:$0xff] }
  0xf8   : > { %6073 = vst [vmem:[#allocation80_spill] sm:$0xff] %v3853_v8  ;;  %6074 = vst [vmem:[#allocation82_spill] sm:$0xff] %v3856_v49  ;;  %v1060_v7 = vsel %vm6077_vm4, %v5939_v25, %v6042_v23  ;;  %v3885_v14 = vsub.f32 %v2888_v39, %v1031_v57  ;;  %v1042_v40 = vmul.f32 %v3822_v24, %v3822_v24  ;;  %v6094_v24 = vld [vmem:[#allocation70_spill] sm:$0xff] }
  0xf9   : > { %vm3880_vm8 = vmand %vm2901_vm13, %vm918_vm2  ;;  %v1046_v16 = vmul.f32 %v3825_v19, %v3825_v19  ;;  %vm930_vm2 = vcmp.lt.f32.partialorder %v3683_v20, 25.0  ;;  %v3905_v39 = vsub.f32 %v2925_v52, %v1035_v21  ;;  %v1043_v45 = vmul.f32 %v3838_v2, %v3838_v2  ;;  %v6091_v21 = vld [vmem:[#allocation66_spill] sm:$0xff] }
  0xfa   : > { %6081 = vst [vmem:[#allocation30_spill] sm:$0xff] %v3885_v14  ;;  %vm6083_vm6 = vmmov %vm6077_vm4  ;;  %v1047_v44 = vmul.f32 %v3850_v3, %v3850_v3  ;;  %v1052_v19 = vmul.f32 %v3853_v8, %v3853_v8  ;;  %v1048_v41 = vadd.f32 %v1044_v37, %v1040_v22  ;;  %v1049_v3 = vadd.f32 %v1045_v38, %v1041_v32 }
  0xfb   : > { %v1067_v11 = vsel %vm6083_vm6, %v6082_v29, %v6049_v17  ;;  %vm3898_vm7 = vmand %vm3832_vm1, %vm923_vm15  ;;  %6086 = vst [vmem:[#allocation41_spill] sm:$0xff] %v3905_v39  ;;  %vm6090_vm1 = vcmask 1042434   ;;  %v1074_v2 = vsel %vm6083_vm6, %v6091_v21, %v6051_v43  ;;  %v1053_v8 = vmul.f32 %v3856_v49, %v3856_v49  ;;  %v2289_v10 = vpop.eup %2288 }
  0xfc   : > { %vm3913_vm4 = vmand %vm3845_vm5, %vm923_vm15  ;;  %v1061_v52 = vsel %vm6090_vm1, %v6089_v55, %v1060_v7  ;;  %v3940_v21 = vadd.f32 %v3751_v12, %v6096_v42  ;;  %v1050_v22 = vadd.f32 %v1046_v16, %v1042_v40  ;;  %v1054_v32 = vmul.f32 %v3885_v14, %v3885_v14  ;;  %v2291_v38 = vpop.eup %2290  ;;  %v6103_v42 = vld [vmem:[#allocation31_spill] sm:$0xff] }
  0xfd   : > { %vm3930_vm5 = vmand %vm3880_vm8, %vm923_vm15  ;;  %vm931_vm8 = vcmp.lt.f32.partialorder %v3685_v0, 25.0  ;;  %v6105_v40 = vld [vmem:[#allocation71_spill] sm:$0xff]  ;;  %v1051_v60 = vadd.f32 %v1047_v44, %v1043_v45  ;;  %v1055_v4 = vmul.f32 %v3905_v39, %v3905_v39 }
  0xfe   : > { %vm6095_vm3 = vmmov %vm6090_vm1  ;;  %v1075_v16 = vsel %vm6090_vm1, %v6105_v40, %v1074_v2  ;;  %v2293_v14 = vpop.eup %2292  ;;  %v3986_v2 = vadd.f32 %v3771_v15, %v3669_v56  ;;  %v4000_v44 = vadd.f32 %v1054_v32, %v1050_v22  ;;  %v6109_v56 = vld [vmem:[#allocation38_spill] sm:$0xff] }
  0xff   : > { %v1068_v7 = vsel %vm6095_vm3, %v6094_v24, %v1067_v11  ;;  %vm3946_vm15 = vmand %vm3864_vm14, %vm928_vm9  ;;  %v6100_v11 = vld [vmem:[#allocation32_spill] sm:$0xff]  ;;  %vm6104_vm14 = vcmask 1043459   ;;  %v2295_v57 = vpop.eup %2294  ;;  %v4013_v32 = vadd.f32 %v1055_v4, %v1051_v60 }
 0x100   : > { %vm6099_vm3 = vmmov %vm6083_vm6  ;;  %v3957_v12 = vadd.f32 %v3765_v47, %v6100_v11  ;;  %v1062_v27 = vsel %vm6104_vm14, %v6103_v42, %v1061_v52  ;;  %v3974_v47 = vadd.f32 %v3768_v61, %v3638_v63  ;;  %v3988_v11 = vadd.f32 %v1052_v19, %v1048_v41  ;;  %v6107_v63 = vld [vmem:[#allocation74_spill] sm:$0xff]  ;;  %v6111_v41 = vld [vmem:[#allocation44_spill] sm:$0xff] }
 0x101   : > { %v1081_v37 = vsel %vm6099_vm3, %v3176_v5, %v6056_v13  ;;  %vm3964_vm9 = vmand %vm3898_vm7, %vm929_vm0  ;;  %v3990_v61 = vadd.f32 %v1053_v8, %v1049_v3  ;;  %v948_v45 = vsel %vm3946_vm15, %v2289_v10, 0.0  ;;  %v6116_v10 = vld [vmem:[#allocation21_spill] sm:$0xff] }
 0x102   : > { %vm934_vm6 = vmand %vm3913_vm4, %vm930_vm2  ;;  %vm6110_vm4 = vcmask 1044484   ;;  %v949_v3 = vsel %vm3964_vm9, %v2291_v38, 0.0  ;;  %v4028_v4 = vadd.f32 %v948_v45, %v3702_v59  ;;  %v6134_v59 = vld [vmem:[#allocation57_spill] sm:$0xff] }
 0x103   : > { %vm6106_vm7 = vmmov %vm6104_vm14  ;;  %v1063_v15 = vsel %vm6110_vm4, %v6109_v56, %v1062_v27  ;;  %v950_v8 = vsel %vm934_vm6, %v2293_v14, 0.0  ;;  %v965_v38 = vmul.f32 %v949_v3, %v6119_v9  ;;  %vm6139_vm6 = vcmask 1046534   ;;  %v4166_v5 = vld [vmem:[%s2792_s6 + $0x48] sm:$0xff] }
 0x104   : > { %v1069_v52 = vsel %vm6106_vm7, %v5995_v46, %v1068_v7  ;;  %vm6108_vm0 = vmmov %vm6090_vm1  ;;  %v6113_v7 = vld [vmem:[#allocation36_spill] sm:$0xff]  ;;  %v958_v22 = vmul.f32 %v950_v8, %v6116_v10  ;;  %6126 = vst [vmem:[#allocation83_spill] sm:$0xff] %v4028_v4 }
 0x105   : > { %v1082_v20 = vsel %vm6108_vm0, %v6107_v63, %v1081_v37  ;;  %vm935_vm2 = vmand %vm3930_vm5, %vm931_vm8  ;;  %v956_v0 = vmul.f32 %v948_v45, %v6113_v7  ;;  %v6115_v37 = vld [vmem:[#allocation42_spill] sm:$0xff]  ;;  %v6121_v7 = vld [vmem:[#allocation25_spill] sm:$0xff]  ;;  %vm6124_vm8 = vcmask 1045509  }
 0x106   : > { %vm6112_vm3 = vmmov %vm6106_vm7  ;;  %v957_v36 = vmul.f32 %v949_v3, %v6115_v37  ;;  %v951_v39 = vsel %vm935_vm2, %v2295_v57, 0.0  ;;  %v6123_v37 = vld [vmem:[#allocation45_spill] sm:$0xff]  ;;  %v4034_v57 = vadd.f32 %v950_v8, %v3716_v26 }
 0x107   : > { %v1076_v19 = vsel %vm6112_vm3, %v6111_v41, %v1075_v16  ;;  %vm6114_vm14 = vmmov %vm6110_vm4  ;;  %v6118_v16 = vld [vmem:[#allocation23_spill] sm:$0xff]  ;;  %v959_v63 = vmul.f32 %v951_v39, %v6121_v7  ;;  %v1064_v10 = vsel %vm6124_vm8, %v6123_v37, %v1063_v15 }
 0x108   : > { %v1070_v31 = vsel %vm6114_vm14, %v6011_v6, %v1069_v52  ;;  %vm6117_vm5 = vmmov %vm6112_vm3  ;;  %v964_v49 = vmul.f32 %v948_v45, %v6118_v16  ;;  %v6122_v52 = vld [vmem:[#allocation90_spill] sm:$0xff]  ;;  %6128 = vst [vmem:[#allocation85_spill] sm:$0xff] %v4034_v57  ;;  %v6130_v16 = vld [vmem:[#allocation33_spill] sm:$0xff]  ;;  %v4043_v15 = vadd.f32 %v957_v36, %v3726_v62 }
 0x109   : > { %v1083_v27 = vsel %vm6117_vm5, %v3027_v51, %v1082_v20  ;;  %vm6120_vm15 = vmmov %vm6110_vm4  ;;  %v966_v6 = vmul.f32 %v950_v8, %v6122_v52  ;;  %v4031_v20 = vadd.f32 %v949_v3, %v3709_v28  ;;  %v4040_v9 = vadd.f32 %v951_v39, %v6130_v16  ;;  %v6136_v28 = vld [vmem:[#allocation91_spill] sm:$0xff] }
 0x10a   : > { %v1077_v14 = vsel %vm6120_vm15, %v3020_v48, %v1076_v19  ;;  %vm6125_vm9 = vmmov %vm6124_vm8  ;;  %v4037_v19 = vadd.f32 %v956_v0, %v3722_v58  ;;  %6132 = vst [vmem:[#allocation35_spill] sm:$0xff] %v4043_v15  ;;  %v967_v52 = vmul.f32 %v951_v39, %v6136_v28  ;;  %v4052_v26 = vadd.f32 %v964_v49, %v3742_v18  ;;  %v6140_v0 = vld [vmem:[#allocation53_spill] sm:$0xff]  ;;  %v6144_v36 = vld [vmem:[#allocation43_spill] sm:$0xff] }
 0x10b   : > { %v1071_v60 = vsel %vm6125_vm9, %v6018_v54, %v1070_v31  ;;  %6127 = vst [vmem:[#allocation84_spill] sm:$0xff] %v4031_v20  ;;  %6131 = vst [vmem:[#allocation22_spill] sm:$0xff] %v4040_v9  ;;  %v4046_v31 = vadd.f32 %v958_v22, %v3733_v50  ;;  %v6138_v54 = vld [vmem:[#allocation49_spill] sm:$0xff]  ;;  %v6142_v9 = vld [vmem:[#allocation39_spill] sm:$0xff]  ;;  %v4062_v50 = vadd.f32 %v965_v38, %v6144_v36  ;;  %vm1096_vm9 = vcmp.ne.s32.totalorder %v2795_v1, 3 }
 0x10c   : > { %6129 = vst [vmem:[#allocation86_spill] sm:$0xff] %v4037_v19  ;;  %vm6135_vm1 = vmmov %vm6110_vm4  ;;  %v1065_v58 = vsel %vm6139_vm6, %v6138_v54, %v1064_v10  ;;  %v4059_v62 = vadd.f32 %v959_v63, %v6142_v9  ;;  %v6146_v22 = vld [vmem:[#allocation34_spill] sm:$0xff]  ;;  %v6148_v28 = vld [vmem:[#allocation92_spill] sm:$0xff]  ;;  %v1110_v63 = vmul.f32 -1.0, %v3990_v61  ;;  %vm6154_vm4 = vcmask 1047559  }
 0x10d   : > { %6133 = vst [vmem:[#allocation32_spill] sm:$0xff] %v4046_v31  ;;  %v1084_v7 = vsel %vm6135_vm1, %v6134_v59, %v1083_v27  ;;  %6137 = vst [vmem:[#allocation36_spill] sm:$0xff] %v4052_v26  ;;  %v4065_v31 = vadd.f32 %v966_v6, %v6146_v22  ;;  %v1109_v27 = vmul.f32 -1.0, %v3988_v11  ;;  %v4069_v18 = vmul.f32 %v948_v45, %v6148_v28  ;;  %v6149_v49 = vld [vmem:[#allocation51_spill] sm:$0xff]  ;;  %v6151_v26 = vld [vmem:[#allocation61_spill] sm:$0xff] }
 0x10e   : > { %vm6141_vm7 = vmmov %vm6139_vm6  ;;  %6143 = vst [vmem:[#allocation42_spill] sm:$0xff] %v4059_v62  ;;  %v6153_v9 = vld [vmem:[#allocation55_spill] sm:$0xff]  ;;  %v6155_v36 = vld [vmem:[#allocation56_spill] sm:$0xff]  ;;  %v1111_v22 = vmul.f32 -1.0, %v4000_v44  ;;  %v4082_v45 = vsub.s32 4, %v2795_v1  ;;  %vm6165_vm1 = vcmask 1041409  }
 0x10f   : > { %v1072_v16 = vsel %vm6141_vm7, %v6140_v0, %v1071_v60  ;;  %6145 = vst [vmem:[#allocation21_spill] sm:$0xff] %v4062_v50  ;;  %6147 = vst [vmem:[#allocation23_spill] sm:$0xff] %v4065_v31  ;;  %v1066_v38 = vsel %vm6154_vm4, %v6153_v9, %v1065_v58  ;;  %v6158_v28 = vld [vmem:[#allocation93_spill] sm:$0xff]  ;;  %v6159_v31 = vld [vmem:[#allocation94_spill] sm:$0xff]  ;;  %v1112_v58 = vmul.f32 -1.0, %v4013_v32 }
 0x110   : > { %vm6150_vm0 = vmmov %vm6124_vm8  ;;  %v4091_v62 = vmul.f32 %v950_v8, %v6159_v31  ;;  %v6161_v0 = vld [vmem:[#allocation54_spill] sm:$0xff]  ;;  %v6163_v59 = vld [vmem:[#allocation63_spill] sm:$0xff]  ;;  %vm1088_vm15 = vcmp.ne.s32.totalorder %v1066_v38, 0  ;;  %v1117_v8 = vmul.f32 1.442695, %v1111_v22 }
 0x111   : > { %v1078_v10 = vsel %vm6150_vm0, %v6149_v49, %v1077_v14  ;;  %vm6152_vm2 = vmmov %vm6150_vm0  ;;  %v4085_v14 = vadd.f32 %v967_v52, %v3762_v30  ;;  %v1113_v30 = vmul.f32 1.442695, %v1109_v27  ;;  %v4103_v31 = vld [vmem:[%s2792_s6] sm:$0xff]  ;;  %v4108_v52 = vld [vmem:[%s2792_s6 + $0x8] sm:$0xff]  ;;  %v1233_v27 = vsel %vm6165_vm1, %v6042_v23, %v6153_v9 }
 0x112   : > { %v1085_v60 = vsel %vm6152_vm2, %v6151_v26, %v1084_v7  ;;  %vm6156_vm3 = vmmov %vm6154_vm4  ;;  %v4088_v7 = vmul.f32 %v949_v3, %v6158_v28  ;;  %v6160_v26 = vld [vmem:[#allocation95_spill] sm:$0xff]  ;;  %v1115_v3 = vmul.f32 1.442695, %v1110_v63  ;;  %v1119_v28 = vmul.f32 1.442695, %v1112_v58  ;;  %v4130_v9 = vld [vmem:[%s2792_s6 + $0x28] sm:$0xff] }
 0x113   : > { %v1073_v6 = vsel %vm6156_vm3, %v6155_v36, %v1072_v16  ;;  %6157 = vst [vmem:[#allocation24_spill] sm:$0xff] %v4085_v14  ;;  %v4095_v16 = vmul.f32 %v951_v39, %v6160_v26  ;;  %vm6162_vm14 = vmmov %vm6139_vm6  ;;  %v1156_v39 = vrot.slane %v4103_v31, %v4082_v45  ;;  %v1160_v26 = vrot.slane %v4108_v52, %v4082_v45  ;;  %v6168_v63 = vld [vmem:[#allocation67_spill] sm:$0xff]  ;;  %v4120_v14 = vld [vmem:[%s2792_s6 + $0x20] sm:$0xff] }
 0x114   : > { %v1079_v50 = vsel %vm6162_vm14, %v6161_v0, %v1078_v10  ;;  %vm6164_vm5 = vmmov %vm6139_vm6  ;;  %vm1089_vm8 = vcmp.ne.s32.totalorder %v1073_v6, 0  ;;  %v6166_v10 = vld [vmem:[#allocation58_spill] sm:$0xff]  ;;  %6170 = vst [vmem:[#allocation25_spill] sm:$0xff] %v4120_v14  ;;  %2296 = vpow2.f32 %v1113_v30  ;;  %v4140_v30 = vld [vmem:[%s2792_s6 + $0x18] sm:$0xff]  ;;  %vm6172_vm0 = vcmask 1042434  }
 0x115   : > { %v1086_v49 = vsel %vm6164_vm5, %v6163_v59, %v1085_v60  ;;  %vm6167_vm6 = vmmov %vm6156_vm3  ;;  %v1176_v59 = vrot.slane %v4120_v14, %v4082_v45  ;;  %v4125_v0 = vld [vmem:[%s2792_s6 + $0x10] sm:$0xff]  ;;  %2298 = vpow2.f32 %v1115_v3  ;;  %v1168_v15 = vrot.slane %v4140_v30, %v4082_v45  ;;  %v4145_v19 = vld [vmem:[%s2792_s6 + $0x38] sm:$0xff] }
 0x116   : > { %v1080_v60 = vsel %vm6167_vm6, %v6166_v10, %v1079_v50  ;;  %vm6169_vm7 = vmmov %vm6156_vm3  ;;  %6171 = vst [vmem:[#allocation90_spill] sm:$0xff] %v4125_v0  ;;  %v1164_v23 = vrot.slane %v4125_v0, %v4082_v45  ;;  %v1180_v50 = vrot.slane %v4130_v9, %v4082_v45  ;;  %v1188_v57 = vrot.slane %v4145_v19, %v4082_v45  ;;  %v4158_v3 = vld [vmem:[%s2792_s6 + $0x40] sm:$0xff]  ;;  %v4194_v38 = vld [vmem:[%s2792_s6 + $0x58] sm:$0xff] }
 0x117   : > { %v1087_v22 = vsel %vm6169_vm7, %v6168_v63, %v1086_v49  ;;  %v4135_v49 = vld [vmem:[%s2792_s6 + $0x30] sm:$0xff]  ;;  %v1234_v20 = vsel %vm6172_vm0, %v5939_v25, %v1233_v27  ;;  %2300 = vpow2.f32 %v1117_v8  ;;  %v4152_v51 = vsub.f32 %v4103_v31, %v1156_v39  ;;  %vm1092_vm4 = vmand %vm2865_vm10, %vm1088_vm15 }
 0x118   : > { %v1184_v58 = vrot.slane %v4135_v49, %v4082_v45  ;;  %v4155_v48 = vsub.f32 %v4108_v52, %v1160_v26  ;;  %v1196_v4 = vrot.slane %v4158_v3, %v4082_v45  ;;  %2302 = vpow2.f32 %v1119_v28  ;;  %v4171_v39 = vld [vmem:[%s2792_s6 + $0x50] sm:$0xff]  ;;  %vm4201_vm14 = vmand %vm2870_vm11, %vm1089_vm8 }
 0x119   : > { %6173 = vst [vmem:[#allocation33_spill] sm:$0xff] %v4152_v51  ;;  %v4163_v54 = vsub.f32 %v4120_v14, %v1176_v59  ;;  %v1200_v8 = vrot.slane %v4166_v5, %v4082_v45  ;;  %v1204_v26 = vrot.slane %v4171_v39, %v4082_v45  ;;  %vm1090_vm2 = vcmp.ne.s32.totalorder %v1080_v60, 0  ;;  %vm6185_vm15 = vmmov %vm6165_vm1 }
 0x11a   : > { %6174 = vst [vmem:[#allocation91_spill] sm:$0xff] %v4155_v48  ;;  %v4179_v27 = vsub.f32 %v4125_v0, %v1164_v23  ;;  %v4182_v59 = vsub.f32 %v4130_v9, %v1180_v50  ;;  %v4185_v28 = vsub.f32 %v4135_v49, %v1184_v58  ;;  %vm1091_vm3 = vcmp.ne.s32.totalorder %v1087_v22, 0  ;;  %vm4217_vm1 = vmand %vm1092_vm4, %vm1096_vm9  ;;  %v6218_v22 = vld [vmem:[#allocation73_spill] sm:$0xff] }
 0x11b   : > { %6175 = vst [vmem:[#allocation39_spill] sm:$0xff] %v4163_v54  ;;  %v4188_v25 = vsub.f32 %v4140_v30, %v1168_v15  ;;  %v4191_v14 = vsub.f32 %v4145_v19, %v1188_v57  ;;  %v1208_v53 = vrot.slane %v4194_v38, %v4082_v45  ;;  %v4206_v50 = vsub.f32 %v4158_v3, %v1196_v4  ;;  %vm4234_vm8 = vmand %vm2875_vm12, %vm1090_vm2 }
 0x11c   : > { %6176 = vst [vmem:[#allocation43_spill] sm:$0xff] %v4179_v27  ;;  %6177 = vst [vmem:[#allocation34_spill] sm:$0xff] %v4182_v59  ;;  %v1213_v15 = vmul.f32 %v4152_v51, %v4152_v51  ;;  %vm6184_vm5 = vcmask 1043459   ;;  %v1240_v45 = vsel %vm6185_vm15, %v6049_v17, %v6155_v36  ;;  %v4222_v58 = vsub.f32 %v4166_v5, %v1200_v8 }
 0x11d   : > { %6178 = vst [vmem:[#allocation92_spill] sm:$0xff] %v4185_v28  ;;  %6179 = vst [vmem:[#allocation93_spill] sm:$0xff] %v4188_v25  ;;  %v1235_v57 = vsel %vm6184_vm5, %v6089_v55, %v1234_v20  ;;  %v4225_v4 = vsub.f32 %v4171_v39, %v1204_v26  ;;  %v1214_v51 = vmul.f32 %v4155_v48, %v4155_v48  ;;  %vm6196_vm0 = vcmask 1044484  }
 0x11e   : > { %6180 = vst [vmem:[#allocation94_spill] sm:$0xff] %v4191_v14  ;;  %6183 = vst [vmem:[#allocation95_spill] sm:$0xff] %v4206_v50  ;;  %v1217_v20 = vmul.f32 %v4163_v54, %v4163_v54  ;;  %v1215_v8 = vmul.f32 %v4179_v27, %v4179_v27  ;;  %v1218_v26 = vmul.f32 %v4182_v59, %v4182_v59  ;;  %vm1101_vm4 = vcmp.lt.f32.partialorder %v3988_v11, 25.0 }
 0x11f   : > { %6188 = vst [vmem:[#allocation58_spill] sm:$0xff] %v4222_v58  ;;  %6189 = vst [vmem:[#allocation67_spill] sm:$0xff] %v4225_v4  ;;  %v1219_v55 = vmul.f32 %v4185_v28, %v4185_v28  ;;  %v4255_v48 = vsub.f32 %v4194_v38, %v1208_v53  ;;  %v1216_v59 = vmul.f32 %v4188_v25, %v4188_v25  ;;  %vm1103_vm5 = vcmp.lt.f32.partialorder %v4000_v44, 25.0 }
 0x120   : > { %vm6192_vm6 = vmmov %vm6185_vm15  ;;  %v1220_v28 = vmul.f32 %v4191_v14, %v4191_v14  ;;  %v1236_v27 = vsel %vm6196_vm0, %v6103_v42, %v1235_v57  ;;  %vm6199_vm15 = vcmask 1042434   ;;  %v1221_v23 = vadd.f32 %v1217_v20, %v1213_v15 }
 0x121   : > { %v1247_v54 = vsel %vm6192_vm6, %v6051_v43, %v6166_v10  ;;  %vm4250_vm7 = vmand %vm2901_vm13, %vm1091_vm3  ;;  %6195 = vst [vmem:[#allocation96_spill] sm:$0xff] %v4255_v48  ;;  %vm1102_vm3 = vcmp.lt.f32.partialorder %v3990_v61, 25.0  ;;  %v1241_v53 = vsel %vm6199_vm15, %v6082_v29, %v1240_v45  ;;  %v1225_v14 = vmul.f32 %v4206_v50, %v4206_v50  ;;  %v6202_v43 = vld [vmem:[#allocation66_spill] sm:$0xff]  ;;  %v6241_v50 = vld [vmem:[#allocation76_spill] sm:$0xff] }
 0x122   : > { %vm4267_vm2 = vmand %vm4201_vm14, %vm1096_vm9  ;;  %v1226_v25 = vmul.f32 %v4222_v58, %v4222_v58  ;;  %v1222_v45 = vadd.f32 %v1218_v26, %v1214_v51  ;;  %v1223_v29 = vadd.f32 %v1219_v55, %v1215_v8  ;;  %v1227_v15 = vmul.f32 %v4225_v4, %v4225_v4  ;;  %v2297_v58 = vpop.eup %2296  ;;  %v6239_v4 = vld [vmem:[#allocation86_spill] sm:$0xff] }
 0x123   : > { %vm4280_vm6 = vmand %vm4234_vm8, %vm1096_vm9  ;;  %vm6206_vm8 = vcmask 1045509   ;;  %v1224_v60 = vadd.f32 %v1220_v28, %v1216_v59  ;;  %v1228_v51 = vmul.f32 %v4255_v48, %v4255_v48  ;;  %v2299_v8 = vpop.eup %2298  ;;  %v4321_v11 = vadd.f32 %v4088_v7, %v3957_v12 }
 0x124   : > { %vm6203_vm14 = vmmov %vm6199_vm15  ;;  %v1237_v20 = vsel %vm6206_vm8, %v6109_v56, %v1236_v27  ;;  %vm1104_vm15 = vcmp.lt.f32.partialorder %v4013_v32, 25.0  ;;  %v4317_v27 = vadd.f32 %v4069_v18, %v3940_v21  ;;  %v2301_v18 = vpop.eup %2300  ;;  %v4338_v12 = vadd.f32 %v4091_v62, %v3974_v47 }
 0x125   : > { %v1248_v42 = vsel %vm6203_vm14, %v6202_v43, %v1247_v54  ;;  %vm4294_vm0 = vmand %vm4250_vm7, %vm1096_vm9  ;;  %vm6209_vm9 = vcmask 1043459   ;;  %v4342_v61 = vadd.f32 %v4095_v16, %v3986_v2  ;;  %v4348_v7 = vadd.f32 %v1225_v14, %v1221_v23  ;;  %v2303_v6 = vpop.eup %2302  ;;  %v6216_v14 = vld [vmem:[#allocation40_spill] sm:$0xff]  ;;  %v6222_v23 = vld [vmem:[#allocation74_spill] sm:$0xff] }
 0x126   : > { %vm4307_vm14 = vmand %vm4217_vm1, %vm1101_vm4  ;;  %v1242_v55 = vsel %vm6209_vm9, %v6094_v24, %v1241_v53  ;;  %vm6213_vm4 = vcmask 1041409   ;;  %v4358_v2 = vadd.f32 %v1226_v25, %v1222_v45  ;;  %v4360_v44 = vadd.f32 %v1227_v15, %v1223_v29  ;;  %v6220_v29 = vld [vmem:[#allocation49_spill] sm:$0xff]  ;;  %v6224_v15 = vld [vmem:[#allocation83_spill] sm:$0xff] }
 0x127   : > { %vm4327_vm1 = vmand %vm4267_vm2, %vm1102_vm3  ;;  %v1254_v21 = vsel %vm6213_vm4, %v6056_v13, %v6168_v63  ;;  %vm6214_vm3 = vcmask 1046534   ;;  %v1121_v47 = vsel %vm4307_vm14, %v2297_v58, 0.0  ;;  %v4365_v26 = vadd.f32 %v1228_v51, %v1224_v60  ;;  %v6226_v54 = vld [vmem:[#allocation48_spill] sm:$0xff]  ;;  %v6227_v51 = vld [vmem:[#allocation46_spill] sm:$0xff] }
 0x128   : > { %vm6212_vm7 = vmmov %vm6209_vm9  ;;  %v1129_v16 = vmul.f32 %v1121_v47, %v6216_v14  ;;  %vm6219_vm9 = vcmask 1042434   ;;  %v1122_v58 = vsel %vm4327_vm1, %v2299_v8, 0.0  ;;  %vm6228_vm14 = vcmask 1045509   ;;  %v6229_v8 = vld [vmem:[#allocation77_spill] sm:$0xff]  ;;  %v6233_v14 = vld [vmem:[#allocation52_spill] sm:$0xff] }
 0x129   : > { %v1249_v28 = vsel %vm6212_vm7, %v6105_v40, %v1248_v42  ;;  %vm1107_vm2 = vmand %vm4280_vm6, %vm1103_vm5  ;;  %v1238_v42 = vsel %vm6214_vm3, %v6123_v37, %v1237_v20  ;;  %vm6215_vm5 = vcmask 1044484   ;;  %v1255_v53 = vsel %vm6219_vm9, %v6218_v22, %v1254_v21 }
 0x12a   : > { %vm1108_vm8 = vmand %vm4294_vm0, %vm1104_vm15  ;;  %v1243_v62 = vsel %vm6215_vm5, %v5995_v46, %v1242_v55  ;;  %v4373_v25 = vsel %vm1107_vm2, %v2301_v18, 0.0  ;;  %vm6221_vm0 = vcmask 1047559   ;;  %v4384_v20 = vadd.f32 %v1121_v47, %v6224_v15  ;;  %v6231_v18 = vld [vmem:[#allocation50_spill] sm:$0xff]  ;;  %v6237_v15 = vld [vmem:[#allocation85_spill] sm:$0xff] }
 0x12b   : > { %vm6217_vm6 = vmmov %vm6215_vm5  ;;  %v4377_v57 = vsel %vm6221_vm0, %v6220_v29, %v1238_v42  ;;  %v4381_v45 = vsel %vm1108_vm8, %v2303_v6, 0.0  ;;  %v1130_v60 = vmul.f32 %v1122_v58, %v6226_v54  ;;  %v1244_v55 = vsel %vm6228_vm14, %v6227_v51, %v1243_v62  ;;  %v6247_v51 = vld [vmem:[#allocation35_spill] sm:$0xff] }
 0x12c   : > { %v1250_v32 = vsel %vm6217_vm6, %v6111_v41, %v1249_v28  ;;  %vm6223_vm15 = vmmov %vm6212_vm7  ;;  %6225 = vst [vmem:[#allocation40_spill] sm:$0xff] %v4384_v20  ;;  %v1131_v59 = vmul.f32 %v4373_v25, %v6229_v8  ;;  %v6230_v28 = vld [vmem:[#allocation75_spill] sm:$0xff]  ;;  %v4401_v54 = vadd.f32 %v4373_v25, %v6237_v15  ;;  %v4404_v62 = vadd.f32 %v1129_v16, %v6239_v4  ;;  %v6242_v41 = vld [vmem:[#allocation22_spill] sm:$0xff] }
 0x12d   : > { %v1256_v17 = vsel %vm6223_vm15, %v6222_v23, %v1255_v53  ;;  %v1137_v21 = vmul.f32 %v1121_v47, %v6230_v28  ;;  %vm6232_vm1 = vmmov %vm6228_vm14  ;;  %v6235_v53 = vld [vmem:[#allocation84_spill] sm:$0xff]  ;;  %v1138_v8 = vmul.f32 %v1122_v58, %v6241_v50  ;;  %v4409_v28 = vadd.f32 %v4381_v45, %v6242_v41  ;;  %v6249_v23 = vld [vmem:[#allocation51_spill] sm:$0xff] }
 0x12e   : > { %v1251_v42 = vsel %vm6232_vm1, %v6231_v18, %v1250_v32  ;;  %vm6234_vm7 = vmmov %vm6215_vm5  ;;  %v4397_v48 = vadd.f32 %v1122_v58, %v6235_v53  ;;  %6238 = vst [vmem:[#allocation48_spill] sm:$0xff] %v4401_v54  ;;  %v6244_v32 = vld [vmem:[#allocation81_spill] sm:$0xff]  ;;  %v4417_v15 = vadd.f32 %v1130_v60, %v6247_v51  ;;  %v1283_v41 = vmul.f32 -1.0, %v4358_v2  ;;  %v6256_v51 = vld [vmem:[#allocation79_spill] sm:$0xff] }
 0x12f   : > { %v1257_v6 = vsel %vm6234_vm7, %v6233_v14, %v1256_v17  ;;  %6240 = vst [vmem:[#allocation77_spill] sm:$0xff] %v4404_v62  ;;  %6243 = vst [vmem:[#allocation75_spill] sm:$0xff] %v4409_v28  ;;  %v1132_v18 = vmul.f32 %v4381_v45, %v6244_v32  ;;  %v6245_v17 = vld [vmem:[#allocation47_spill] sm:$0xff]  ;;  %v1282_v14 = vmul.f32 -1.0, %v4348_v7  ;;  %v6251_v16 = vld [vmem:[#allocation57_spill] sm:$0xff]  ;;  %v1328_v60 = vsub.s32 5, %v2795_v1 }
 0x130   : > { %6236 = vst [vmem:[#allocation83_spill] sm:$0xff] %v4397_v48  ;;  %vm6246_vm4 = vmmov %vm6214_vm3  ;;  %v6253_v62 = vld [vmem:[#allocation32_spill] sm:$0xff]  ;;  %v6255_v32 = vld [vmem:[#allocation78_spill] sm:$0xff]  ;;  %v1285_v46 = vmul.f32 -1.0, %v4365_v26  ;;  %vm1261_vm9 = vcmp.ne.s32.totalorder %v4377_v57, 0  ;;  %vm6284_vm7 = vcmask 1042434  }
 0x131   : > { %v1245_v53 = vsel %vm6246_vm4, %v6245_v17, %v1244_v55  ;;  %6248 = vst [vmem:[#allocation84_spill] sm:$0xff] %v4417_v15  ;;  %vm6250_vm2 = vmmov %vm6214_vm3  ;;  %v4425_v28 = vadd.f32 %v1131_v59, %v6253_v62  ;;  %v4429_v40 = vmul.f32 %v4373_v25, %v6255_v32  ;;  %v1284_v55 = vmul.f32 -1.0, %v4360_v44  ;;  %v6261_v59 = vld [vmem:[#allocation53_spill] sm:$0xff] }
 0x132   : > { %v1252_v4 = vsel %vm6250_vm2, %v6249_v23, %v1251_v42  ;;  %vm6252_vm3 = vmmov %vm6232_vm1  ;;  %v4435_v17 = vmul.f32 %v4381_v45, %v6256_v51  ;;  %v6257_v42 = vld [vmem:[#allocation36_spill] sm:$0xff]  ;;  %v6265_v15 = vld [vmem:[#allocation61_spill] sm:$0xff]  ;;  %v1286_v48 = vmul.f32 1.442695, %v1282_v14  ;;  %vm6276_vm1 = vcmask 1041409  }
 0x133   : > { %v1258_v50 = vsel %vm6252_vm3, %v6251_v16, %v1257_v6  ;;  %6254 = vst [vmem:[#allocation85_spill] sm:$0xff] %v4425_v28  ;;  %v4438_v23 = vadd.f32 %v1137_v21, %v6257_v42  ;;  %v6259_v6 = vld [vmem:[#allocation21_spill] sm:$0xff]  ;;  %vm6262_vm8 = vmmov %vm6221_vm0  ;;  %v6263_v28 = vld [vmem:[#allocation54_spill] sm:$0xff]  ;;  %v1373_v37 = vrot.slane %v4166_v5, %v1328_v60  ;;  %v1377_v22 = vrot.slane %v4171_v39, %v1328_v60 }
 0x134   : > { %v4441_v16 = vadd.f32 %v1138_v8, %v6259_v6  ;;  %v1246_v62 = vsel %vm6262_vm8, %v6261_v59, %v1245_v53  ;;  %vm6264_vm5 = vmmov %vm6221_vm0  ;;  %v6267_v51 = vld [vmem:[#allocation42_spill] sm:$0xff]  ;;  %v6269_v21 = vld [vmem:[#allocation80_spill] sm:$0xff]  ;;  %v1290_v53 = vmul.f32 1.442695, %v1284_v55  ;;  %2304 = vpow2.f32 %v1286_v48 }
 0x135   : > { %6258 = vst [vmem:[#allocation86_spill] sm:$0xff] %v4438_v23  ;;  %v1253_v32 = vsel %vm6264_vm5, %v6263_v28, %v1252_v4  ;;  %vm6266_vm6 = vmmov %vm6250_vm2  ;;  %v4451_v20 = vadd.f32 %v1132_v18, %v6267_v51  ;;  %v4454_v42 = vmul.f32 %v1121_v47, %v6269_v21  ;;  %v6270_v8 = vld [vmem:[#allocation82_spill] sm:$0xff]  ;;  %v1329_v4 = vrot.slane %v4103_v31, %v1328_v60  ;;  %v6272_v51 = vld [vmem:[#allocation25_spill] sm:$0xff] }
 0x136   : > { %6260 = vst [vmem:[#allocation76_spill] sm:$0xff] %v4441_v16  ;;  %v1259_v54 = vsel %vm6266_vm6, %v6265_v15, %v1258_v50  ;;  %v4457_v6 = vmul.f32 %v1122_v58, %v6270_v8  ;;  %v1288_v16 = vmul.f32 1.442695, %v1283_v41  ;;  %v1333_v50 = vrot.slane %v4108_v52, %v1328_v60  ;;  %v6271_v15 = vld [vmem:[#allocation63_spill] sm:$0xff]  ;;  %vm1265_vm2 = vmand %vm2865_vm10, %vm1261_vm9 }
 0x137   : > { %6268 = vst [vmem:[#allocation22_spill] sm:$0xff] %v4451_v20  ;;  %v1260_v14 = vsel %vm6221_vm0, %v6271_v15, %v1259_v54  ;;  %vm1262_vm15 = vcmp.ne.s32.totalorder %v1246_v62, 0  ;;  %vm1263_vm14 = vcmp.ne.s32.totalorder %v1253_v32, 0  ;;  %v1337_v18 = vrot.slane %v4125_v0, %v1328_v60  ;;  %v6275_v48 = vld [vmem:[#allocation55_spill] sm:$0xff]  ;;  %vm6298_vm0 = vmmov %vm6276_vm1 }
 0x138   : > { %v1292_v47 = vmul.f32 1.442695, %v1285_v46  ;;  %v1349_v58 = vrot.slane %v6272_v51, %v1328_v60  ;;  %v1353_v41 = vrot.slane %v4130_v9, %v1328_v60  ;;  %2306 = vpow2.f32 %v1288_v16  ;;  %vm4515_vm8 = vmand %vm2870_vm11, %vm1262_vm15 }
 0x139   : > { %v1341_v55 = vrot.slane %v4140_v30, %v1328_v60  ;;  %v1357_v21 = vrot.slane %v4135_v49, %v1328_v60  ;;  %v1361_v8 = vrot.slane %v4145_v19, %v1328_v60  ;;  %2308 = vpow2.f32 %v1290_v53  ;;  %vm4533_vm5 = vmand %vm2875_vm12, %vm1263_vm14 }
 0x13a   : > { %v4471_v54 = vsub.f32 %v4103_v31, %v1329_v4  ;;  %v4474_v20 = vsub.f32 %v4108_v52, %v1333_v50  ;;  %v1406_v46 = vsel %vm6276_vm1, %v6275_v48, %v6220_v29  ;;  %v4480_v23 = vsub.f32 %v4125_v0, %v1337_v18  ;;  %v6283_v0 = vld [vmem:[#allocation59_spill] sm:$0xff] }
 0x13b   : > { %v1369_v16 = vrot.slane %v4158_v3, %v1328_v60  ;;  %2310 = vpow2.f32 %v1292_v47  ;;  %v4486_v53 = vsub.f32 %v6272_v51, %v1349_v58  ;;  %v4489_v4 = vsub.f32 %v4130_v9, %v1353_v41  ;;  %v6396_v58 = vld [vmem:[#allocation96_spill] sm:$0xff] }
 0x13c   : > { %6273 = vst [vmem:[#allocation81_spill] sm:$0xff] %v4471_v54  ;;  %6274 = vst [vmem:[#allocation35_spill] sm:$0xff] %v4474_v20  ;;  %v1381_v50 = vrot.slane %v4194_v38, %v1328_v60  ;;  %v4493_v48 = vsub.f32 %v4140_v30, %v1341_v55  ;;  %v4496_v18 = vsub.f32 %v4135_v49, %v1357_v21  ;;  %vm1264_vm4 = vcmp.ne.s32.totalorder %v1260_v14, 0 }
 0x13d   : > { %6277 = vst [vmem:[#allocation32_spill] sm:$0xff] %v4480_v23  ;;  %6278 = vst [vmem:[#allocation78_spill] sm:$0xff] %v4486_v53  ;;  %v4499_v29 = vsub.f32 %v4145_v19, %v1361_v8  ;;  %v1407_v47 = vsel %vm6284_vm7, %v6283_v0, %v1406_v46  ;;  %vm1269_vm3 = vcmp.ne.s32.totalorder %v2795_v1, 4  ;;  %v1386_v60 = vmul.f32 %v4471_v54, %v4471_v54  ;;  %v6300_v0 = vld [vmem:[#allocation41_spill] sm:$0xff] }
 0x13e   : > { %6279 = vst [vmem:[#allocation79_spill] sm:$0xff] %v4489_v4  ;;  %6280 = vst [vmem:[#allocation36_spill] sm:$0xff] %v4493_v48  ;;  %v1387_v41 = vmul.f32 %v4474_v20, %v4474_v20  ;;  %v4520_v57 = vsub.f32 %v4158_v3, %v1369_v16  ;;  %v4523_v21 = vsub.f32 %v4166_v5, %v1373_v37  ;;  %v6294_v16 = vld [vmem:[#allocation64_spill] sm:$0xff]  ;;  %vm6295_vm6 = vcmask 1043459  }
 0x13f   : > { %6281 = vst [vmem:[#allocation21_spill] sm:$0xff] %v4496_v18  ;;  %6282 = vst [vmem:[#allocation42_spill] sm:$0xff] %v4499_v29  ;;  %v4526_v8 = vsub.f32 %v4171_v39, %v1377_v22  ;;  %v1388_v46 = vmul.f32 %v4480_v23, %v4480_v23  ;;  %v4538_v20 = vsub.f32 %v4194_v38, %v1381_v50  ;;  %vm1274_vm14 = vcmp.lt.f32.partialorder %v4348_v7, 25.0  ;;  %v6318_v7 = vld [vmem:[#allocation65_spill] sm:$0xff] }
 0x140   : > { %6288 = vst [vmem:[#allocation80_spill] sm:$0xff] %v4520_v57  ;;  %6289 = vst [vmem:[#allocation82_spill] sm:$0xff] %v4523_v21  ;;  %v1390_v37 = vmul.f32 %v4486_v53, %v4486_v53  ;;  %v1391_v22 = vmul.f32 %v4489_v4, %v4489_v4  ;;  %v1408_v54 = vsel %vm6295_vm6, %v6294_v16, %v1407_v47  ;;  %v6299_v47 = vld [vmem:[#allocation30_spill] sm:$0xff]  ;;  %vm1275_vm1 = vcmp.lt.f32.partialorder %v4358_v2, 25.0 }
 0x141   : > { %6290 = vst [vmem:[#allocation63_spill] sm:$0xff] %v4526_v8  ;;  %6293 = vst [vmem:[#allocation25_spill] sm:$0xff] %v4538_v20  ;;  %v1389_v23 = vmul.f32 %v4493_v48, %v4493_v48  ;;  %v1392_v50 = vmul.f32 %v4496_v18, %v4496_v18  ;;  %v1393_v53 = vmul.f32 %v4499_v29, %v4499_v29  ;;  %v6321_v2 = vld [vmem:[#allocation62_spill] sm:$0xff] }
 0x142   : > { %vm4548_vm9 = vmand %vm1265_vm2, %vm1269_vm3  ;;  %v1413_v4 = vsel %vm6298_vm0, %v6155_v36, %v6261_v59  ;;  %v1147_v16 = vmul.f32 %v4373_v25, %v6299_v47  ;;  %v1148_v35 = vmul.f32 %v4381_v45, %v6300_v0  ;;  %vm1276_vm2 = vcmp.lt.f32.partialorder %v4360_v44, 25.0  ;;  %v6303_v45 = vld [vmem:[#allocation68_spill] sm:$0xff] }
 0x143   : > { %vm1268_vm15 = vmand %vm2901_vm13, %vm1264_vm4  ;;  %v1398_v0 = vmul.f32 %v4520_v57, %v4520_v57  ;;  %v1399_v25 = vmul.f32 %v4523_v21, %v4523_v21  ;;  %vm6304_vm4 = vcmask 1044484   ;;  %v1394_v47 = vadd.f32 %v1390_v37, %v1386_v60  ;;  %v6307_v57 = vld [vmem:[#allocation60_spill] sm:$0xff]  ;;  %v2305_v21 = vpop.eup %2304  ;;  %v6312_v37 = vld [vmem:[#allocation23_spill] sm:$0xff] }
 0x144   : > { %vm4574_vm7 = vmand %vm4515_vm8, %vm1269_vm3  ;;  %v1409_v14 = vsel %vm6304_vm4, %v6303_v45, %v1408_v54  ;;  %v1395_v18 = vadd.f32 %v1391_v22, %v1387_v41  ;;  %v1400_v48 = vmul.f32 %v4526_v8, %v4526_v8  ;;  %vm6308_vm8 = vcmask 1042434   ;;  %v6313_v22 = vld [vmem:[#allocation24_spill] sm:$0xff]  ;;  %v6331_v54 = vld [vmem:[#allocation43_spill] sm:$0xff] }
 0x145   : > { %vm4589_vm6 = vmand %vm4533_vm5, %vm1269_vm3  ;;  %v1414_v36 = vsel %vm6308_vm8, %v6307_v57, %v1413_v4  ;;  %v1396_v62 = vadd.f32 %v1392_v50, %v1388_v46  ;;  %v1397_v45 = vadd.f32 %v1393_v53, %v1389_v23  ;;  %v1401_v59 = vmul.f32 %v4538_v20, %v4538_v20  ;;  %v2307_v41 = vpop.eup %2306  ;;  %v6316_v53 = vld [vmem:[#allocation31_spill] sm:$0xff] }
 0x146   : > { %vm4599_vm0 = vmand %vm1268_vm15, %vm1269_vm3  ;;  %vm6311_vm5 = vcmask 1041409   ;;  %v1143_v4 = vadd.f32 %v4429_v40, %v6312_v37  ;;  %v4612_v8 = vadd.f32 %v4435_v17, %v6313_v22  ;;  %vm1277_vm3 = vcmp.lt.f32.partialorder %v4365_v26, 25.0  ;;  %v2309_v50 = vpop.eup %2308  ;;  %v6334_v22 = vld [vmem:[#allocation40_spill] sm:$0xff] }
 0x147   : > { %v1420_v60 = vsel %vm6311_vm5, %v6166_v10, %v6263_v28  ;;  %vm4619_vm15 = vmand %vm4548_vm9, %vm1274_vm14  ;;  %vm6317_vm4 = vcmask 1045509   ;;  %v4627_v40 = vadd.f32 %v4454_v42, %v4317_v27  ;;  %v4631_v17 = vadd.f32 %v4457_v6, %v4321_v11 }
 0x148   : > { %v1410_v46 = vsel %vm6317_vm4, %v6316_v53, %v1409_v14  ;;  %vm1279_vm9 = vmand %vm4574_vm7, %vm1275_vm1  ;;  %vm6319_vm14 = vcmask 1043459   ;;  %v4643_v37 = vadd.f32 %v1147_v16, %v4338_v12  ;;  %v4646_v27 = vadd.f32 %v1148_v35, %v4342_v61  ;;  %v2311_v29 = vpop.eup %2310  ;;  %v6348_v53 = vld [vmem:[#allocation75_spill] sm:$0xff] }
 0x149   : > { %v1415_v32 = vsel %vm6319_vm14, %v6318_v7, %v1414_v36  ;;  %vm6320_vm8 = vmmov %vm6311_vm5  ;;  %v4652_v11 = vadd.f32 %v1398_v0, %v1394_v47  ;;  %vm6322_vm1 = vcmask 1042434   ;;  %v4660_v12 = vadd.f32 %v1399_v25, %v1395_v18  ;;  %v6326_v18 = vld [vmem:[#allocation33_spill] sm:$0xff]  ;;  %v6330_v47 = vld [vmem:[#allocation91_spill] sm:$0xff] }
 0x14a   : > { %v1427_v14 = vsel %vm6320_vm8, %v6168_v63, %v6271_v15  ;;  %vm1280_vm5 = vmand %vm4589_vm6, %vm1276_vm2  ;;  %v1421_v36 = vsel %vm6322_vm1, %v6321_v2, %v1420_v60  ;;  %v4662_v35 = vadd.f32 %v1400_v48, %v1396_v62  ;;  %v4664_v61 = vadd.f32 %v1401_v59, %v1397_v45  ;;  %v6328_v48 = vld [vmem:[#allocation73_spill] sm:$0xff] }
 0x14b   : > { %vm1281_vm7 = vmand %vm4599_vm0, %vm1277_vm3  ;;  %vm6323_vm4 = vcmask 1046534   ;;  %v1294_v42 = vsel %vm4619_vm15, %v2305_v21, 0.0  ;;  %v1295_v6 = vsel %vm1279_vm9, %v2307_v41, 0.0  ;;  %vm6324_vm2 = vcmask 1044484   ;;  %v6332_v60 = vld [vmem:[#allocation45_spill] sm:$0xff] }
 0x14c   : > { %v1411_v44 = vsel %vm6323_vm4, %v6109_v56, %v1410_v46  ;;  %v1416_v16 = vsel %vm6324_vm2, %v6094_v24, %v1415_v32  ;;  %vm6325_vm6 = vmmov %vm6322_vm1  ;;  %v1296_v0 = vsel %vm1280_vm5, %v2309_v50, 0.0  ;;  %v1302_v25 = vmul.f32 %v1294_v42, %v6326_v18  ;;  %v6336_v46 = vld [vmem:[#allocation83_spill] sm:$0xff]  ;;  %v6351_v24 = vld [vmem:[#allocation77_spill] sm:$0xff] }
 0x14d   : > { %v1428_v26 = vsel %vm6325_vm6, %v6056_v13, %v1427_v14  ;;  %vm6327_vm0 = vmmov %vm6319_vm14  ;;  %v4679_v55 = vsel %vm1281_vm7, %v2311_v29, 0.0  ;;  %v1303_v21 = vmul.f32 %v1295_v6, %v6330_v47  ;;  %v1304_v62 = vmul.f32 %v1296_v0, %v6331_v54  ;;  %v6338_v32 = vld [vmem:[#allocation39_spill] sm:$0xff]  ;;  %v6341_v29 = vld [vmem:[#allocation48_spill] sm:$0xff] }
 0x14e   : > { %v1422_v59 = vsel %vm6327_vm0, %v6202_v43, %v1421_v36  ;;  %vm6329_vm3 = vmmov %vm6327_vm0  ;;  %vm6333_vm15 = vcmask 1047559   ;;  %v4686_v23 = vadd.f32 %v1294_v42, %v6334_v22  ;;  %v4689_v50 = vadd.f32 %v1295_v6, %v6336_v46  ;;  %v6339_v36 = vld [vmem:[#allocation37_spill] sm:$0xff]  ;;  %v6343_v47 = vld [vmem:[#allocation34_spill] sm:$0xff] }
 0x14f   : > { %v1429_v45 = vsel %vm6329_vm3, %v6328_v48, %v1428_v26  ;;  %v1412_v41 = vsel %vm6333_vm15, %v6332_v60, %v1411_v44  ;;  %v1310_v14 = vmul.f32 %v1294_v42, %v6338_v32  ;;  %vm6340_vm9 = vcmask 1045509   ;;  %v6344_v54 = vld [vmem:[#allocation71_spill] sm:$0xff]  ;;  %vm6345_vm14 = vmmov %vm6324_vm2  ;;  %v6346_v44 = vld [vmem:[#allocation74_spill] sm:$0xff] }
 0x150   : > { %6335 = vst [vmem:[#allocation30_spill] sm:$0xff] %v4686_v23  ;;  %6337 = vst [vmem:[#allocation41_spill] sm:$0xff] %v4689_v50  ;;  %v1417_v26 = vsel %vm6340_vm9, %v6339_v36, %v1416_v16  ;;  %v4695_v18 = vadd.f32 %v1296_v0, %v6341_v29  ;;  %v1311_v20 = vmul.f32 %v1295_v6, %v6343_v47  ;;  %v6350_v48 = vld [vmem:[#allocation93_spill] sm:$0xff]  ;;  %v6353_v29 = vld [vmem:[#allocation92_spill] sm:$0xff]  ;;  %vm1434_vm0 = vcmp.ne.s32.totalorder %v1412_v41, 0 }
 0x151   : > { %v1423_v56 = vsel %vm6345_vm14, %v6344_v54, %v1422_v59  ;;  %vm6347_vm8 = vmmov %vm6324_vm2  ;;  %v4704_v46 = vadd.f32 %v4679_v55, %v6348_v53  ;;  %v1305_v32 = vmul.f32 %v4679_v55, %v6350_v48  ;;  %v4709_v16 = vadd.f32 %v1302_v25, %v6351_v24  ;;  %v6356_v50 = vld [vmem:[#allocation85_spill] sm:$0xff]  ;;  %v6358_v54 = vld [vmem:[#allocation46_spill] sm:$0xff] }
 0x152   : > { %6342 = vst [vmem:[#allocation60_spill] sm:$0xff] %v4695_v18  ;;  %v1430_v22 = vsel %vm6347_vm8, %v6346_v44, %v1429_v45  ;;  %v1312_v36 = vmul.f32 %v1296_v0, %v6353_v29  ;;  %v6354_v18 = vld [vmem:[#allocation84_spill] sm:$0xff]  ;;  %v4716_v59 = vadd.f32 %v1304_v62, %v6356_v50  ;;  %vm6359_vm5 = vmmov %vm6323_vm4  ;;  %v1455_v53 = vmul.f32 -1.0, %v4652_v11  ;;  %v6360_v44 = vld [vmem:[#allocation94_spill] sm:$0xff] }
 0x153   : > { %6349 = vst [vmem:[#allocation23_spill] sm:$0xff] %v4704_v46  ;;  %6352 = vst [vmem:[#allocation24_spill] sm:$0xff] %v4709_v16  ;;  %v4713_v47 = vadd.f32 %v1303_v21, %v6354_v18  ;;  %v1418_v45 = vsel %vm6359_vm5, %v6358_v54, %v1417_v26  ;;  %v4723_v46 = vmul.f32 %v4679_v55, %v6360_v44  ;;  %v6361_v48 = vld [vmem:[#allocation44_spill] sm:$0xff]  ;;  %v1456_v21 = vmul.f32 -1.0, %v4660_v12  ;;  %v6365_v18 = vld [vmem:[#allocation86_spill] sm:$0xff] }
 0x154   : > { %6357 = vst [vmem:[#allocation62_spill] sm:$0xff] %v4716_v59  ;;  %vm6362_vm1 = vmmov %vm6340_vm9  ;;  %v6363_v25 = vld [vmem:[#allocation52_spill] sm:$0xff]  ;;  %v4731_v62 = vadd.f32 %v1310_v14, %v6365_v18  ;;  %v1457_v26 = vmul.f32 -1.0, %v4662_v35  ;;  %v1501_v54 = vsub.s32 6, %v2795_v1  ;;  %v6369_v44 = vld [vmem:[#allocation22_spill] sm:$0xff]  ;;  %v4741_v16 = vadd.f32 %v1312_v36, %v1143_v4 }
 0x155   : > { %6355 = vst [vmem:[#allocation65_spill] sm:$0xff] %v4713_v47  ;;  %v1424_v24 = vsel %vm6362_vm1, %v6361_v48, %v1423_v56  ;;  %vm6364_vm7 = vmmov %vm6362_vm1  ;;  %v6367_v50 = vld [vmem:[#allocation76_spill] sm:$0xff]  ;;  %v4739_v47 = vadd.f32 %v1305_v32, %v6369_v44  ;;  %v6372_v56 = vld [vmem:[#allocation95_spill] sm:$0xff]  ;;  %vm6388_vm8 = vcmask 1041409  }
 0x156   : > { %v1431_v29 = vsel %vm6364_vm7, %v6363_v25, %v1430_v22  ;;  %6366 = vst [vmem:[#allocation33_spill] sm:$0xff] %v4731_v62  ;;  %v4734_v59 = vadd.f32 %v1311_v20, %v6367_v50  ;;  %6371 = vst [vmem:[#allocation45_spill] sm:$0xff] %v4741_v16  ;;  %v4744_v48 = vmul.f32 %v1294_v42, %v6372_v56  ;;  %v6373_v22 = vld [vmem:[#allocation47_spill] sm:$0xff]  ;;  %v6375_v14 = vld [vmem:[#allocation50_spill] sm:$0xff]  ;;  %v1459_v62 = vmul.f32 1.442695, %v1455_v53 }
 0x157   : > { %6370 = vst [vmem:[#allocation43_spill] sm:$0xff] %v4739_v47  ;;  %vm6374_vm4 = vmmov %vm6333_vm15  ;;  %v6377_v20 = vld [vmem:[#allocation57_spill] sm:$0xff]  ;;  %v6379_v23 = vld [vmem:[#allocation58_spill] sm:$0xff]  ;;  %v1461_v42 = vmul.f32 1.442695, %v1456_v21  ;;  %vm1442_vm15 = vcmp.ne.s32.totalorder %v2795_v1, 5  ;;  %v1522_v21 = vrot.slane %v6272_v51, %v1501_v54  ;;  %v1542_v16 = vrot.slane %v4158_v3, %v1501_v54 }
 0x158   : > { %6368 = vst [vmem:[#allocation91_spill] sm:$0xff] %v4734_v59  ;;  %v1419_v25 = vsel %vm6374_vm4, %v6373_v22, %v1418_v45  ;;  %vm6376_vm2 = vmmov %vm6359_vm5  ;;  %v1458_v59 = vmul.f32 -1.0, %v4664_v61  ;;  %v4754_v32 = vmul.f32 %v1295_v6, %v6379_v23  ;;  %v6380_v4 = vld [vmem:[#allocation67_spill] sm:$0xff]  ;;  %v1463_v45 = vmul.f32 1.442695, %v1457_v26  ;;  %v6383_v56 = vld [vmem:[#allocation61_spill] sm:$0xff] }
 0x159   : > { %v1425_v18 = vsel %vm6376_vm2, %v6375_v14, %v1424_v24  ;;  %vm6378_vm6 = vmmov %vm6376_vm2  ;;  %v4757_v36 = vmul.f32 %v1296_v0, %v6380_v4  ;;  %vm1435_vm3 = vcmp.ne.s32.totalorder %v1419_v25, 0  ;;  %v1502_v24 = vrot.slane %v4103_v31, %v1501_v54  ;;  %v6381_v44 = vld [vmem:[#allocation51_spill] sm:$0xff]  ;;  %v6385_v23 = vld [vmem:[#allocation90_spill] sm:$0xff] }
 0x15a   : > { %v1432_v50 = vsel %vm6378_vm6, %v6377_v20, %v1431_v29  ;;  %vm6382_vm9 = vmmov %vm6374_vm4  ;;  %v1506_v6 = vrot.slane %v4108_v52, %v1501_v54  ;;  %v1510_v20 = vrot.slane %v6385_v23, %v1501_v54  ;;  %2312 = vpow2.f32 %v1459_v62  ;;  %v6387_v62 = vld [vmem:[#allocation49_spill] sm:$0xff] }
 0x15b   : > { %v1426_v29 = vsel %vm6382_vm9, %v6381_v44, %v1425_v18  ;;  %vm6384_vm14 = vmmov %vm6374_vm4  ;;  %v1465_v0 = vmul.f32 1.442695, %v1458_v59  ;;  %v1526_v4 = vrot.slane %v4130_v9, %v1501_v54  ;;  %2314 = vpow2.f32 %v1461_v42 }
 0x15c   : > { %v1433_v53 = vsel %vm6384_vm14, %v6383_v56, %v1432_v50  ;;  %v1514_v26 = vrot.slane %v4140_v30, %v1501_v54  ;;  %v1530_v14 = vrot.slane %v4135_v49, %v1501_v54  ;;  %v1534_v18 = vrot.slane %v4145_v19, %v1501_v54  ;;  %vm1438_vm5 = vmand %vm2865_vm10, %vm1434_vm0 }
 0x15d   : > { %2316 = vpow2.f32 %v1463_v45  ;;  %v4773_v50 = vsub.f32 %v4103_v31, %v1502_v24  ;;  %v1579_v59 = vsel %vm6388_vm8, %v6387_v62, %v6332_v60  ;;  %v4780_v47 = vsub.f32 %v4108_v52, %v1506_v6  ;;  %vm4811_vm4 = vmand %vm2870_vm11, %vm1435_vm3 }
 0x15e   : > { %v4783_v42 = vsub.f32 %v6385_v23, %v1510_v20  ;;  %v1546_v13 = vrot.slane %v4166_v5, %v1501_v54  ;;  %v1550_v43 = vrot.slane %v4171_v39, %v1501_v54  ;;  %2318 = vpow2.f32 %v1465_v0  ;;  %vm4822_vm6 = vmand %vm1438_vm5, %vm1442_vm15 }
 0x15f   : > { %6386 = vst [vmem:[#allocation40_spill] sm:$0xff] %v4773_v50  ;;  %6389 = vst [vmem:[#allocation83_spill] sm:$0xff] %v4780_v47  ;;  %v4791_v45 = vsub.f32 %v6272_v51, %v1522_v21  ;;  %v4794_v24 = vsub.f32 %v4130_v9, %v1526_v4  ;;  %v1554_v6 = vrot.slane %v4194_v38, %v1501_v54  ;;  %vm1436_vm1 = vcmp.ne.s32.totalorder %v1426_v29, 0  ;;  %v6400_v29 = vld [vmem:[#allocation55_spill] sm:$0xff] }
 0x160   : > { %6390 = vst [vmem:[#allocation39_spill] sm:$0xff] %v4783_v42  ;;  %v4798_v20 = vsub.f32 %v4140_v30, %v1514_v26  ;;  %v4801_v62 = vsub.f32 %v4135_v49, %v1530_v14  ;;  %v4804_v41 = vsub.f32 %v4145_v19, %v1534_v18  ;;  %v1321_v0 = vmul.f32 %v4679_v55, %v6396_v58  ;;  %vm4838_vm0 = vmand %vm2875_vm12, %vm1436_vm1  ;;  %v6446_v26 = vld [vmem:[#allocation30_spill] sm:$0xff] }
 0x161   : > { %6391 = vst [vmem:[#allocation48_spill] sm:$0xff] %v4791_v45  ;;  %6392 = vst [vmem:[#allocation34_spill] sm:$0xff] %v4794_v24  ;;  %vm1437_vm7 = vcmp.ne.s32.totalorder %v1433_v53, 0  ;;  %v4816_v54 = vsub.f32 %v4158_v3, %v1542_v16  ;;  %vm6401_vm2 = vcmask 1042434   ;;  %v4827_v58 = vsub.f32 %v4166_v5, %v1546_v13 }
 0x162   : > { %6393 = vst [vmem:[#allocation75_spill] sm:$0xff] %v4798_v20  ;;  %6394 = vst [vmem:[#allocation93_spill] sm:$0xff] %v4801_v62  ;;  %v1580_v14 = vsel %vm6401_vm2, %v6400_v29, %v1579_v59  ;;  %v4830_v55 = vsub.f32 %v4171_v39, %v1550_v43  ;;  %v1559_v25 = vmul.f32 %v4773_v50, %v4773_v50  ;;  %vm1448_vm5 = vcmp.lt.f32.partialorder %v4660_v12, 25.0 }
 0x163   : > { %6395 = vst [vmem:[#allocation77_spill] sm:$0xff] %v4804_v41  ;;  %6399 = vst [vmem:[#allocation92_spill] sm:$0xff] %v4816_v54  ;;  %v1560_v16 = vmul.f32 %v4780_v47, %v4780_v47  ;;  %v4843_v18 = vsub.f32 %v4194_v38, %v1554_v6  ;;  %v1561_v13 = vmul.f32 %v4783_v42, %v4783_v42  ;;  %vm1449_vm1 = vcmp.lt.f32.partialorder %v4662_v35, 25.0 }
 0x164   : > { %6404 = vst [vmem:[#allocation84_spill] sm:$0xff] %v4827_v58  ;;  %6405 = vst [vmem:[#allocation85_spill] sm:$0xff] %v4830_v55  ;;  %v1563_v43 = vmul.f32 %v4791_v45, %v4791_v45  ;;  %v1564_v59 = vmul.f32 %v4794_v24, %v4794_v24  ;;  %v1562_v50 = vmul.f32 %v4798_v20, %v4798_v20  ;;  %v6412_v45 = vld [vmem:[#allocation53_spill] sm:$0xff] }
 0x165   : > { %6409 = vst [vmem:[#allocation94_spill] sm:$0xff] %v4843_v18  ;;  %vm4853_vm3 = vmand %vm2901_vm13, %vm1437_vm7  ;;  %v1565_v6 = vmul.f32 %v4801_v62, %v4801_v62  ;;  %v1566_v42 = vmul.f32 %v4804_v41, %v4804_v41  ;;  %v1571_v62 = vmul.f32 %v4816_v54, %v4816_v54  ;;  %v1572_v20 = vmul.f32 %v4827_v58, %v4827_v58  ;;  %v6423_v58 = vld [vmem:[#allocation56_spill] sm:$0xff]  ;;  %v6438_v24 = vld [vmem:[#allocation81_spill] sm:$0xff] }
 0x166   : > { %vm6413_vm9 = vmmov %vm6388_vm8  ;;  %vm1447_vm8 = vcmp.lt.f32.partialorder %v4652_v11, 25.0  ;;  %v1573_v33 = vmul.f32 %v4830_v55, %v4830_v55  ;;  %v1574_v54 = vmul.f32 %v4843_v18, %v4843_v18  ;;  %v4925_v11 = vadd.f32 %v4744_v48, %v4627_v40 }
 0x167   : > { %v1586_v53 = vsel %vm6413_vm9, %v6412_v45, %v6373_v22  ;;  %vm4870_vm14 = vmand %vm4811_vm4, %vm1442_vm15  ;;  %vm6420_vm4 = vcmask 1043459   ;;  %v1568_v45 = vadd.f32 %v1564_v59, %v1560_v16  ;;  %v2313_v55 = vpop.eup %2312  ;;  %v1569_v47 = vadd.f32 %v1565_v6, %v1561_v13  ;;  %v6441_v59 = vld [vmem:[#allocation32_spill] sm:$0xff] }
 0x168   : > { %vm6416_vm7 = vmmov %vm6413_vm9  ;;  %vm6424_vm9 = vcmask 1042434   ;;  %v4944_v40 = vadd.f32 %v4757_v36, %v4643_v37  ;;  %v4947_v12 = vadd.f32 %v1321_v0, %v4646_v27  ;;  %v6436_v36 = vld [vmem:[#allocation68_spill] sm:$0xff] }
 0x169   : > { %v1593_v41 = vsel %vm6416_vm7, %v6263_v28, %v6381_v44  ;;  %vm4884_vm2 = vmand %vm4838_vm0, %vm1442_vm15  ;;  %v1581_v28 = vsel %vm6420_vm4, %v6419_v34, %v1580_v14  ;;  %v1567_v44 = vadd.f32 %v1563_v43, %v1559_v25  ;;  %v1587_v29 = vsel %vm6424_vm9, %v6423_v58, %v1586_v53  ;;  %v2315_v43 = vpop.eup %2314 }
 0x16a   : > { %vm4900_vm0 = vmand %vm4853_vm3, %vm1442_vm15  ;;  %v1570_v34 = vadd.f32 %v1566_v42, %v1562_v50  ;;  %vm6428_vm3 = vcmask 1041409   ;;  %v1317_v53 = vadd.f32 %v4723_v46, %v4612_v8  ;;  %v6431_v42 = vld [vmem:[#allocation64_spill] sm:$0xff]  ;;  %vm6432_vm4 = vcmask 1044484   ;;  %v2317_v4 = vpop.eup %2316  ;;  %6433 = vst [vmem:[#allocation86_spill] sm:$0xff] %v4947_v12  ;;  %v6450_v50 = vld [vmem:[#allocation41_spill] sm:$0xff] }
 0x16b   : > { %vm4912_vm7 = vmand %vm4822_vm6, %vm1447_vm8  ;;  %v1600_v16 = vsel %vm6428_vm3, %v6271_v15, %v6383_v56  ;;  %vm1450_vm6 = vcmp.lt.f32.partialorder %v4664_v61, 25.0  ;;  %v4940_v8 = vadd.f32 %v4754_v32, %v4631_v17  ;;  %v4955_v61 = vadd.f32 %v1571_v62, %v1567_v44  ;;  %v2319_v27 = vpop.eup %2318 }
 0x16c   : > { %vm6427_vm15 = vmmov %vm6424_vm9  ;;  %v4957_v46 = vadd.f32 %v1572_v20, %v1568_v45  ;;  %v1467_v35 = vsel %vm4912_vm7, %v2313_v55, 0.0  ;;  %v4967_v48 = vadd.f32 %v1573_v33, %v1569_v47  ;;  %v4969_v32 = vadd.f32 %v1574_v54, %v1570_v34  ;;  %v6442_v33 = vld [vmem:[#allocation66_spill] sm:$0xff]  ;;  %v6444_v54 = vld [vmem:[#allocation72_spill] sm:$0xff] }
 0x16d   : > { %v1594_v25 = vsel %vm6427_vm15, %v6166_v10, %v1593_v41  ;;  %vm4932_vm8 = vmand %vm4870_vm14, %vm1448_vm5  ;;  %v1582_v41 = vsel %vm6432_vm4, %v6431_v42, %v1581_v28  ;;  %vm6434_vm5 = vcmask 1043459   ;;  %v1601_v37 = vsel %vm6427_vm15, %v6168_v63, %v1600_v16  ;;  %v6448_v47 = vld [vmem:[#allocation78_spill] sm:$0xff]  ;;  %v6449_v16 = vld [vmem:[#allocation79_spill] sm:$0xff] }
 0x16e   : > { %vm1453_vm14 = vmand %vm4884_vm2, %vm1449_vm1  ;;  %v1588_v28 = vsel %vm6434_vm5, %v6307_v57, %v1587_v29  ;;  %vm6437_vm1 = vcmask 1045509   ;;  %v1468_v62 = vsel %vm4932_vm8, %v2315_v43, 0.0  ;;  %v1475_v20 = vmul.f32 %v1467_v35, %v6438_v24  ;;  %v6440_v29 = vld [vmem:[#allocation35_spill] sm:$0xff]  ;;  %v6454_v24 = vld [vmem:[#allocation36_spill] sm:$0xff] }
 0x16f   : > { %vm6435_vm9 = vmmov %vm6434_vm5  ;;  %v1583_v44 = vsel %vm6437_vm1, %v6436_v36, %v1582_v41  ;;  %v1469_v45 = vsel %vm1453_vm14, %v2317_v4, 0.0  ;;  %v1476_v13 = vmul.f32 %v1468_v62, %v6440_v29  ;;  %v4985_v14 = vadd.f32 %v1467_v35, %v6446_v26  ;;  %v6452_v4 = vld [vmem:[#allocation60_spill] sm:$0xff]  ;;  %v6459_v26 = vld [vmem:[#allocation21_spill] sm:$0xff] }
 0x170   : > { %v1595_v17 = vsel %vm6435_vm9, %v6321_v2, %v1594_v25  ;;  %vm1454_vm3 = vmand %vm4900_vm0, %vm1450_vm6  ;;  %v1477_v55 = vmul.f32 %v1469_v45, %v6441_v59  ;;  %v1483_v25 = vmul.f32 %v1467_v35, %v6448_v47  ;;  %v1484_v43 = vmul.f32 %v1468_v62, %v6449_v16  ;;  %v6462_v16 = vld [vmem:[#allocation73_spill] sm:$0xff] }
 0x171   : > { %vm6439_vm2 = vmmov %vm6432_vm4  ;;  %v1470_v21 = vsel %vm1454_vm3, %v2319_v27, 0.0  ;;  %6447 = vst [vmem:[#allocation76_spill] sm:$0xff] %v4985_v14  ;;  %v4990_v41 = vadd.f32 %v1468_v62, %v6450_v50  ;;  %v1485_v18 = vmul.f32 %v1469_v45, %v6459_v26  ;;  %v6460_v14 = vld [vmem:[#allocation71_spill] sm:$0xff]  ;;  %vm6471_vm14 = vcmask 1046534  }
 0x172   : > { %v1589_v0 = vsel %vm6439_vm2, %v6318_v7, %v1588_v28  ;;  %vm6443_vm0 = vmmov %vm6439_vm2  ;;  %v4993_v28 = vadd.f32 %v1469_v45, %v6452_v4  ;;  %v1478_v29 = vmul.f32 %v1470_v21, %v6454_v24  ;;  %v6466_v4 = vld [vmem:[#allocation65_spill] sm:$0xff]  ;;  %v6468_v24 = vld [vmem:[#allocation62_spill] sm:$0xff]  ;;  %vm6488_vm3 = vcmask 1047559  }
 0x173   : > { %v1596_v34 = vsel %vm6443_vm0, %v6442_v33, %v1595_v17  ;;  %vm6445_vm7 = vmmov %vm6434_vm5  ;;  %6451 = vst [vmem:[#allocation22_spill] sm:$0xff] %v4990_v41  ;;  %v6455_v17 = vld [vmem:[#allocation70_spill] sm:$0xff]  ;;  %v6464_v41 = vld [vmem:[#allocation23_spill] sm:$0xff]  ;;  %v5013_v33 = vadd.f32 %v1477_v55, %v6468_v24 }
 0x174   : > { %v1602_v6 = vsel %vm6445_vm7, %v6444_v54, %v1601_v37  ;;  %6453 = vst [vmem:[#allocation95_spill] sm:$0xff] %v4993_v28  ;;  %vm6456_vm6 = vmmov %vm6437_vm1  ;;  %v6457_v37 = vld [vmem:[#allocation24_spill] sm:$0xff]  ;;  %v5007_v54 = vadd.f32 %v1470_v21, %v6464_v41  ;;  %v5010_v28 = vadd.f32 %v1476_v13, %v6466_v4  ;;  %v6483_v24 = vld [vmem:[#allocation74_spill] sm:$0xff] }
 0x175   : > { %v1590_v59 = vsel %vm6456_vm6, %v6455_v17, %v1589_v0  ;;  %v4999_v27 = vadd.f32 %v1475_v20, %v6457_v37  ;;  %vm6461_vm8 = vmmov %vm6437_vm1  ;;  %6469 = vst [vmem:[#allocation61_spill] sm:$0xff] %v5013_v33  ;;  %v6470_v0 = vld [vmem:[#allocation31_spill] sm:$0xff]  ;;  %v6472_v37 = vld [vmem:[#allocation42_spill] sm:$0xff] }
 0x176   : > { %v1597_v47 = vsel %vm6461_vm8, %v6460_v14, %v1596_v34  ;;  %vm6463_vm4 = vmmov %vm6443_vm0  ;;  %6465 = vst [vmem:[#allocation58_spill] sm:$0xff] %v5007_v54  ;;  %v1584_v20 = vsel %vm6471_vm14, %v6470_v0, %v1583_v44  ;;  %v1486_v26 = vmul.f32 %v1470_v21, %v6472_v37  ;;  %v6475_v34 = vld [vmem:[#allocation91_spill] sm:$0xff]  ;;  %v6481_v4 = vld [vmem:[#allocation44_spill] sm:$0xff]  ;;  %v1628_v37 = vmul.f32 -1.0, %v4955_v61 }
 0x177   : > { %6458 = vst [vmem:[#allocation47_spill] sm:$0xff] %v4999_v27  ;;  %v1603_v50 = vsel %vm6463_vm4, %v6462_v16, %v1602_v6  ;;  %6467 = vst [vmem:[#allocation67_spill] sm:$0xff] %v5010_v28  ;;  %v6473_v27 = vld [vmem:[#allocation33_spill] sm:$0xff]  ;;  %v5022_v14 = vadd.f32 %v1484_v43, %v6475_v34  ;;  %v6479_v54 = vld [vmem:[#allocation43_spill] sm:$0xff]  ;;  %v1629_v34 = vmul.f32 -1.0, %v4957_v46  ;;  %vm1615_vm8 = vcmp.ne.s32.totalorder %v2795_v1, 6 }
 0x178   : > { %v5019_v12 = vadd.f32 %v1483_v25, %v6473_v27  ;;  %v6477_v6 = vld [vmem:[#allocation37_spill] sm:$0xff]  ;;  %vm6478_vm5 = vmmov %vm6471_vm14  ;;  %v5027_v13 = vadd.f32 %v1478_v29, %v6479_v54  ;;  %v6487_v27 = vld [vmem:[#allocation38_spill] sm:$0xff] }
 0x179   : > { %6476 = vst [vmem:[#allocation96_spill] sm:$0xff] %v5022_v14  ;;  %v1591_v41 = vsel %vm6478_vm5, %v6477_v6, %v1590_v59  ;;  %vm6482_vm9 = vmmov %vm6478_vm5  ;;  %v6485_v33 = vld [vmem:[#allocation45_spill] sm:$0xff]  ;;  %v1585_v43 = vsel %vm6488_vm3, %v6487_v27, %v1584_v20  ;;  %v5041_v59 = vsub.s32 7, %v2795_v1  ;;  %v6489_v54 = vld [vmem:[#allocation80_spill] sm:$0xff] }
 0x17a   : > { %6474 = vst [vmem:[#allocation90_spill] sm:$0xff] %v5019_v12  ;;  %6480 = vst [vmem:[#allocation56_spill] sm:$0xff] %v5027_v13  ;;  %v1598_v55 = vsel %vm6482_vm9, %v6481_v4, %v1597_v47  ;;  %v5035_v25 = vadd.f32 %v1485_v18, %v6485_v33  ;;  %v5044_v29 = vmul.f32 %v1467_v35, %v6489_v54  ;;  %v6490_v47 = vld [vmem:[#allocation82_spill] sm:$0xff]  ;;  %v1630_v18 = vmul.f32 -1.0, %v4967_v48  ;;  %v6496_v13 = vld [vmem:[#allocation52_spill] sm:$0xff] }
 0x17b   : > { %vm6484_vm15 = vmmov %vm6437_vm1  ;;  %v5047_v14 = vmul.f32 %v1468_v62, %v6490_v47  ;;  %v5052_v33 = vadd.f32 %v1486_v26, %v1317_v53  ;;  %v1631_v4 = vmul.f32 -1.0, %v4969_v32  ;;  %v6498_v35 = vld [vmem:[#allocation63_spill] sm:$0xff]  ;;  %v6499_v62 = vld [vmem:[#allocation25_spill] sm:$0xff]  ;;  %vm1607_vm7 = vcmp.ne.s32.totalorder %v1585_v43, 0 }
 0x17c   : > { %v1604_v44 = vsel %vm6484_vm15, %v6483_v24, %v1603_v50  ;;  %6486 = vst [vmem:[#allocation64_spill] sm:$0xff] %v5035_v25  ;;  %v6491_v50 = vld [vmem:[#allocation46_spill] sm:$0xff]  ;;  %vm6492_vm1 = vmmov %vm6488_vm3  ;;  %v5060_v54 = vmul.f32 %v1469_v45, %v6498_v35  ;;  %v5063_v47 = vmul.f32 %v1470_v21, %v6499_v62  ;;  %v1634_v53 = vmul.f32 1.442695, %v1629_v34 }
 0x17d   : > { %v1592_v12 = vsel %vm6492_vm1, %v6491_v50, %v1591_v41  ;;  %6493 = vst [vmem:[#allocation68_spill] sm:$0xff] %v5052_v33  ;;  %v6494_v25 = vld [vmem:[#allocation50_spill] sm:$0xff]  ;;  %vm6495_vm2 = vmmov %vm6492_vm1  ;;  %v1632_v41 = vmul.f32 1.442695, %v1628_v37  ;;  %v1675_v26 = vrot.slane %v4103_v31, %v5041_v59  ;;  %v1636_v33 = vmul.f32 1.442695, %v1630_v18 }
 0x17e   : > { %v1599_v20 = vsel %vm6495_vm2, %v6494_v25, %v1598_v55  ;;  %vm6497_vm0 = vmmov %vm6478_vm5  ;;  %vm1608_vm6 = vcmp.ne.s32.totalorder %v1592_v12, 0  ;;  %v6500_v55 = vld [vmem:[#allocation57_spill] sm:$0xff]  ;;  %v1679_v45 = vrot.slane %v4108_v52, %v5041_v59  ;;  %v1638_v35 = vmul.f32 1.442695, %v1631_v4 }
 0x17f   : > { %v1605_v28 = vsel %vm6497_vm0, %v6496_v13, %v1604_v44  ;;  %vm6501_vm4 = vmmov %vm6492_vm1  ;;  %vm1609_vm14 = vcmp.ne.s32.totalorder %v1599_v20, 0  ;;  %v1695_v21 = vrot.slane %v6272_v51, %v5041_v59  ;;  %v1699_v37 = vrot.slane %v4130_v9, %v5041_v59 }
 0x180   : > { %v1606_v44 = vsel %vm6501_vm4, %v6500_v55, %v1605_v28  ;;  %vm6502_vm5 = vcmask 1041409   ;;  %2320 = vpow2.f32 %v1632_v41  ;;  %v1683_v28 = vrot.slane %v6385_v23, %v5041_v59  ;;  %vm1611_vm3 = vmand %vm2865_vm10, %vm1607_vm7 }
 0x181   : > { %v1752_v34 = vsel %vm6502_vm5, %v6332_v60, %v6487_v27  ;;  %v1687_v18 = vrot.slane %v4140_v30, %v5041_v59  ;;  %v1703_v4 = vrot.slane %v4135_v49, %v5041_v59  ;;  %2322 = vpow2.f32 %v1634_v53  ;;  %vm6503_vm9 = vmmov %vm6502_vm5 }
 0x182   : > { %v5086_v62 = vsub.f32 %v4103_v31, %v1675_v26  ;;  %v1707_v13 = vrot.slane %v4145_v19, %v5041_v59  ;;  %v1759_v60 = vsel %vm6503_vm9, %v6373_v22, %v6491_v50  ;;  %2324 = vpow2.f32 %v1636_v33  ;;  %v6504_v22 = vld [vmem:[#allocation49_spill] sm:$0xff]  ;;  %vm5142_vm7 = vmand %vm2870_vm11, %vm1608_vm6 }
 0x183   : > { %v5094_v27 = vsub.f32 %v4108_v52, %v1679_v45  ;;  %v1715_v41 = vrot.slane %v4158_v3, %v5041_v59  ;;  %v1719_v53 = vrot.slane %v4166_v5, %v5041_v59  ;;  %v5101_v31 = vsub.f32 %v6272_v51, %v1695_v21  ;;  %vm5157_vm4 = vmand %vm1611_vm3, %vm1615_vm8  ;;  %v6576_v51 = vld [vmem:[#allocation48_spill] sm:$0xff] }
 0x184   : > { %v5104_v26 = vsub.f32 %v4130_v9, %v1699_v37  ;;  %v1723_v24 = vrot.slane %v4171_v39, %v5041_v59  ;;  %vm6505_vm15 = vcmask 1042434   ;;  %2326 = vpow2.f32 %v1638_v35  ;;  %v6507_v35 = vld [vmem:[#allocation55_spill] sm:$0xff]  ;;  %v6509_v37 = vld [vmem:[#allocation53_spill] sm:$0xff]  ;;  %vm5172_vm9 = vmand %vm2875_vm12, %vm1609_vm14 }
 0x185   : > { %v1753_v50 = vsel %vm6505_vm15, %v6504_v22, %v1752_v34  ;;  %v5111_v52 = vsub.f32 %v6385_v23, %v1683_v28  ;;  %v5114_v33 = vsub.f32 %v4140_v30, %v1687_v18  ;;  %v5117_v45 = vsub.f32 %v4135_v49, %v1703_v4  ;;  %vm6510_vm2 = vmmov %vm6505_vm15 }
 0x186   : > { %v5123_v9 = vsub.f32 %v4145_v19, %v1707_v13  ;;  %v1727_v21 = vrot.slane %v4194_v38, %v5041_v59  ;;  %vm6508_vm1 = vcmask 1043459   ;;  %v1760_v30 = vsel %vm6510_vm2, %v6509_v37, %v1759_v60  ;;  %vm5194_vm14 = vmand %vm5142_vm7, %vm1615_vm8 }
 0x187   : > { %v1754_v23 = vsel %vm6508_vm1, %v6507_v35, %v1753_v50  ;;  %vm1610_vm0 = vcmp.ne.s32.totalorder %v1606_v44, 0  ;;  %v5132_v49 = vsub.f32 %v4158_v3, %v1715_v41  ;;  %v5135_v43 = vsub.f32 %v4166_v5, %v1719_v53  ;;  %vm6518_vm5 = vmmov %vm6508_vm1  ;;  %v6592_v41 = vld [vmem:[#allocation92_spill] sm:$0xff] }
 0x188   : > { %v1732_v19 = vmul.f32 %v5086_v62, %v5086_v62  ;;  %v5147_v34 = vsub.f32 %v4171_v39, %v1723_v24  ;;  %v1733_v3 = vmul.f32 %v5094_v27, %v5094_v27  ;;  %v1736_v5 = vmul.f32 %v5101_v31, %v5101_v31  ;;  %v6516_v24 = vld [vmem:[#allocation59_spill] sm:$0xff]  ;;  %vm5206_vm1 = vmand %vm2901_vm13, %vm1610_vm0 }
 0x189   : > { %v1737_v28 = vmul.f32 %v5104_v26, %v5104_v26  ;;  %v1734_v18 = vmul.f32 %v5111_v52, %v5111_v52  ;;  %v1738_v39 = vmul.f32 %v5117_v45, %v5117_v45  ;;  %vm6517_vm6 = vcmask 1044484  }
 0x18a   : > { %v1755_v4 = vsel %vm6517_vm6, %v6516_v24, %v1754_v23  ;;  %v1761_v60 = vsel %vm6518_vm5, %v6423_v58, %v1760_v30  ;;  %v5177_v22 = vsub.f32 %v4194_v38, %v1727_v21  ;;  %v1735_v50 = vmul.f32 %v5114_v33, %v5114_v33  ;;  %v6522_v23 = vld [vmem:[#allocation51_spill] sm:$0xff]  ;;  %vm6530_vm7 = vmmov %vm6517_vm6  ;;  %v6550_v38 = vld [vmem:[#allocation86_spill] sm:$0xff] }
 0x18b   : > { %v1739_v35 = vmul.f32 %v5123_v9, %v5123_v9  ;;  %vm6523_vm15 = vcmask 1041409   ;;  %v5188_v20 = vadd.f32 %v5044_v29, %v4925_v11  ;;  %vm1620_vm3 = vcmp.lt.f32.partialorder %v4955_v61, 25.0  ;;  %vm5218_vm6 = vmand %vm5172_vm9, %vm1615_vm8  ;;  %v6553_v11 = vld [vmem:[#allocation72_spill] sm:$0xff]  ;;  %v6564_v61 = vld [vmem:[#allocation87_spill] sm:$0xff] }
 0x18c   : > { %v1766_v58 = vsel %vm6523_vm15, %v6522_v23, %v6494_v25  ;;  %v1744_v21 = vmul.f32 %v5132_v49, %v5132_v49  ;;  %v1745_v25 = vmul.f32 %v5135_v43, %v5135_v43  ;;  %v1740_v29 = vadd.f32 %v1736_v5, %v1732_v19  ;;  %vm5232_vm9 = vmand %vm5157_vm4, %vm1620_vm3 }
 0x18d   : > { %v1741_v30 = vadd.f32 %v1737_v28, %v1733_v3  ;;  %vm6529_vm2 = vcmask 1045509   ;;  %v1762_v24 = vsel %vm6530_vm7, %v6307_v57, %v1761_v60  ;;  %vm1621_vm0 = vcmp.lt.f32.partialorder %v4957_v46, 25.0  ;;  %v6533_v3 = vld [vmem:[#allocation54_spill] sm:$0xff]  ;;  %v2321_v5 = vpop.eup %2320  ;;  %vm5249_vm4 = vmand %vm5206_vm1, %vm1615_vm8 }
 0x18e   : > { %v1756_v59 = vsel %vm6529_vm2, %v6431_v42, %v1755_v4  ;;  %v1742_v23 = vadd.f32 %v1738_v39, %v1734_v18  ;;  %v1746_v19 = vmul.f32 %v5147_v34, %v5147_v34  ;;  %vm6534_vm5 = vcmask 1042434   ;;  %v2323_v4 = vpop.eup %2322  ;;  %vm5266_vm8 = vmand %vm5194_vm14, %vm1621_vm0 }
 0x18f   : > { %v1767_v42 = vsel %vm6534_vm5, %v6533_v3, %v1766_v58  ;;  %vm1622_vm15 = vcmp.lt.f32.partialorder %v4967_v48, 25.0  ;;  %v1743_v28 = vadd.f32 %v1739_v35, %v1735_v50  ;;  %v1747_v18 = vmul.f32 %v5177_v22, %v5177_v22 }
 0x190   : > { %vm6537_vm2 = vcmask 1041409   ;;  %v5243_v60 = vadd.f32 %v5047_v14, %v4940_v8  ;;  %vm1623_vm3 = vcmp.lt.f32.partialorder %v4969_v32, 25.0  ;;  %vm6540_vm7 = vcmask 1046534  }
 0x191   : > { %v1773_v39 = vsel %vm6537_vm2, %v6383_v56, %v6500_v55  ;;  %v1757_v12 = vsel %vm6540_vm7, %v6436_v36, %v1756_v59  ;;  %vm6541_vm5 = vcmask 1045509   ;;  %v2325_v55 = vpop.eup %2324  ;;  %v5260_v8 = vadd.f32 %v5060_v54, %v4944_v40  ;;  %vm1626_vm2 = vmand %vm5218_vm6, %vm1622_vm15  ;;  %v6556_v59 = vld [vmem:[#allocation40_spill] sm:$0xff] }
 0x192   : > { %v1763_v56 = vsel %vm6541_vm5, %v6318_v7, %v1762_v24  ;;  %v5270_v53 = vadd.f32 %v1744_v21, %v1740_v29  ;;  %v5272_v50 = vadd.f32 %v1745_v25, %v1741_v30  ;;  %vm6544_vm1 = vcmask 1043459   ;;  %v2327_v35 = vpop.eup %2326  ;;  %vm1627_vm7 = vmand %vm5249_vm4, %vm1623_vm3  ;;  %v6551_v21 = vld [vmem:[#allocation66_spill] sm:$0xff]  ;;  %v6555_v30 = vld [vmem:[#allocation76_spill] sm:$0xff] }
 0x193   : > { %v1768_v7 = vsel %vm6544_vm1, %v6166_v10, %v1767_v42  ;;  %v5282_v40 = vsel %vm5232_vm9, %v2321_v5, 0.0  ;;  %v5284_v46 = vadd.f32 %v1746_v19, %v1742_v23  ;;  %vm6545_vm14 = vcmask 1044484   ;;  %vm6549_vm9 = vmmov %vm6544_vm1  ;;  %v6559_v19 = vld [vmem:[#allocation71_spill] sm:$0xff] }
 0x194   : > { %v1769_v36 = vsel %vm6545_vm14, %v6321_v2, %v1768_v7  ;;  %vm6546_vm0 = vcmask 1042434   ;;  %v5294_v10 = vadd.f32 %v1747_v18, %v1743_v28  ;;  %vm6547_vm6 = vcmask 1047559   ;;  %vm6552_vm4 = vmmov %vm6541_vm5  ;;  %v6561_v28 = vld [vmem:[#allocation74_spill] sm:$0xff] }
 0x195   : > { %v1774_v54 = vsel %vm6546_vm0, %v6271_v15, %v1773_v39  ;;  %v1758_v48 = vsel %vm6547_vm6, %v6470_v0, %v1757_v12  ;;  %vm6548_vm15 = vcmask 1046534   ;;  %v5304_v15 = vadd.f32 %v5063_v47, %v6550_v38  ;;  %vm6554_vm3 = vmmov %vm6545_vm14  ;;  %v6563_v39 = vld [vmem:[#allocation69_spill] sm:$0xff]  ;;  %v6565_v12 = vld [vmem:[#allocation83_spill] sm:$0xff] }
 0x196   : > { %v1764_v58 = vsel %vm6548_vm15, %v6455_v17, %v1763_v56  ;;  %v1775_v2 = vsel %vm6549_vm9, %v6168_v63, %v1774_v54  ;;  %v1641_v32 = vsel %vm5266_vm8, %v2323_v4, 0.0  ;;  %v1770_v25 = vsel %vm6552_vm4, %v6551_v21, %v1769_v36  ;;  %vm6557_vm5 = vmmov %vm6552_vm4  ;;  %v6566_v36 = vld [vmem:[#allocation44_spill] sm:$0xff] }
 0x197   : > { %v1776_v29 = vsel %vm6554_vm3, %v6553_v11, %v1775_v2  ;;  %v1642_v0 = vsel %vm1626_vm2, %v2325_v55, 0.0  ;;  %v5314_v17 = vadd.f32 %v5282_v40, %v6555_v30  ;;  %v1648_v63 = vmul.f32 %v5282_v40, %v6556_v59  ;;  %vm6558_vm8 = vmmov %vm6547_vm6  ;;  %v6569_v2 = vld [vmem:[#allocation52_spill] sm:$0xff] }
 0x198   : > { %v1777_v47 = vsel %vm6557_vm5, %v6462_v16, %v1776_v29  ;;  %v1643_v24 = vsel %vm1627_vm7, %v2327_v35, 0.0  ;;  %v1765_v44 = vsel %vm6558_vm8, %v6477_v6, %v1764_v58  ;;  %vm1780_vm1 = vcmp.ne.s32.totalorder %v1758_v48, 0  ;;  %vm6560_vm14 = vmmov %vm6548_vm15  ;;  %v6568_v35 = vld [vmem:[#allocation88_spill] sm:$0xff]  ;;  %v6575_v48 = vld [vmem:[#allocation22_spill] sm:$0xff] }
 0x199   : > { %v1801_v23 = vmul.f32 -1.0, %v5270_v53  ;;  %v1771_v3 = vsel %vm6560_vm14, %v6559_v19, %v1770_v25  ;;  %v1802_v42 = vmul.f32 -1.0, %v5272_v50  ;;  %v1803_v5 = vmul.f32 -1.0, %v5284_v46  ;;  %vm6562_vm2 = vmmov %vm6560_vm14  ;;  %v6571_v25 = vld [vmem:[#allocation89_spill] sm:$0xff] }
 0x19a   : > { %v1804_v57 = vmul.f32 -1.0, %v5294_v10  ;;  %v1778_v18 = vsel %vm6562_vm2, %v6561_v28, %v1777_v47  ;;  %v1845_v4 = vrot.slane %v6563_v39, 4  ;;  %v1851_v6 = vrot.slane %v6564_v61, 4  ;;  %vm6567_vm0 = vmmov %vm6547_vm6  ;;  %v6574_v47 = vld [vmem:[#allocation39_spill] sm:$0xff]  ;;  %v6591_v29 = vld [vmem:[#allocation77_spill] sm:$0xff] }
 0x19b   : > { %v1805_v16 = vmul.f32 1.442695, %v1801_v23  ;;  %v1649_v56 = vmul.f32 %v1641_v32, %v6565_v12  ;;  %v1807_v55 = vmul.f32 1.442695, %v1802_v42  ;;  %v1809_v14 = vmul.f32 1.442695, %v1803_v5  ;;  %vm6570_vm6 = vmmov %vm6567_vm0 }
 0x19c   : > { %v1811_v7 = vmul.f32 1.442695, %v1804_v57  ;;  %v1772_v54 = vsel %vm6567_vm0, %v6566_v36, %v1771_v3  ;;  %vm1781_vm7 = vcmp.ne.s32.totalorder %v1765_v44, 0  ;;  %v1857_v58 = vrot.slane %v6568_v35, 4  ;;  %vm5343_vm15 = vmand %vm2865_vm10, %vm1780_vm1  ;;  %v6577_v5 = vld [vmem:[#allocation34_spill] sm:$0xff]  ;;  %v6585_v12 = vld [vmem:[#allocation75_spill] sm:$0xff] }
 0x19d   : > { %2328 = vpow2.f32 %v1805_v16  ;;  %v1779_v38 = vsel %vm6570_vm6, %v6569_v2, %v1778_v18  ;;  %v1846_v21 = vadd.f32 %v1845_v4, %v6563_v39  ;;  %v1863_v11 = vrot.slane %v6571_v25, 4  ;;  %vm5361_vm3 = vmand %vm2870_vm11, %vm1781_vm7  ;;  %v6580_v18 = vld [vmem:[#allocation95_spill] sm:$0xff]  ;;  %v6581_v39 = vld [vmem:[#allocation58_spill] sm:$0xff] }
 0x19e   : > { %2330 = vpow2.f32 %v1807_v55  ;;  %vm1788_vm9 = vcmp.ne.s32.totalorder %v2795_v1, 7  ;;  %v1852_v30 = vadd.f32 %v1851_v6, %v6564_v61  ;;  %v1858_v59 = vadd.f32 %v1857_v58, %v6568_v35  ;;  %v6582_v61 = vld [vmem:[#allocation47_spill] sm:$0xff]  ;;  %v6589_v58 = vld [vmem:[#allocation61_spill] sm:$0xff]  ;;  %v6602_v28 = vld [vmem:[#allocation56_spill] sm:$0xff] }
 0x19f   : > { %2332 = vpow2.f32 %v1809_v14  ;;  %v1650_v23 = vmul.f32 %v1642_v0, %v6574_v47  ;;  %vm1782_vm4 = vcmp.ne.s32.totalorder %v1772_v54, 0  ;;  %v1864_v19 = vadd.f32 %v1863_v11, %v6571_v25  ;;  %vm5378_vm5 = vmand %vm5343_vm15, %vm1788_vm9  ;;  %v6588_v54 = vld [vmem:[#allocation67_spill] sm:$0xff]  ;;  %v6590_v25 = vld [vmem:[#allocation93_spill] sm:$0xff] }
 0x1a0   : > { %2334 = vpow2.f32 %v1811_v7  ;;  %v5353_v3 = vadd.f32 %v1641_v32, %v6575_v48  ;;  %v1656_v42 = vmul.f32 %v5282_v40, %v6576_v51  ;;  %v1657_v57 = vmul.f32 %v1641_v32, %v6577_v5  ;;  %vm5385_vm11 = vmand %vm2875_vm12, %vm1782_vm4  ;;  %v6593_v51 = vld [vmem:[#allocation84_spill] sm:$0xff] }
 0x1a1   : > { %vm1783_vm10 = vcmp.ne.s32.totalorder %v1779_v38, 0  ;;  %v5366_v16 = vadd.f32 %v1642_v0, %v6580_v18  ;;  %v5369_v4 = vadd.f32 %v1643_v24, %v6581_v39  ;;  %v5372_v6 = vadd.f32 %v1648_v63, %v6582_v61  ;;  %v6594_v18 = vld [vmem:[#allocation85_spill] sm:$0xff]  ;;  %vm5404_vm12 = vmand %vm5361_vm3, %vm1788_vm9  ;;  %v6597_v38 = vld [vmem:[#allocation94_spill] sm:$0xff] }
 0x1a2   : > { %v1847_v13 = vrot.slane %v1846_v21, 2  ;;  %v1651_v55 = vmul.f32 %v1643_v24, %v6585_v12  ;;  %v1853_v7 = vrot.slane %v1852_v30, 2  ;;  %v1859_v63 = vrot.slane %v1858_v59, 2  ;;  %vm1787_vm8 = vmand %vm2901_vm13, %vm1783_vm10  ;;  %v6603_v12 = vld [vmem:[#allocation90_spill] sm:$0xff] }
 0x1a3   : > { %v1865_v36 = vrot.slane %v1864_v19, 2  ;;  %v1653_v35 = vadd.f32 %v1649_v56, %v6588_v54  ;;  %v1654_v2 = vadd.f32 %v1650_v23, %v6589_v58  ;;  %v1658_v11 = vmul.f32 %v1642_v0, %v6590_v25  ;;  %vm5414_vm13 = vmand %vm5385_vm11, %vm1788_vm9  ;;  %v6604_v54 = vld [vmem:[#allocation96_spill] sm:$0xff] }
 0x1a4   : > { %v1659_v47 = vmul.f32 %v1643_v24, %v6591_v29  ;;  %v1664_v48 = vmul.f32 %v5282_v40, %v6592_v41  ;;  %v1665_v5 = vmul.f32 %v1641_v32, %v6593_v51  ;;  %v1666_v39 = vmul.f32 %v1642_v0, %v6594_v18  ;;  %vm5424_vm0 = vmand %vm1787_vm8, %vm1788_vm9 }
 0x1a5   : > { %vm1793_vm1 = vcmp.lt.f32.partialorder %v5270_v53, 25.0  ;;  %v1667_v37 = vmul.f32 %v1643_v24, %v6597_v38  ;;  %vm1794_vm14 = vcmp.lt.f32.partialorder %v5272_v50, 25.0  ;;  %vm1795_vm2 = vcmp.lt.f32.partialorder %v5284_v46, 25.0 }
 0x1a6   : > { %v5420_v32 = vadd.f32 %v1847_v13, %v1846_v21  ;;  %v5428_v0 = vadd.f32 %v1853_v7, %v1852_v30  ;;  %v5430_v24 = vadd.f32 %v1859_v63, %v1858_v59  ;;  %v5432_v23 = vadd.f32 %v1865_v36, %v1864_v19  ;;  %vm5440_vm6 = vmand %vm5378_vm5, %vm1793_vm1  ;;  %v6607_v30 = vld [vmem:[#allocation64_spill] sm:$0xff] }
 0x1a7   : > { %v1655_v61 = vadd.f32 %v1651_v55, %v6602_v28  ;;  %v1660_v14 = vadd.f32 %v1656_v42, %v6603_v12  ;;  %v1661_v58 = vadd.f32 %v1657_v57, %v6604_v54  ;;  %vm1796_vm7 = vcmp.lt.f32.partialorder %v5294_v10, 25.0  ;;  %v6608_v59 = vld [vmem:[#allocation68_spill] sm:$0xff]  ;;  %vm1798_vm15 = vmand %vm5404_vm12, %vm1794_vm14 }
 0x1a8   : > { %v1662_v13 = vadd.f32 %v1658_v11, %v6607_v30  ;;  %v1663_v7 = vadd.f32 %v1659_v47, %v6608_v59  ;;  %v1668_v19 = vadd.f32 %v1664_v48, %v5188_v20  ;;  %v1669_v55 = vadd.f32 %v1665_v5, %v5243_v60  ;;  %vm5458_vm9 = vmand %vm5414_vm13, %vm1795_vm2 }
 0x1a9   : > { %v1670_v57 = vadd.f32 %v1666_v39, %v5260_v8  ;;  %v1671_v44 = vadd.f32 %v1667_v37, %v5304_v15  ;;  %v1849_v20 = vrot.slane %v5420_v32, 1  ;;  %v2554_v60 = vmov 1966171168   ;;  %vm1800_vm4 = vmand %vm5424_vm0, %vm1796_vm7 }
 0x1aa   : > { %v2329_v42 = vpop.eup %2328  ;;  %v5463_v50 = vunpack.c.l.s4 %v2554_v60  ;;  %v1855_v46 = vrot.slane %v5428_v0, 1  ;;  %v1861_v15 = vrot.slane %v5430_v24, 1  ;;  %v1867_v25 = vrot.slane %v5432_v23, 1 }
 0x1ab   : > { %v2331_v36 = vpop.eup %2330  ;;  %v1813_v8 = vsel %vm5440_vm6, %v2329_v42, 0.0 }
 0x1ac   : > { %v2333_v11 = vpop.eup %2332  ;;  %v1814_v29 = vsel %vm1798_vm15, %v2331_v36, 0.0  ;;  %v1817_v47 = vadd.f32 %v1813_v8, %v5314_v17  ;;  %v1821_v41 = vmul.f32 %v1813_v8, %v5086_v62  ;;  %v1829_v10 = vmul.f32 %v1813_v8, %v5101_v31 }
 0x1ad   : > { %v2335_v48 = vpop.eup %2334  ;;  %v1815_v51 = vsel %vm5458_vm9, %v2333_v11, 0.0  ;;  %v1818_v5 = vadd.f32 %v1814_v29, %v5353_v3  ;;  %v1822_v18 = vmul.f32 %v1814_v29, %v5094_v27  ;;  %v1830_v39 = vmul.f32 %v1814_v29, %v5104_v26 }
 0x1ae   : > { %v1816_v56 = vsel %vm1800_vm4, %v2335_v48, 0.0  ;;  %v1819_v38 = vadd.f32 %v1815_v51, %v5366_v16  ;;  %v1823_v37 = vmul.f32 %v1815_v51, %v5111_v52  ;;  %v1825_v17 = vadd.f32 %v1821_v41, %v5372_v6 }
 0x1af   : > { %v1820_v62 = vadd.f32 %v1816_v56, %v5369_v4  ;;  %v1824_v31 = vmul.f32 %v1816_v56, %v5114_v33  ;;  %v1826_v40 = vadd.f32 %v1822_v18, %v1653_v35  ;;  %v1831_v53 = vmul.f32 %v1815_v51, %v5117_v45 }
 0x1b0   : > { %v1827_v28 = vadd.f32 %v1823_v37, %v1654_v2  ;;  %v1832_v3 = vmul.f32 %v1816_v56, %v5123_v9  ;;  %v1833_v27 = vadd.f32 %v1829_v10, %v1660_v14  ;;  %v1834_v12 = vadd.f32 %v1830_v39, %v1661_v58 }
 0x1b1   : > { %v1828_v26 = vadd.f32 %v1824_v31, %v1655_v61  ;;  %v1835_v54 = vadd.f32 %v1831_v53, %v1662_v13  ;;  %v1837_v16 = vmul.f32 %v1813_v8, %v5132_v49  ;;  %v1838_v52 = vmul.f32 %v1814_v29, %v5135_v43 }
 0x1b2   : > { %v1836_v21 = vadd.f32 %v1832_v3, %v1663_v7  ;;  %v1839_v4 = vmul.f32 %v1815_v51, %v5147_v34  ;;  %v1840_v33 = vmul.f32 %v1816_v56, %v5177_v22  ;;  %v1869_v6 = vrot.slane %v1817_v47, 4 }
 0x1b3   : > { %v1841_v35 = vadd.f32 %v1837_v16, %v1668_v19  ;;  %v1842_v45 = vadd.f32 %v1838_v52, %v1669_v55  ;;  %v1875_v2 = vrot.slane %v1818_v5, 4  ;;  %v1881_v9 = vrot.slane %v1819_v38, 4 }
 0x1b4   : > { %v1843_v14 = vadd.f32 %v1839_v4, %v1670_v57  ;;  %v1844_v58 = vadd.f32 %v1840_v33, %v1671_v44  ;;  %v1870_v61 = vadd.f32 %v1869_v6, %v1817_v47  ;;  %v1887_v30 = vrot.slane %v1820_v62, 4 }
 0x1b5   : > { %v1876_v13 = vadd.f32 %v1875_v2, %v1818_v5  ;;  %v1882_v49 = vadd.f32 %v1881_v9, %v1819_v38  ;;  %v1935_v59 = vmul.f32 0.2124, %v1825_v17  ;;  %v1936_v43 = vmul.f32 0.2124, %v1826_v40 }
 0x1b6   : > { %v1871_v7 = vrot.slane %v1870_v61, 2  ;;  %v1888_v42 = vadd.f32 %v1887_v30, %v1820_v62  ;;  %v1937_v34 = vmul.f32 0.2124, %v1827_v28  ;;  %v1938_v63 = vmul.f32 0.2124, %v1828_v26 }
 0x1b7   : > { %v1877_v22 = vrot.slane %v1876_v13, 2  ;;  %v1883_v19 = vrot.slane %v1882_v49, 2  ;;  %1939 = vst [vmem:[%s5496_s11] sm:$0xff] %v1935_v59  ;;  %1940 = vst [vmem:[%s5496_s11 + $0x8] sm:$0xff] %v1936_v43  ;;  %v1943_v55 = vmul.f32 0.2124, %v1833_v27  ;;  %v1850_v56 = vadd.f32 %v1849_v20, %v5420_v32 }
 0x1b8   : > { %v1944_v57 = vmul.f32 0.2124, %v1834_v12  ;;  %v1872_v44 = vadd.f32 %v1871_v7, %v1870_v61  ;;  %v1889_v60 = vrot.slane %v1888_v42, 2  ;;  %1941 = vst [vmem:[%s5496_s11 + $0x10] sm:$0xff] %v1937_v34  ;;  %1942 = vst [vmem:[%s5496_s11 + $0x18] sm:$0xff] %v1938_v63  ;;  %v1909_v17 = vunpack.c.0.s8 %v5463_v50 }
 0x1b9   : > { %v1945_v36 = vmul.f32 0.2124, %v1835_v54  ;;  %v1946_v8 = vmul.f32 0.2124, %v1836_v21  ;;  %v1878_v11 = vadd.f32 %v1877_v22, %v1876_v13  ;;  %v1884_v29 = vadd.f32 %v1883_v19, %v1882_v49  ;;  %2173 = vst [vmem:[%s5496_s11 + $0x20] sm:$0xff] %v1943_v55 }
 0x1ba   : > { %2174 = vst [vmem:[%s5496_s11 + $0x28] sm:$0xff] %v1944_v57  ;;  %v1952_v47 = vmul.f32 0.2124, %v1841_v35  ;;  %v1953_v41 = vmul.f32 0.2124, %v1842_v45  ;;  %v1873_v10 = vrot.slane %v1872_v44, 1  ;;  %v1890_v48 = vadd.f32 %v1889_v60, %v1888_v42 }
 0x1bb   : > { %2175 = vst [vmem:[%s5496_s11 + $0x30] sm:$0xff] %v1945_v36  ;;  %2176 = vst [vmem:[%s5496_s11 + $0x38] sm:$0xff] %v1946_v8  ;;  %v1954_v51 = vmul.f32 0.2124, %v1843_v14  ;;  %v1955_v5 = vmul.f32 0.2124, %v1844_v58  ;;  %v1856_v62 = vadd.f32 %v1855_v46, %v5428_v0  ;;  %v1862_v31 = vadd.f32 %v1861_v15, %v5430_v24 }
 0x1bc   : > { %v1879_v18 = vrot.slane %v1878_v11, 1  ;;  %v1885_v39 = vrot.slane %v1884_v29, 1  ;;  %2177 = vst [vmem:[%s5496_s11 + $0x40] sm:$0xff] %v1952_v47  ;;  %2178 = vst [vmem:[%s5496_s11 + $0x48] sm:$0xff] %v1953_v41  ;;  %v1874_v38 = vadd.f32 %v1873_v10, %v1872_v44  ;;  %v1891_v37 = vrot.slane %v1890_v48, 1 }
 0x1bd   : > { %2179 = vst [vmem:[%s5496_s11 + $0x50] sm:$0xff] %v1954_v51  ;;  %2180 = vst [vmem:[%s5496_s11 + $0x58] sm:$0xff] %v1955_v5 }
 0x1be   : > { %v1880_v40 = vadd.f32 %v1879_v18, %v1878_v11  ;;  %v1886_v53 = vadd.f32 %v1885_v39, %v1884_v29 }
 0x1bf   : > { %2456 = shalt.err (!%p2453_p3)
}
 0x1c0   : > { %s2457_s28 = scalar_lea.hbm %s5508_s24, 1536  ;;  %s2461_s26 = scalar_lea.hbm %s5598_s5, 3072 }
 0x1c1   : > { %p2458_p13 = scmp.ne.s32.totalorder %s5508_s24, %s2457_s28  ;;  %p2462_p4 = scmp.lt.s32.totalorder %s5508_s24, %s5598_s5 }
 0x1c2   : > { %p2463_p7 = scmp.lt.s32.totalorder %s2461_s26, %s2457_s28 }
 0x1c3   : > { %p2459_p2 = pnand %p2458_p13, %p6611_p12 }
 0x1c4   : > { %p2464_p6 = por %p2463_p7, %p2462_p4 }
 0x1c5   : > { %p2460_p8 = pneg %p2459_p2 }
 0x1c7   : > { %p2465_p0 = pnand %p2464_p6, %p2460_p8 }
 0x1c9   : > { %2468 = shalt.err (!%p2465_p0)
}
 0x1ca   : > { %s2556_s25 = smov 512   ;;  %s2557_s13 = smov 32   ;;  %v1868_v32 = vadd.f32 %v1867_v25, %v5432_v23  ;;  %v1892_v0 = vadd.f32 %v1891_v37, %v1890_v48  ;;  %v1893_v24 = vmul.f32 0.0531, %v1874_v38  ;;  %v1894_v20 = vmul.f32 0.0531, %v1880_v40 }
 0x1cb   : > { %2205 = dma.vmem_to_hbm [thread:$0]  (%p6611_p12), %s5512_s23, 1536, %s5508_s24, %s1967_s27, %s2556_s25, %s2556_s25, %s2557_s13   ;;  %v1895_v50 = vmul.f32 0.0531, %v1886_v53  ;;  %v1912_v27 = vsub.s32 %v1909_v17, %v2795_v1  ;;  %v6612_v25 = vlaneseq }
 0x1cc   : > { %v1896_v46 = vmul.f32 0.0531, %v1892_v0  ;;  %v1897_v15 = vadd.f32 %v1893_v24, %v1850_v56  ;;  %v1898_v28 = vadd.f32 %v1894_v20, %v1856_v62  ;;  %s2189_s11 = sshll.u32 %s2668_s7, 6  ;;  %s331_s23 = scalar_lea.vmem [#allocation10], %s2167_s16 }
 0x1cd   : > { %v1899_v3 = vadd.f32 %v1895_v50, %v1862_v31  ;;  %s1981_s20 = sshll.u32 %s331_s23, 4  ;;  %vm1932_vm10 = vcmp.lt.s32.totalorder %v6612_v25, 512  ;;  %s1979_s27 = scalar_lea.hbm %s5597_s4, %s2189_s11  ;;  %s1982_s20 = int_to_ptr.vmem [resolvable:$true] %s1981_s20 }
 0x1ce   : > { %v1900_v12 = vadd.f32 %v1896_v46, %v1868_v32  ;;  %v1905_v26 = vcombine.low %v1897_v15, %v1898_v28  ;;  %s1962_s29 = scalar_lea.sflag [#allocation4], %s2773_s14  ;;  %s2469_s12 = scalar_lea.vmem %s1982_s20, 64 }
 0x1cf   : > { %p2470_p1 = scmp.ne.s32.totalorder %s1982_s20, %s2469_s12  ;;  %s2558_s7 = smov [#allocation10]  }
 0x1d0   : > { %v1906_v54 = vcombine.low %v1899_v3, %v1900_v12  ;;  %v1913_v16 = vrot.slane %v1905_v26, %v1912_v27  ;;  %s2473_s15 = sshll.u32 %s2558_s7, 4  ;;  %s2474_s15 = int_to_ptr.vmem [resolvable:$false] %s2473_s15 }
 0x1d1   : > { %p2471_p5 = pnand %p2470_p1, %p6611_p12  ;;  %s2475_s16 = scalar_lea.vmem %s2474_s15, 128 }
 0x1d2   : > { %v1920_v52 = vrot.slane %v1906_v54, %v1912_v27  ;;  %p2476_p10 = scmp.lt.s32.totalorder %s1982_s20, %s2474_s15  ;;  %p2477_p11 = scmp.lt.s32.totalorder %s2475_s16, %s2469_s12 }
 0x1d3   : > { %p2472_p9 = pneg %p2471_p5 }
 0x1d4   : > { %v1921_v23 = vcombine.low %v1913_v16, %v1920_v52  ;;  %p2478_p3 = por %p2477_p11, %p2476_p10 }
 0x1d6   : > { %v1928_v21 = vrot.slane %v1921_v23, %v1912_v27  ;;  %p2479_p13 = pnand %p2478_p3, %p2472_p9 }
 0x1d8   : > { %1934 = vst.msk [vmem:[%s331_s23] sm:$0xf] %vm1932_vm10, %v1928_v21 }
 0x1d9   : > { %2482 = shalt.err (!%p2479_p13)
}
 0x1da   : > { %s2483_s17 = scalar_lea.hbm %s1979_s27, 64  ;;  %s2487_s30 = scalar_lea.hbm %s5597_s4, 128 }
 0x1db   : > { %p2484_p2 = scmp.ne.s32.totalorder %s1979_s27, %s2483_s17  ;;  %p2488_p7 = scmp.lt.s32.totalorder %s1979_s27, %s5597_s4 }
 0x1dc   : > { %p2489_p6 = scmp.lt.s32.totalorder %s2487_s30, %s2483_s17 }
 0x1dd   : > { %p2485_p8 = pnand %p2484_p2, %p6611_p12 }
 0x1de   : > { %p2490_p0 = por %p2489_p6, %p2488_p7 }
 0x1df   : > { %p2486_p4 = pneg %p2485_p8 }
 0x1e1   : > { %p2491_p1 = pnand %p2490_p0, %p2486_p4 }
 0x1e3   : > { %2494 = shalt.err (!%p2491_p1)
}
 0x1e4   : > { %2204 = dma.vmem_to_hbm [thread:$0]  (%p6611_p12), %s1982_s20, 64, %s1979_s27, %s1962_s29  }
 0x1e5 PF: > { %s2009_s9 = sand.u32 1, %s2533_s18   ;;  %p6613_p5 = scmp.ne.s32.totalorder %s5829_s10, 0 }
 0x1e6   : > { %p6614_p9 = scmp.ge.s32.totalorder %s2545_s21, 2  ;;  %s2010_s2 = scalar_lea.sflag [#allocation4], %s2009_s9 }
 0x1e8   : > { %p2223_p10 = pnand %p6614_p9, %p6613_p5 }
 0x1ea   : > { %p2224_p11 = pneg %p2223_p10 }
 0x1ec   : > { %2524 = dma.done.wait (%p2224_p11), %s2010_s2, 64  }
 0x1ed   : > { %2526 = vsyncadd (%p2224_p11), %s2010_s2, 4294967232  ;;  %s2019_s25 = scalar_lea.sflag [#allocation12], %s2009_s9 }
 0x1ee   : > { %2528 = dma.done.wait (%p2224_p11), %s2019_s25, 1536  }
 0x1ef   : > { %2530 = vsyncadd (%p2224_p11), %s2019_s25, 4294965760  ;;  %s6615_s21 = sld [smem:[#allocation19_spill]]  ;;  %s6618_s18 = smov %s2537_s19 }
 0x1f0   : > { %s6616_s13 = sld [smem:[#allocation18_spill]] }
 0x1f1   : > { %s6617_s20 = sld [smem:[#allocation20_spill]] }
 0x1f5   : > { %p26_p12 = scmp.ge.s32.totalorder %s6615_s21, 4  }
 0x1f6   : > { %s6619_s19 = smov %s6616_s13 }
 0x1f7   :  { %28 = sbr.rel (!%p26_p12) target bundleno = 12 (0xc), region = 129 }
 0x1fc   :  { %2024 = vsyncpa [#allocation3], 1 }
 0x1fd   :  { %2026 = vsyncpa [#allocation3 + $0x1], 1 }
 0x1fe   :  { %2027 = vsyncpa [#allocation8], 1 }
 0x1ff   :  { %2029 = vsyncpa [#allocation8 + $0x1], 1 }
 0x200   :  { %2030 = vsyncpa [#allocation4], 1 }
 0x201   :  { %2032 = vsyncpa [#allocation4 + $0x1], 1 }
 0x202   :  { %2033 = vsyncpa [#allocation12], 1 }
 0x203   :  { %2035 = vsyncpa [#allocation12 + $0x1], 1 }
 0x204   :  { %2036 = vsyncpa [#allocation5], 1 }
 0x205   :  { %2038 = vsyncpa [#allocation5 + $0x1], 1 }

</bundles_post_ra>
